<compile_context>
chip_gen: v6e
topology: v6e:2x2x1
jax: 0.10.0
libtpu: 0.0.40
codegen_flags: <defaults>
</compile_context>

<pallas_src>
import functools

import numpy as np
import jax
import jax.numpy as jnp
from jax.experimental import pallas as pl
from jax.experimental.pallas import tpu as pltpu


def _round_up(v, m):
    return (v + m - 1) // m * m


# ----------------------------------------------------------------- kernel 1
def _xw_kernel(x_ref, wcat_ref, bln_ref, x0_ref, xw12_ref):
    """xw_all = x @ [W_ln^T | W1 | W2]; writes x0 (+b_ln) and xw1|xw2."""
    xw = jnp.dot(x_ref[...], wcat_ref[...],
                 preferred_element_type=jnp.float32)
    op = x0_ref.shape[-1]                       # padded per-branch width
    x0_ref[...] = xw[:, :op] + bln_ref[...]
    xw12_ref[...] = xw[:, op:].astype(xw12_ref.dtype)


# ----------------------------------------------------------------- kernel 2
def _agg_kernel(a1_ref, a2_ref, xw_ref, b_ref, out_ref, *, tile_k, xw_resident):
    """[x1 | x2] = [A1 @ xw1 | A2 @ xw2] + [b1 | b2]; reduction over k tiles.

    Accumulates directly into the (VMEM-resident) output block; no scratch.
    """
    k = pl.program_id(1)

    @pl.when(k == 0)
    def _init():
        out_ref[...] = jnp.zeros_like(out_ref)

    if xw_resident:
        # xw1|xw2 is a single resident block; pick this reduction step's rows.
        start = pl.multiple_of(k * tile_k, tile_k)
        xw = xw_ref[pl.ds(start, tile_k), :]
    else:
        xw = xw_ref[...]

    op = out_ref.shape[-1] // 2
    a1 = a1_ref[...]
    a2 = a2_ref[...]
    if a1.dtype != xw.dtype:
        # int8 / fp8 adjacency: upcast via f32 (scale already folded into xw).
        a1 = a1.astype(jnp.float32).astype(xw.dtype)
        a2 = a2.astype(jnp.float32).astype(xw.dtype)

    out_ref[:, :op] = out_ref[:, :op] + jnp.dot(
        a1, xw[:, :op], preferred_element_type=jnp.float32)
    out_ref[:, op:] = out_ref[:, op:] + jnp.dot(
        a2, xw[:, op:], preferred_element_type=jnp.float32)

    @pl.when(k == pl.num_programs(1) - 1)
    def _finalize():
        out_ref[...] = out_ref[...] + b_ref[...]


# -------------------------------------------------------------------- glue
def _edges_to_dense_adj(edge_index, edge_weight, num_nodes):
    """A[dst, src] += w  (source_to_target, 'add' aggregation)."""
    src = edge_index[0]
    dst = edge_index[1]
    a = jnp.zeros((num_nodes, num_nodes), dtype=jnp.float32)
    return a.at[dst, src].add(edge_weight.astype(jnp.float32))


def _quantize_adj(a_f32, adj_dtype):
    """Cast/quantize a dense f32 adjacency to its streaming dtype.

    int8 uses a per-matrix scale s (A ~= s * A_q); the caller folds s into the
    corresponding weight columns so no in-kernel rescale is needed.
    """
    if np.dtype(adj_dtype) == np.dtype(jnp.int8):
        s = jnp.maximum(jnp.max(jnp.abs(a_f32)), 1e-12) / 127.0
        q = jnp.clip(jnp.round(a_f32 / s), -127.0, 127.0).astype(jnp.int8)
        return q, s
    return a_f32.astype(adj_dtype), jnp.float32(1.0)


@functools.partial(jax.jit,
                   static_argnames=("num_nodes", "adj_dtype", "tile",
                                    "resident_xw"))
def digcn_inception_block(x, edge_index, edge_weight,
                          edge_index2, edge_weight2,
                          params, *, num_nodes, adj_dtype=jnp.bfloat16,
                          tile=512, resident_xw=None):
    """JAX/Pallas equivalent of DiGCN_InceptionBlock.forward.

    adj_dtype: streaming dtype of the dense propagation operators.
      * jnp.bfloat16 (default), jnp.int8 (v5e/v6e byte reduction,
        per-matrix scale), jnp.float8_e4m3fn (v7x), jnp.float32 (f32 math).
    tile: adjacency tile for the aggregation kernel (512 default; 1024 is fine
      on v6e/v5e with the raised VMEM limit below, keep <=1024 on v7x/64MiB).
    """
    w_ln, b_ln = params["w_ln"], params["b_ln"]
    w1, b1 = params["w1"], params["b1"]
    w2, b2 = params["w2"], params["b2"]

    n, in_dim = x.shape
    out_dim = w_ln.shape[0]
    op = _round_up(out_dim, 128)                  # lane-dense branch width

    exact_f32 = np.dtype(adj_dtype) == np.dtype(jnp.float32)
    msg_dtype = jnp.float32 if exact_f32 else jnp.bfloat16
    msg_bytes = np.dtype(msg_dtype).itemsize
    adj_bytes = np.dtype(adj_dtype).itemsize

    # Pad N up to a multiple of the adjacency tile (a few hundred zero rows are
    # far cheaper than degrading to 128-tiles).  Kernel 1 uses a decoupled,
    # larger row tile since its per-step VMEM footprint is tiny.
    tile2 = int(tile)
    n_pad = _round_up(max(n, num_nodes), tile2)
    grid_rows = n_pad // tile2
    tile1 = next(t for t in (2048, 1024, 512, 256, 128) if n_pad % t == 0)

    # Dense propagation operators.
    # TODO(synk): replace this O(N^2) densify with a CSR row-ptr/col-idx gather
    # via PrefetchScalarGridSpec for genuinely sparse graphs.
    a1, s1 = _quantize_adj(
        _edges_to_dense_adj(edge_index, edge_weight, n_pad), adj_dtype)
    a2, s2 = _quantize_adj(
        _edges_to_dense_adj(edge_index2, edge_weight2, n_pad), adj_dtype)

    # Node features / packed weights in the MXU streaming dtype.  The int8
    # adjacency scales are folded into the W1/W2 columns here.
    x_pad = jnp.zeros((n_pad, in_dim), msg_dtype).at[:n].set(
        x.astype(msg_dtype))

    w_cat = jnp.zeros((in_dim, 3 * op), jnp.float32)
    w_cat = w_cat.at[:, :out_dim].set(w_ln.T.astype(jnp.float32))
    w_cat = w_cat.at[:, op:op + out_dim].set(w1.astype(jnp.float32) * s1)
    w_cat = w_cat.at[:, 2 * op:2 * op + out_dim].set(w2.astype(jnp.float32) * s2)
    w_cat = w_cat.astype(msg_dtype)

    bln = jnp.zeros((1, op), jnp.float32).at[0, :out_dim].set(b_ln)
    b12 = jnp.zeros((1, 2 * op), jnp.float32)
    b12 = b12.at[0, :out_dim].set(b1).at[0, op:op + out_dim].set(b2)

    # ---- kernel 1: fused x-side matmul (x0 + messages) --------------------
    x0_pad, xw12 = pl.pallas_call(
        _xw_kernel,
        grid=(n_pad // tile1,),
        in_specs=[
            pl.BlockSpec((tile1, in_dim), lambda i: (i, 0)),
            pl.BlockSpec((in_dim, 3 * op), lambda i: (0, 0)),
            pl.BlockSpec((1, op), lambda i: (0, 0)),
        ],
        out_specs=(
            pl.BlockSpec((tile1, op), lambda i: (i, 0)),
            pl.BlockSpec((tile1, 2 * op), lambda i: (i, 0)),
        ),
        out_shape=(
            jax.ShapeDtypeStruct((n_pad, op), jnp.float32),
            jax.ShapeDtypeStruct((n_pad, 2 * op), msg_dtype),
        ),
        compiler_params=pltpu.CompilerParams(
            dimension_semantics=("parallel",)),
    )(x_pad, w_cat, bln)

    # ---- kernel 2: tiled A @ xw aggregation, accumulate into out block ----
    if resident_xw is None:
        resident_xw = n_pad * 2 * op * msg_bytes <= 4 * 1024 * 1024
    if resident_xw:
        xw_spec = pl.BlockSpec((n_pad, 2 * op), lambda i, k: (0, 0))
    else:
        xw_spec = pl.BlockSpec((tile2, 2 * op), lambda i, k: (k, 0))

    k2_vmem = (2 * 2 * tile2 * tile2 * adj_bytes            # A1/A2, 2 buffers
               + 2 * tile2 * 2 * op * 4                     # out block, 2 buf
               + (n_pad if resident_xw else 2 * tile2) * 2 * op * msg_bytes
               + 2 * 2 * op * 4)                             # bias
    vmem_limit = int(min(max(2 * k2_vmem, 32 * 1024 * 1024), 64 * 1024 * 1024))

    y12 = pl.pallas_call(
        functools.partial(_agg_kernel, tile_k=tile2, xw_resident=resident_xw),
        grid=(grid_rows, n_pad // tile2),
        in_specs=[
            pl.BlockSpec((tile2, tile2), lambda i, k: (i, k)),      # A1 tile
            pl.BlockSpec((tile2, tile2), lambda i, k: (i, k)),      # A2 tile
            xw_spec,                                                # xw1|xw2
            pl.BlockSpec((1, 2 * op), lambda i, k: (0, 0)),         # b1|b2
        ],
        out_specs=pl.BlockSpec((tile2, 2 * op), lambda i, k: (i, 0)),
        out_shape=jax.ShapeDtypeStruct((n_pad, 2 * op), jnp.float32),
        compiler_params=pltpu.CompilerParams(
            dimension_semantics=("parallel", "arbitrary"),
            vmem_limit_bytes=vmem_limit),
    )(a1, a2, xw12, b12)

    x0 = x0_pad[:n, :out_dim]
    x1 = y12[:n, :out_dim]
    x2 = y12[:n, op:op + out_dim]
    return x0, x1, x2


# ------------------------------------------------------------------- params
def init_params(key, in_dim, out_dim):
    """Deterministic parameter init mirroring the PyTorch module shapes."""
    k_lnw, k_lnb, k_w1, k_w2 = jax.random.split(key, 4)
    bound = 1.0 / jnp.sqrt(in_dim)
    w_ln = jax.random.uniform(k_lnw, (out_dim, in_dim), jnp.float32,
                              -bound, bound)
    b_ln = jax.random.uniform(k_lnb, (out_dim,), jnp.float32, -bound, bound)
    glorot = jnp.sqrt(6.0 / (in_dim + out_dim))
    w1 = jax.random.uniform(k_w1, (in_dim, out_dim), jnp.float32,
                            -glorot, glorot)
    w2 = jax.random.uniform(k_w2, (in_dim, out_dim), jnp.float32,
                            -glorot, glorot)
    b1 = jnp.zeros((out_dim,), jnp.float32)
    b2 = jnp.zeros((out_dim,), jnp.float32)
    return {"w_ln": w_ln, "b_ln": b_ln, "w1": w1, "b1": b1,
            "w2": w2, "b2": b2}


# --------------------------------------------------------------- reference
def _reference(x, ei, ew, ei2, ew2, params, num_nodes, adj_dtype):
    """Pure-JAX forward whose numerics mirror the kernel's dtype path.

    With adj_dtype=float32 this is the module-faithful f32 math; the quantized
    paths (bf16 / int8 / fp8) intentionally deviate from the PyTorch module's
    f32 math and are validated against this dtype-matched reference.
    """
    f32 = jnp.float32
    exact_f32 = np.dtype(adj_dtype) == np.dtype(jnp.float32)
    msg_dt = f32 if exact_f32 else jnp.bfloat16

    a1, s1 = _quantize_adj(_edges_to_dense_adj(ei, ew, num_nodes), adj_dtype)
    a2, s2 = _quantize_adj(_edges_to_dense_adj(ei2, ew2, num_nodes), adj_dtype)

    xq = x.astype(msg_dt).astype(f32)
    wlnq = params["w_ln"].astype(msg_dt).astype(f32)
    w1q = (params["w1"].astype(f32) * s1).astype(msg_dt).astype(f32)
    w2q = (params["w2"].astype(f32) * s2).astype(msg_dt).astype(f32)

    x0 = xq @ wlnq.T + params["b_ln"]
    xw1 = (xq @ w1q).astype(msg_dt).astype(f32)
    xw2 = (xq @ w2q).astype(msg_dt).astype(f32)
    x1 = a1.astype(f32) @ xw1 + params["b1"]
    x2 = a2.astype(f32) @ xw2 + params["b2"]
    return x0, x1, x2


if __name__ == "__main__":
    key = jax.random.PRNGKey(0)
    k_x, k_e1, k_w1, k_e2, k_w2, k_p = jax.random.split(key, 6)

    N, IN_DIM, OUT_DIM, E = 16, 8, 16, 24

    x = jax.random.normal(k_x, (N, IN_DIM), jnp.float32)
    edge_index = jax.random.randint(k_e1, (2, E), 0, N, jnp.int32)
    edge_weight = jax.random.uniform(k_w1, (E,), jnp.float32, 0.1, 1.0)
    edge_index2 = jax.random.randint(k_e2, (2, E), 0, N, jnp.int32)
    edge_weight2 = jax.random.uniform(k_w2, (E,), jnp.float32, 0.1, 1.0)

    params = init_params(k_p, IN_DIM, OUT_DIM)

    def _check(tag, outs, refs, atol, rtol):
        for name, o, r in zip(("x0", "x1", "x2"), outs, refs):
            assert jnp.allclose(o, r, atol=atol, rtol=rtol), (
                f"{name} mismatch ({tag}); "
                f"max err {float(jnp.max(jnp.abs(o - r)))}")

    # 1) Default: bf16 features/messages + bf16 adjacency streaming.
    outs = digcn_inception_block(x, edge_index, edge_weight,
                                 edge_index2, edge_weight2, params,
                                 num_nodes=N)
    jax.block_until_ready(outs)
    refs = _reference(x, edge_index, edge_weight, edge_index2, edge_weight2,
                      params, N, jnp.bfloat16)
    _check("bf16", outs, refs, 2e-2, 2e-2)

    # 2) int8 adjacency (per-matrix scale folded into W1/W2): the byte-
    #    reduction path for v5e/v6e.  (Use jnp.float8_e4m3fn on v7x.)
    outs = digcn_inception_block(x, edge_index, edge_weight,
                                 edge_index2, edge_weight2, params,
                                 num_nodes=N, adj_dtype=jnp.int8)
    jax.block_until_ready(outs)
    refs = _reference(x, edge_index, edge_weight, edge_index2, edge_weight2,
                      params, N, jnp.int8)
    _check("int8", outs, refs, 2e-2, 2e-2)

    # 3) f32 mode (module-faithful math), forcing the tiled (non-resident)
    #    xw path so both kernel-2 variants are exercised.
    outs = digcn_inception_block(x, edge_index, edge_weight,
                                 edge_index2, edge_weight2, params,
                                 num_nodes=N, adj_dtype=jnp.float32,
                                 resident_xw=False)
    jax.block_until_ready(outs)
    refs = _reference(x, edge_index, edge_weight, edge_index2, edge_weight2,
                      params, N, jnp.float32)
    _check("f32", outs, refs, 5e-4, 5e-4)

    print("KERNEL_OK")
</pallas_src>

<mosaic_0001>
module attributes {stable_mosaic.version = 11 : i64} {
  func.func private @main(%arg0: i32) attributes {dimension_semantics = [#tpu.dimension_semantics<core_parallel>], iteration_bounds = array<i64: 2>, tpu.core_type = #tpu.core_type<sc_scalar_subcore>, window_params = []} {
    return
  }
}

module attributes {stable_mosaic.version = 11 : i64} {
  func.func private @main(%arg0: i32) attributes {dimension_semantics = [#tpu.dimension_semantics<core_parallel>], iteration_bounds = array<i64: 2>, tpu.core_type = #tpu.core_type<sc_scalar_subcore>, window_params = []} {
    return
  }
}

module attributes {stable_mosaic.version = 11 : i64} {
  func.func @_xw_kernel(%arg0: i32, %arg1: memref<512x8xbf16, #tpu.memory_space<vmem>>, %arg2: memref<8x384xbf16, #tpu.memory_space<vmem>>, %arg3: memref<1x128xf32, #tpu.memory_space<vmem>>, %arg4: memref<512x128xf32, #tpu.memory_space<vmem>>, %arg5: memref<512x256xbf16, #tpu.memory_space<vmem>>) attributes {dimension_semantics = [#tpu.dimension_semantics<parallel>], iteration_bounds = array<i64: 1>, scalar_prefetch = 0 : i64, scratch_operands = 0 : i64, tpu.core_type = #tpu.core_type<tc>, window_params = [{transform_indices = @transform_0, window_bounds = array<i64: 512, 8>}, {pipeline_mode = #tpu.pipeline_mode<synchronous>, transform_indices = @transform_1, window_bounds = array<i64: 8, 384>}, {pipeline_mode = #tpu.pipeline_mode<synchronous>, transform_indices = @transform_2, window_bounds = array<i64: 1, 128>}, {transform_indices = @transform_3, window_bounds = array<i64: 512, 128>}, {transform_indices = @transform_4, window_bounds = array<i64: 512, 256>}]} {
    %c0 = arith.constant 0 : index
    %c0_0 = arith.constant 0 : index
    %0 = vector.load %arg1[%c0, %c0_0] : memref<512x8xbf16, #tpu.memory_space<vmem>>, vector<512x8xbf16>
    %c0_1 = arith.constant 0 : index
    %c0_2 = arith.constant 0 : index
    %1 = vector.load %arg2[%c0_1, %c0_2] : memref<8x384xbf16, #tpu.memory_space<vmem>>, vector<8x384xbf16>
    %cst = arith.constant dense<0.000000e+00> : vector<512x384xf32>
    %2 = tpu.matmul %0, %1, %cst {dimension_numbers = #tpu.dot_dimension_numbers<[1], [0], [0], [1], [0, 0, 1, 1], [], []>} : vector<512x8xbf16>, vector<8x384xbf16>, vector<512x384xf32> -> vector<512x384xf32>
    %3 = vector.extract_strided_slice %2 {offsets = [0, 0], sizes = [512, 128], strides = [1, 1]} : vector<512x384xf32> to vector<512x128xf32>
    %c0_3 = arith.constant 0 : index
    %c0_4 = arith.constant 0 : index
    %4 = vector.load %arg3[%c0_3, %c0_4] : memref<1x128xf32, #tpu.memory_space<vmem>>, vector<1x128xf32>
    %5 = vector.broadcast %4 : vector<1x128xf32> to vector<512x128xf32>
    %6 = arith.addf %3, %5 : vector<512x128xf32>
    %c0_5 = arith.constant 0 : index
    %c0_6 = arith.constant 0 : index
    %7 = vector.load %arg4[%c0_5, %c0_6] : memref<512x128xf32, #tpu.memory_space<vmem>>, vector<512x128xf32>
    tpu.vector_store %arg4[%c0_5, %c0_6], %6 {strides = array<i32>} : memref<512x128xf32, #tpu.memory_space<vmem>>, vector<512x128xf32>,
    %8 = vector.extract_strided_slice %2 {offsets = [0, 128], sizes = [512, 256], strides = [1, 1]} : vector<512x384xf32> to vector<512x256xf32>
    %9 = arith.truncf %8 : vector<512x256xf32> to vector<512x256xbf16>
    %c0_7 = arith.constant 0 : index
    %c0_8 = arith.constant 0 : index
    %10 = vector.load %arg5[%c0_7, %c0_8] : memref<512x256xbf16, #tpu.memory_space<vmem>>, vector<512x256xbf16>
    tpu.vector_store %arg5[%c0_7, %c0_8], %9 {strides = array<i32>} : memref<512x256xbf16, #tpu.memory_space<vmem>>, vector<512x256xbf16>,
    return
  }
  func.func @transform_0(%arg0: i32) -> (i32, i32) {
    %c0_i32 = arith.constant 0 : i32
    %c0_i32_0 = arith.constant 0 : i32
    return %arg0, %c0_i32 : i32, i32
  }
  func.func @transform_1(%arg0: i32) -> (i32, i32) {
    %c0_i32 = arith.constant 0 : i32
    %c0_i32_0 = arith.constant 0 : i32
    %c0_i32_1 = arith.constant 0 : i32
    return %c0_i32, %c0_i32_0 : i32, i32
  }
  func.func @transform_2(%arg0: i32) -> (i32, i32) {
    %c0_i32 = arith.constant 0 : i32
    %c0_i32_0 = arith.constant 0 : i32
    %c0_i32_1 = arith.constant 0 : i32
    return %c0_i32, %c0_i32_0 : i32, i32
  }
  func.func @transform_3(%arg0: i32) -> (i32, i32) {
    %c0_i32 = arith.constant 0 : i32
    %c0_i32_0 = arith.constant 0 : i32
    return %arg0, %c0_i32 : i32, i32
  }
  func.func @transform_4(%arg0: i32) -> (i32, i32) {
    %c0_i32 = arith.constant 0 : i32
    %c0_i32_0 = arith.constant 0 : i32
    return %arg0, %c0_i32 : i32, i32
  }
}

module attributes {stable_mosaic.version = 11 : i64} {
  func.func @_agg_kernel(%arg0: i32, %arg1: i32, %arg2: memref<512x512xbf16, #tpu.memory_space<vmem>>, %arg3: memref<512x512xbf16, #tpu.memory_space<vmem>>, %arg4: memref<512x256xbf16, #tpu.memory_space<vmem>>, %arg5: memref<1x256xf32, #tpu.memory_space<vmem>>, %arg6: memref<512x256xf32, #tpu.memory_space<vmem>>) attributes {dimension_semantics = [#tpu.dimension_semantics<parallel>, #tpu.dimension_semantics<arbitrary>], iteration_bounds = array<i64: 1, 1>, scalar_prefetch = 0 : i64, scratch_operands = 0 : i64, tpu.core_type = #tpu.core_type<tc>, window_params = [{transform_indices = @transform_0, window_bounds = array<i64: 512, 512>}, {transform_indices = @transform_1, window_bounds = array<i64: 512, 512>}, {pipeline_mode = #tpu.pipeline_mode<synchronous>, transform_indices = @transform_2, window_bounds = array<i64: 512, 256>}, {pipeline_mode = #tpu.pipeline_mode<synchronous>, transform_indices = @transform_3, window_bounds = array<i64: 1, 256>}, {transform_indices = @transform_4, window_bounds = array<i64: 512, 256>}]} {
    %c0_i32 = arith.constant 0 : i32
    %0 = arith.cmpi eq, %arg1, %c0_i32 : i32
    %1 = arith.extui %0 : i1 to i32
    %c0_i32_0 = arith.constant 0 : i32
    %2 = arith.cmpi ne, %1, %c0_i32_0 : i32
    scf.if %2 {
      %cst_15 = arith.constant 0.000000e+00 : f32
      %22 = vector.broadcast %cst_15 : f32 to vector<512x256xf32>
      %c0_16 = arith.constant 0 : index
      %c0_17 = arith.constant 0 : index
      %23 = vector.load %arg6[%c0_16, %c0_17] : memref<512x256xf32, #tpu.memory_space<vmem>>, vector<512x256xf32>
      tpu.vector_store %arg6[%c0_16, %c0_17], %22 {strides = array<i32>} : memref<512x256xf32, #tpu.memory_space<vmem>>, vector<512x256xf32>,
    } else {
    }
    %c512_i32 = arith.constant 512 : i32
    %3 = arith.muli %arg1, %c512_i32 : i32
    %4 = tpu.assume_multiple %3, 512 : i32
    %5 = arith.index_cast %4 : i32 to index
    %c0 = arith.constant 0 : index
    %6 = vector.load %arg4[%5, %c0] : memref<512x256xbf16, #tpu.memory_space<vmem>>, vector<512x256xbf16>
    %c0_1 = arith.constant 0 : index
    %c0_2 = arith.constant 0 : index
    %7 = vector.load %arg2[%c0_1, %c0_2] : memref<512x512xbf16, #tpu.memory_space<vmem>>, vector<512x512xbf16>
    %c0_3 = arith.constant 0 : index
    %c0_4 = arith.constant 0 : index
    %8 = vector.load %arg3[%c0_3, %c0_4] : memref<512x512xbf16, #tpu.memory_space<vmem>>, vector<512x512xbf16>
    %c0_5 = arith.constant 0 : index
    %c0_6 = arith.constant 0 : index
    %9 = vector.load %arg6[%c0_5, %c0_6] : memref<512x256xf32, #tpu.memory_space<vmem>>, vector<512x128xf32>
    %10 = vector.extract_strided_slice %6 {offsets = [0, 0], sizes = [512, 128], strides = [1, 1]} : vector<512x256xbf16> to vector<512x128xbf16>
    %cst = arith.constant dense<0.000000e+00> : vector<512x128xf32>
    %11 = tpu.matmul %7, %10, %cst {dimension_numbers = #tpu.dot_dimension_numbers<[1], [0], [0], [1], [0, 0, 1, 1], [], []>} : vector<512x512xbf16>, vector<512x128xbf16>, vector<512x128xf32> -> vector<512x128xf32>
    %12 = arith.addf %9, %11 : vector<512x128xf32>
    %c0_7 = arith.constant 0 : index
    %c0_8 = arith.constant 0 : index
    %13 = vector.load %arg6[%c0_7, %c0_8] : memref<512x256xf32, #tpu.memory_space<vmem>>, vector<512x128xf32>
    tpu.vector_store %arg6[%c0_7, %c0_8], %12 {strides = array<i32>} : memref<512x256xf32, #tpu.memory_space<vmem>>, vector<512x128xf32>,
    %c0_9 = arith.constant 0 : index
    %c128 = arith.constant 128 : index
    %14 = vector.load %arg6[%c0_9, %c128] : memref<512x256xf32, #tpu.memory_space<vmem>>, vector<512x128xf32>
    %15 = vector.extract_strided_slice %6 {offsets = [0, 128], sizes = [512, 128], strides = [1, 1]} : vector<512x256xbf16> to vector<512x128xbf16>
    %cst_10 = arith.constant dense<0.000000e+00> : vector<512x128xf32>
    %16 = tpu.matmul %8, %15, %cst_10 {dimension_numbers = #tpu.dot_dimension_numbers<[1], [0], [0], [1], [0, 0, 1, 1], [], []>} : vector<512x512xbf16>, vector<512x128xbf16>, vector<512x128xf32> -> vector<512x128xf32>
    %17 = arith.addf %14, %16 : vector<512x128xf32>
    %c0_11 = arith.constant 0 : index
    %c128_12 = arith.constant 128 : index
    %18 = vector.load %arg6[%c0_11, %c128_12] : memref<512x256xf32, #tpu.memory_space<vmem>>, vector<512x128xf32>
    tpu.vector_store %arg6[%c0_11, %c128_12], %17 {strides = array<i32>} : memref<512x256xf32, #tpu.memory_space<vmem>>, vector<512x128xf32>,
    %c0_i32_13 = arith.constant 0 : i32
    %19 = arith.cmpi eq, %arg1, %c0_i32_13 : i32
    %20 = arith.extui %19 : i1 to i32
    %c0_i32_14 = arith.constant 0 : i32
    %21 = arith.cmpi ne, %20, %c0_i32_14 : i32
    scf.if %21 {
      %c0_15 = arith.constant 0 : index
      %c0_16 = arith.constant 0 : index
      %22 = vector.load %arg6[%c0_15, %c0_16] : memref<512x256xf32, #tpu.memory_space<vmem>>, vector<512x256xf32>
      %c0_17 = arith.constant 0 : index
      %c0_18 = arith.constant 0 : index
      %23 = vector.load %arg5[%c0_17, %c0_18] : memref<1x256xf32, #tpu.memory_space<vmem>>, vector<1x256xf32>
      %24 = vector.broadcast %23 : vector<1x256xf32> to vector<512x256xf32>
      %25 = arith.addf %22, %24 : vector<512x256xf32>
      %c0_19 = arith.constant 0 : index
      %c0_20 = arith.constant 0 : index
      %26 = vector.load %arg6[%c0_19, %c0_20] : memref<512x256xf32, #tpu.memory_space<vmem>>, vector<512x256xf32>
      tpu.vector_store %arg6[%c0_19, %c0_20], %25 {strides = array<i32>} : memref<512x256xf32, #tpu.memory_space<vmem>>, vector<512x256xf32>,
    } else {
    }
    return
  }
  func.func @transform_0(%arg0: i32, %arg1: i32) -> (i32, i32) {
    %c0_i32 = arith.constant 0 : i32
    return %arg0, %arg1 : i32, i32
  }
  func.func @transform_1(%arg0: i32, %arg1: i32) -> (i32, i32) {
    %c0_i32 = arith.constant 0 : i32
    return %arg0, %arg1 : i32, i32
  }
  func.func @transform_2(%arg0: i32, %arg1: i32) -> (i32, i32) {
    %c0_i32 = arith.constant 0 : i32
    %c0_i32_0 = arith.constant 0 : i32
    %c0_i32_1 = arith.constant 0 : i32
    return %c0_i32, %c0_i32_0 : i32, i32
  }
  func.func @transform_3(%arg0: i32, %arg1: i32) -> (i32, i32) {
    %c0_i32 = arith.constant 0 : i32
    %c0_i32_0 = arith.constant 0 : i32
    %c0_i32_1 = arith.constant 0 : i32
    return %c0_i32, %c0_i32_0 : i32, i32
  }
  func.func @transform_4(%arg0: i32, %arg1: i32) -> (i32, i32) {
    %c0_i32 = arith.constant 0 : i32
    %c0_i32_0 = arith.constant 0 : i32
    return %arg0, %c0_i32 : i32, i32
  }
}

</mosaic_0001>

<bundles_post_ra>
// kernel: digcn_inception_block.2
= control target key start
LH: loop header
LB: loop body
LE: loop exit
PB: predicated region body
PF: predicated region fallthrough
CT: control target
= control target key end

     0   :  { %vm348_vm0 = vcmask 1043456   ;;  %v1958_v1 = vmov 0   ;;  %vm251_vm1 = vcmask 64512   ;;  %s2804_s1 = inlined_call_operand.vmem [shape: bf16[8,384], index: 1, kind: input, shape index: {}]   ;;  %s2805_s0 = inlined_call_operand.vmem [shape: bf16[512,8], index: 0, kind: input, shape index: {}]   ;;  %s2806_s2 = inlined_call_operand.vmem [shape: f32[1,128], index: 2, kind: input, shape index: {}]   ;;  %s2807_s3 = inlined_call_operand.vmem [shape: f32[512,128], index: 3, kind: output, shape index: {0}]   ;;  %s2808_s4 = inlined_call_operand.vmem [shape: bf16[512,256], index: 4, kind: output, shape index: {1}]  }
   0x1   :  { %v81_v0 = vld [vmem:[%s2804_s1] sm:$0xff]  ;;  %390 = vmatprep.mubr.bf16.mxu0 %v1958_v1  ;;  %630 = vmatprep.mubr.bf16.mxu1 %v1958_v1  ;;  %v1924_v3 = vld [vmem:[%s2804_s1 + $0x8] ss:$0 sps:$4 sm:$0xff]   ;;  %v1930_v11 = vld [vmem:[%s2805_s0 + $0x10] sm:$0xff]  }
   0x2   :  { %v1624_v2 = vcombine.high %v81_v0, %v81_v0  ;;  %v1623_v4 = vcombine.low %v81_v0, %v81_v0  ;;  %v1926_v5 = vld [vmem:[%s2805_s0] sm:$0xff]   ;;  %v356_v8 = vsel %vm348_vm0, %v1924_v3, 0  ;;  %v1928_v9 = vld [vmem:[%s2805_s0 + $0x8] sm:$0xff]   ;;  %v2029_v12 = vld [vmem:[%s2805_s0 + $0xd0] sm:$0xff]  }
   0x3   :  { %v2001_v7 = vld [vmem:[%s2805_s0 + $0xc0] sm:$0xff]   ;;  %v2016_v10 = vld [vmem:[%s2805_s0 + $0xc8] sm:$0xff]   ;;  %v1932_v13 = vld [vmem:[%s2805_s0 + $0x18] sm:$0xff]  }
   0x4   :  { %1626 = vmatprep.subr.msk.bf16.mxu0 %vm348_vm0, %v1624_v2  ;;  %1919 = vmatprep.subr.msk.bf16.mxu1 %vm348_vm0, %v1624_v2  ;;  %v350_v6 = vsel %vm348_vm0, %v1623_v4, 0  ;;  %v2042_v14 = vld [vmem:[%s2805_s0 + $0xd8] sm:$0xff]   ;;  %v1934_v15 = vld [vmem:[%s2805_s0 + $0x20] sm:$0xff]   ;;  %v1936_v17 = vld [vmem:[%s2805_s0 + $0x28] sm:$0xff]  }
   0x5   :  { %373 = vmatpush1.bf16.msra.mxu0 %v350_v6  ;;  %1920 = vmatpush1.bf16.msra.mxu1 %v350_v6  ;;  %v2055_v16 = vld [vmem:[%s2805_s0 + $0xe0] sm:$0xff]   ;;  %v2068_v18 = vld [vmem:[%s2805_s0 + $0xe8] sm:$0xff]   ;;  %v1938_v19 = vld [vmem:[%s2805_s0 + $0x30] sm:$0xff]  }
   0x6   :  { %1921 = vmatprep.subr.msk.bf16.mxu1 %vm348_vm0, %v1924_v3  ;;  %v2081_v20 = vld [vmem:[%s2805_s0 + $0xf0] sm:$0xff]   ;;  %v1940_v21 = vld [vmem:[%s2805_s0 + $0x38] sm:$0xff]   ;;  %v1942_v23 = vld [vmem:[%s2805_s0 + $0x40] sm:$0xff]  }
   0x7   :  { %v2094_v22 = vld [vmem:[%s2805_s0 + $0xf8] sm:$0xff]   ;;  %v1943_v24 = vld [vmem:[%s2805_s0 + $0x48] sm:$0xff]   ;;  %v1944_v25 = vld [vmem:[%s2805_s0 + $0x50] sm:$0xff]  }
   0x8   :  { %1627 = vmatmul.mubr.msk.bf16.vlgmr.msra.gmra.mxu0 %vm251_vm1, %v1926_v5  ;;  %1651 = vmatmul.mubr.msk.bf16.vlgmr.msra.gmra.mxu1 %vm251_vm1, %v2001_v7  ;;  %v1945_v26 = vld [vmem:[%s2805_s0 + $0x58] sm:$0xff]   ;;  %v1946_v27 = vld [vmem:[%s2805_s0 + $0x60] sm:$0xff]   ;;  %v1947_v28 = vld [vmem:[%s2805_s0 + $0x68] sm:$0xff]  }
   0x9   :  { %1854 = vmatpush3.bf16.msra.mxu1 %v356_v8  ;;  %400 = vmatprep.mubr.bf16.mxu0 %v1958_v1  ;;  %v1948_v29 = vld [vmem:[%s2805_s0 + $0x70] sm:$0xff]   ;;  %v1949_v30 = vld [vmem:[%s2805_s0 + $0x78] sm:$0xff]   ;;  %v1950_v31 = vld [vmem:[%s2805_s0 + $0x80] sm:$0xff]  }
   0xa   :  { %640 = vmatprep.mubr.bf16.mxu1 %v1958_v1  ;;  %v1951_v32 = vld [vmem:[%s2805_s0 + $0x88] sm:$0xff]   ;;  %v1952_v33 = vld [vmem:[%s2805_s0 + $0x90] sm:$0xff]   ;;  %v1953_v34 = vld [vmem:[%s2805_s0 + $0x98] sm:$0xff]  }
   0xb   :  { %v1954_v35 = vld [vmem:[%s2805_s0 + $0xa0] sm:$0xff]   ;;  %v1955_v36 = vld [vmem:[%s2805_s0 + $0xa8] sm:$0xff]   ;;  %v1956_v37 = vld [vmem:[%s2805_s0 + $0xb0] sm:$0xff]  }
   0xc   :  { %v1957_v38 = vld [vmem:[%s2805_s0 + $0xb8] sm:$0xff]   ;;  %v2222_v39 = vld [vmem:[%s2806_s2] ss:$0 sm:$0xff] }
  0x10   :  { %1628 = vmatmul.mubr.msk.bf16.gmra.mxu0 %vm251_vm1, %v1928_v9  ;;  %1652 = vmatmul.mubr.msk.bf16.gmra.mxu1 %vm251_vm1, %v2016_v10 }
  0x11   :  { %410 = vmatprep.mubr.bf16.mxu0 %v1958_v1  ;;  %650 = vmatprep.mubr.bf16.mxu1 %v1958_v1 }
  0x18   :  { %1629 = vmatmul.mubr.msk.bf16.gmra.mxu0 %vm251_vm1, %v1930_v11  ;;  %1653 = vmatmul.mubr.msk.bf16.gmra.mxu1 %vm251_vm1, %v2029_v12 }
  0x19   :  { %420 = vmatprep.mubr.bf16.mxu0 %v1958_v1  ;;  %660 = vmatprep.mubr.bf16.mxu1 %v1958_v1 }
  0x20   :  { %1630 = vmatmul.mubr.msk.bf16.gmra.mxu0 %vm251_vm1, %v1932_v13  ;;  %1654 = vmatmul.mubr.msk.bf16.gmra.mxu1 %vm251_vm1, %v2042_v14 }
  0x21   :  { %430 = vmatprep.mubr.bf16.mxu0 %v1958_v1  ;;  %670 = vmatprep.mubr.bf16.mxu1 %v1958_v1 }
  0x28   :  { %1631 = vmatmul.mubr.msk.bf16.gmra.mxu0 %vm251_vm1, %v1934_v15  ;;  %1655 = vmatmul.mubr.msk.bf16.gmra.mxu1 %vm251_vm1, %v2055_v16 }
  0x29   :  { %440 = vmatprep.mubr.bf16.mxu0 %v1958_v1  ;;  %680 = vmatprep.mubr.bf16.mxu1 %v1958_v1 }
  0x30   :  { %1632 = vmatmul.mubr.msk.bf16.gmra.mxu0 %vm251_vm1, %v1936_v17  ;;  %1656 = vmatmul.mubr.msk.bf16.gmra.mxu1 %vm251_vm1, %v2068_v18 }
  0x31   :  { %450 = vmatprep.mubr.bf16.mxu0 %v1958_v1  ;;  %690 = vmatprep.mubr.bf16.mxu1 %v1958_v1 }
  0x38   :  { %1633 = vmatmul.mubr.msk.bf16.gmra.mxu0 %vm251_vm1, %v1938_v19  ;;  %1657 = vmatmul.mubr.msk.bf16.gmra.mxu1 %vm251_vm1, %v2081_v20 }
  0x39   :  { %460 = vmatprep.mubr.bf16.mxu0 %v1958_v1  ;;  %700 = vmatprep.mubr.bf16.mxu1 %v1958_v1 }
  0x40   :  { %1634 = vmatmul.mubr.msk.bf16.gmra.mxu0 %vm251_vm1, %v1940_v21  ;;  %1658 = vmatmul.mubr.msk.bf16.gmra.mxu1 %vm251_vm1, %v2094_v22 }
  0x41   :  { %470 = vmatprep.mubr.bf16.mxu0 %v1958_v1  ;;  %1855 = vmatprep.mubr.msk.bf16.mxu1 %vm251_vm1, %v1926_v5 }
  0x48   :  { %1635 = vmatmul.mubr.msk.bf16.gmra.mxu0 %vm251_vm1, %v1942_v23  ;;  %1856 = vmatmul.mubr.msk.bf16.vlgmr.msra.gmra.mxu1 %vm251_vm1, %v1928_v9 }
  0x49   :  { %480 = vmatprep.mubr.bf16.mxu0 %v1958_v1  ;;  %1859 = vmatprep.mubr.msk.bf16.mxu1 %vm251_vm1, %v1930_v11 }
  0x50   :  { %1636 = vmatmul.mubr.msk.bf16.gmra.mxu0 %vm251_vm1, %v1943_v24  ;;  %1860 = vmatmul.mubr.msk.bf16.gmra.mxu1 %vm251_vm1, %v1932_v13 }
  0x51   :  { %490 = vmatprep.mubr.bf16.mxu0 %v1958_v1  ;;  %1863 = vmatprep.mubr.msk.bf16.mxu1 %vm251_vm1, %v1934_v15 }
  0x58   :  { %1637 = vmatmul.mubr.msk.bf16.gmra.mxu0 %vm251_vm1, %v1944_v25  ;;  %1864 = vmatmul.mubr.msk.bf16.gmra.mxu1 %vm251_vm1, %v1936_v17 }
  0x59   :  { %500 = vmatprep.mubr.bf16.mxu0 %v1958_v1  ;;  %1867 = vmatprep.mubr.msk.bf16.mxu1 %vm251_vm1, %v1938_v19 }
  0x60   :  { %1638 = vmatmul.mubr.msk.bf16.gmra.mxu0 %vm251_vm1, %v1945_v26  ;;  %1868 = vmatmul.mubr.msk.bf16.gmra.mxu1 %vm251_vm1, %v1940_v21 }
  0x61   :  { %510 = vmatprep.mubr.bf16.mxu0 %v1958_v1  ;;  %1871 = vmatprep.mubr.msk.bf16.mxu1 %vm251_vm1, %v1942_v23 }
  0x68   :  { %1639 = vmatmul.mubr.msk.bf16.gmra.mxu0 %vm251_vm1, %v1946_v27  ;;  %1872 = vmatmul.mubr.msk.bf16.gmra.mxu1 %vm251_vm1, %v1943_v24 }
  0x69   :  { %520 = vmatprep.mubr.bf16.mxu0 %v1958_v1  ;;  %1875 = vmatprep.mubr.msk.bf16.mxu1 %vm251_vm1, %v1944_v25 }
  0x70   :  { %1640 = vmatmul.mubr.msk.bf16.gmra.mxu0 %vm251_vm1, %v1947_v28  ;;  %1876 = vmatmul.mubr.msk.bf16.gmra.mxu1 %vm251_vm1, %v1945_v26 }
  0x71   :  { %530 = vmatprep.mubr.bf16.mxu0 %v1958_v1  ;;  %1879 = vmatprep.mubr.msk.bf16.mxu1 %vm251_vm1, %v1946_v27 }
  0x78   :  { %1641 = vmatmul.mubr.msk.bf16.gmra.mxu0 %vm251_vm1, %v1948_v29  ;;  %1880 = vmatmul.mubr.msk.bf16.gmra.mxu1 %vm251_vm1, %v1947_v28 }
  0x79   :  { %540 = vmatprep.mubr.bf16.mxu0 %v1958_v1  ;;  %1883 = vmatprep.mubr.msk.bf16.mxu1 %vm251_vm1, %v1948_v29 }
  0x80   :  { %1642 = vmatmul.mubr.msk.bf16.gmra.mxu0 %vm251_vm1, %v1949_v30  ;;  %1884 = vmatmul.mubr.msk.bf16.gmra.mxu1 %vm251_vm1, %v1949_v30 }
  0x81   :  { %550 = vmatprep.mubr.bf16.mxu0 %v1958_v1  ;;  %1887 = vmatprep.mubr.msk.bf16.mxu1 %vm251_vm1, %v1950_v31 }
  0x88   :  { %1643 = vmatmul.mubr.msk.bf16.gmra.mxu0 %vm251_vm1, %v1950_v31  ;;  %1888 = vmatmul.mubr.msk.bf16.gmra.mxu1 %vm251_vm1, %v1951_v32 }
  0x89   :  { %560 = vmatprep.mubr.bf16.mxu0 %v1958_v1  ;;  %1891 = vmatprep.mubr.msk.bf16.mxu1 %vm251_vm1, %v1952_v33 }
  0x90   :  { %1644 = vmatmul.mubr.msk.bf16.gmra.mxu0 %vm251_vm1, %v1951_v32  ;;  %1892 = vmatmul.mubr.msk.bf16.gmra.mxu1 %vm251_vm1, %v1953_v34 }
  0x91   :  { %570 = vmatprep.mubr.bf16.mxu0 %v1958_v1  ;;  %1895 = vmatprep.mubr.msk.bf16.mxu1 %vm251_vm1, %v1954_v35 }
  0x98   :  { %1645 = vmatmul.mubr.msk.bf16.gmra.mxu0 %vm251_vm1, %v1952_v33  ;;  %1896 = vmatmul.mubr.msk.bf16.gmra.mxu1 %vm251_vm1, %v1955_v36 }
  0x99   :  { %580 = vmatprep.mubr.bf16.mxu0 %v1958_v1  ;;  %1899 = vmatprep.mubr.msk.bf16.mxu1 %vm251_vm1, %v1956_v37 }
  0xa0   :  { %1646 = vmatmul.mubr.msk.bf16.gmra.mxu0 %vm251_vm1, %v1953_v34  ;;  %1900 = vmatmul.mubr.msk.bf16.gmra.mxu1 %vm251_vm1, %v1957_v38 }
  0xa1   :  { %590 = vmatprep.mubr.bf16.mxu0 %v1958_v1  ;;  %1903 = vmatprep.mubr.msk.bf16.mxu1 %vm251_vm1, %v2001_v7 }
  0xa8   :  { %1647 = vmatmul.mubr.msk.bf16.gmra.mxu0 %vm251_vm1, %v1954_v35  ;;  %1904 = vmatmul.mubr.msk.bf16.gmra.mxu1 %vm251_vm1, %v2016_v10 }
  0xa9   :  { %600 = vmatprep.mubr.bf16.mxu0 %v1958_v1  ;;  %1907 = vmatprep.mubr.msk.bf16.mxu1 %vm251_vm1, %v2029_v12 }
  0xb0   :  { %1648 = vmatmul.mubr.msk.bf16.gmra.mxu0 %vm251_vm1, %v1955_v36  ;;  %1908 = vmatmul.mubr.msk.bf16.gmra.mxu1 %vm251_vm1, %v2042_v14 }
  0xb1   :  { %610 = vmatprep.mubr.bf16.mxu0 %v1958_v1  ;;  %1911 = vmatprep.mubr.msk.bf16.mxu1 %vm251_vm1, %v2055_v16 }
  0xb8   :  { %1649 = vmatmul.mubr.msk.bf16.gmra.mxu0 %vm251_vm1, %v1956_v37  ;;  %1912 = vmatmul.mubr.msk.bf16.gmra.mxu1 %vm251_vm1, %v2068_v18 }
  0xb9   :  { %620 = vmatprep.mubr.bf16.mxu0 %v1958_v1  ;;  %1915 = vmatprep.mubr.msk.bf16.mxu1 %vm251_vm1, %v2081_v20 }
  0xc0   :  { %1650 = vmatmul.mubr.msk.bf16.gmra.mxu0 %vm251_vm1, %v1957_v38  ;;  %1916 = vmatmul.mubr.msk.bf16.gmra.mxu1 %vm251_vm1, %v2094_v22 }
  0xc8   :  { %v392_v40 = vpop.f32.mrf.mxu0  ;;  %v632_v41 = vpop.f32.mrf.mxu1 }
  0xc9   :  { %v1007_v42 = vadd.f32 %v2222_v39, %v392_v40  ;;  %v1055_v43 = vadd.f32 %v2222_v39, %v632_v41 }
  0xca   :  { %v2226_v44 = vpop.f32.mrf.mxu0  ;;  %v2228_v45 = vpop.f32.mrf.mxu1 }
  0xcb   :  { %1071 = vst [vmem:[%s2807_s3] sm:$0xff] %v1007_v42  ;;  %1119 = vst [vmem:[%s2807_s3 + $0x180] sm:$0xff] %v1055_v43 }
  0xcc   :  { %v396_v46 = vpop.f32.mrf.mxu0  ;;  %v636_v47 = vpop.f32.mrf.mxu1 }
  0xcd   :  { %v1008_v48 = vadd.f32 %v2222_v39, %v396_v46  ;;  %v1056_v49 = vadd.f32 %v2222_v39, %v636_v47 }
  0xce   :  { %v2238_v50 = vpop.f32.mrf.mxu0  ;;  %v2240_v51 = vpop.f32.mrf.mxu1 }
  0xcf   :  { %1072 = vst [vmem:[%s2807_s3 + $0x8] sm:$0xff] %v1008_v48  ;;  %1120 = vst [vmem:[%s2807_s3 + $0x188] sm:$0xff] %v1056_v49 }
  0xd0   :  { %v402_v52 = vpop.f32.mrf.mxu0  ;;  %v642_v53 = vpop.f32.mrf.mxu1 }
  0xd1   :  { %v1009_v54 = vadd.f32 %v2222_v39, %v402_v52  ;;  %v1057_v55 = vadd.f32 %v2222_v39, %v642_v53 }
  0xd2   :  { %v2250_v56 = vpop.f32.mrf.mxu0  ;;  %v2252_v57 = vpop.f32.mrf.mxu1 }
  0xd3   :  { %1073 = vst [vmem:[%s2807_s3 + $0x10] sm:$0xff] %v1009_v54  ;;  %1121 = vst [vmem:[%s2807_s3 + $0x190] sm:$0xff] %v1057_v55 }
  0xd4   :  { %v406_v58 = vpop.f32.mrf.mxu0  ;;  %v646_v59 = vpop.f32.mrf.mxu1 }
  0xd5   :  { %v1010_v60 = vadd.f32 %v2222_v39, %v406_v58  ;;  %v1058_v61 = vadd.f32 %v2222_v39, %v646_v59 }
  0xd6   :  { %v2262_v62 = vpop.f32.mrf.mxu0  ;;  %v2264_v63 = vpop.f32.mrf.mxu1 }
  0xd7   :  { %1074 = vst [vmem:[%s2807_s3 + $0x18] sm:$0xff] %v1010_v60  ;;  %1122 = vst [vmem:[%s2807_s3 + $0x198] sm:$0xff] %v1058_v61 }
  0xd8   :  { %v412_v0 = vpop.f32.mrf.mxu0  ;;  %v652_v1 = vpop.f32.mrf.mxu1 }
  0xd9   :  { %v1011_v2 = vadd.f32 %v2222_v39, %v412_v0  ;;  %v1059_v3 = vadd.f32 %v2222_v39, %v652_v1 }
  0xda   :  { %v2274_v4 = vpop.f32.mrf.mxu0  ;;  %v2276_v5 = vpop.f32.mrf.mxu1 }
  0xdb   :  { %1075 = vst [vmem:[%s2807_s3 + $0x20] sm:$0xff] %v1011_v2  ;;  %1123 = vst [vmem:[%s2807_s3 + $0x1a0] sm:$0xff] %v1059_v3 }
  0xdc   :  { %v416_v6 = vpop.f32.mrf.mxu0  ;;  %v656_v7 = vpop.f32.mrf.mxu1 }
  0xdd   :  { %v1012_v8 = vadd.f32 %v2222_v39, %v416_v6  ;;  %v1060_v9 = vadd.f32 %v2222_v39, %v656_v7 }
  0xde   :  { %v2286_v10 = vpop.f32.mrf.mxu0  ;;  %v2288_v11 = vpop.f32.mrf.mxu1 }
  0xdf   :  { %1076 = vst [vmem:[%s2807_s3 + $0x28] sm:$0xff] %v1012_v8  ;;  %1124 = vst [vmem:[%s2807_s3 + $0x1a8] sm:$0xff] %v1060_v9 }
  0xe0   :  { %v422_v12 = vpop.f32.mrf.mxu0  ;;  %v662_v13 = vpop.f32.mrf.mxu1 }
  0xe1   :  { %v1013_v14 = vadd.f32 %v2222_v39, %v422_v12  ;;  %v1061_v15 = vadd.f32 %v2222_v39, %v662_v13 }
  0xe2   :  { %v2298_v16 = vpop.f32.mrf.mxu0  ;;  %v2300_v17 = vpop.f32.mrf.mxu1 }
  0xe3   :  { %1077 = vst [vmem:[%s2807_s3 + $0x30] sm:$0xff] %v1013_v14  ;;  %1125 = vst [vmem:[%s2807_s3 + $0x1b0] sm:$0xff] %v1061_v15 }
  0xe4   :  { %v426_v18 = vpop.f32.mrf.mxu0  ;;  %v666_v19 = vpop.f32.mrf.mxu1 }
  0xe5   :  { %v1014_v20 = vadd.f32 %v2222_v39, %v426_v18  ;;  %v1062_v21 = vadd.f32 %v2222_v39, %v666_v19 }
  0xe6   :  { %v2310_v22 = vpop.f32.mrf.mxu0  ;;  %v2312_v23 = vpop.f32.mrf.mxu1 }
  0xe7   :  { %1078 = vst [vmem:[%s2807_s3 + $0x38] sm:$0xff] %v1014_v20  ;;  %1126 = vst [vmem:[%s2807_s3 + $0x1b8] sm:$0xff] %v1062_v21 }
  0xe8   :  { %v432_v24 = vpop.f32.mrf.mxu0  ;;  %v672_v25 = vpop.f32.mrf.mxu1 }
  0xe9   :  { %v1015_v26 = vadd.f32 %v2222_v39, %v432_v24  ;;  %v1063_v27 = vadd.f32 %v2222_v39, %v672_v25 }
  0xea   :  { %v2322_v28 = vpop.f32.mrf.mxu0  ;;  %v2324_v29 = vpop.f32.mrf.mxu1 }
  0xeb   :  { %1079 = vst [vmem:[%s2807_s3 + $0x40] sm:$0xff] %v1015_v26  ;;  %1127 = vst [vmem:[%s2807_s3 + $0x1c0] sm:$0xff] %v1063_v27 }
  0xec   :  { %v436_v30 = vpop.f32.mrf.mxu0  ;;  %v676_v31 = vpop.f32.mrf.mxu1 }
  0xed   :  { %v1016_v32 = vadd.f32 %v2222_v39, %v436_v30  ;;  %v1064_v33 = vadd.f32 %v2222_v39, %v676_v31 }
  0xee   :  { %v2334_v34 = vpop.f32.mrf.mxu0  ;;  %v2336_v35 = vpop.f32.mrf.mxu1 }
  0xef   :  { %1080 = vst [vmem:[%s2807_s3 + $0x48] sm:$0xff] %v1016_v32  ;;  %1128 = vst [vmem:[%s2807_s3 + $0x1c8] sm:$0xff] %v1064_v33 }
  0xf0   :  { %v442_v36 = vpop.f32.mrf.mxu0  ;;  %v682_v37 = vpop.f32.mrf.mxu1 }
  0xf1   :  { %v1017_v38 = vadd.f32 %v2222_v39, %v442_v36  ;;  %v1065_v40 = vadd.f32 %v2222_v39, %v682_v37 }
  0xf2   :  { %v2346_v41 = vpop.f32.mrf.mxu0  ;;  %v2348_v42 = vpop.f32.mrf.mxu1 }
  0xf3   :  { %1081 = vst [vmem:[%s2807_s3 + $0x50] sm:$0xff] %v1017_v38  ;;  %1129 = vst [vmem:[%s2807_s3 + $0x1d0] sm:$0xff] %v1065_v40 }
  0xf4   :  { %v446_v43 = vpop.f32.mrf.mxu0  ;;  %v686_v46 = vpop.f32.mrf.mxu1 }
  0xf5   :  { %v1018_v47 = vadd.f32 %v2222_v39, %v446_v43  ;;  %v1066_v48 = vadd.f32 %v2222_v39, %v686_v46 }
  0xf6   :  { %v2358_v49 = vpop.f32.mrf.mxu0  ;;  %v2360_v52 = vpop.f32.mrf.mxu1 }
  0xf7   :  { %1082 = vst [vmem:[%s2807_s3 + $0x58] sm:$0xff] %v1018_v47  ;;  %1130 = vst [vmem:[%s2807_s3 + $0x1d8] sm:$0xff] %v1066_v48 }
  0xf8   :  { %v452_v53 = vpop.f32.mrf.mxu0  ;;  %v692_v54 = vpop.f32.mrf.mxu1 }
  0xf9   :  { %v1019_v55 = vadd.f32 %v2222_v39, %v452_v53  ;;  %v1067_v58 = vadd.f32 %v2222_v39, %v692_v54 }
  0xfa   :  { %v2370_v59 = vpop.f32.mrf.mxu0  ;;  %v2372_v60 = vpop.f32.mrf.mxu1 }
  0xfb   :  { %1083 = vst [vmem:[%s2807_s3 + $0x60] sm:$0xff] %v1019_v55  ;;  %1131 = vst [vmem:[%s2807_s3 + $0x1e0] sm:$0xff] %v1067_v58 }
  0xfc   :  { %v456_v61 = vpop.f32.mrf.mxu0  ;;  %v696_v0 = vpop.f32.mrf.mxu1 }
  0xfd   :  { %v1020_v1 = vadd.f32 %v2222_v39, %v456_v61  ;;  %v1068_v2 = vadd.f32 %v2222_v39, %v696_v0 }
  0xfe   :  { %v2382_v3 = vpop.f32.mrf.mxu0  ;;  %v2384_v6 = vpop.f32.mrf.mxu1 }
  0xff   :  { %1084 = vst [vmem:[%s2807_s3 + $0x68] sm:$0xff] %v1020_v1  ;;  %1132 = vst [vmem:[%s2807_s3 + $0x1e8] sm:$0xff] %v1068_v2 }
 0x100   :  { %v462_v7 = vpop.f32.mrf.mxu0  ;;  %v702_v8 = vpop.f32.mrf.mxu1 }
 0x101   :  { %v1021_v9 = vadd.f32 %v2222_v39, %v462_v7  ;;  %v1069_v12 = vadd.f32 %v2222_v39, %v702_v8 }
 0x102   :  { %v2394_v13 = vpop.f32.mrf.mxu0  ;;  %v2396_v14 = vpop.f32.mrf.mxu1 }
 0x103   :  { %1085 = vst [vmem:[%s2807_s3 + $0x70] sm:$0xff] %v1021_v9  ;;  %1133 = vst [vmem:[%s2807_s3 + $0x1f0] sm:$0xff] %v1069_v12 }
 0x104   :  { %v466_v15 = vpop.f32.mrf.mxu0  ;;  %v706_v18 = vpop.f32.mrf.mxu1 }
 0x105   :  { %v1022_v19 = vadd.f32 %v2222_v39, %v466_v15  ;;  %v1070_v20 = vadd.f32 %v2222_v39, %v706_v18 }
 0x106   :  { %v2406_v21 = vpop.f32.mrf.mxu0  ;;  %v2408_v24 = vpop.f32.mrf.mxu1 }
 0x107   :  { %1086 = vst [vmem:[%s2807_s3 + $0x78] sm:$0xff] %v1022_v19  ;;  %1134 = vst [vmem:[%s2807_s3 + $0x1f8] sm:$0xff] %v1070_v20 }
 0x108   :  { %v472_v25 = vpop.f32.mrf.mxu0  ;;  %v1857_v26 = vpop.f32.mrf.mxu1 }
 0x109   :  { %v1023_v27 = vadd.f32 %v2222_v39, %v472_v25  ;;  %v1758_v30 = vpack.c.bf16 %v1857_v26, %v2250_v56 }
 0x10a   :  { %v2418_v31 = vpop.f32.mrf.mxu0  ;;  %v745_v32 = vpop.f32.mrf.mxu1 }
 0x10b   :  { %1087 = vst [vmem:[%s2807_s3 + $0x80] sm:$0xff] %v1023_v27  ;;  %1521 = vst [vmem:[%s2808_s4 + $0x10] sm:$0xff] %v1758_v30  ;;  %v1756_v33 = vpack.c.bf16 %v745_v32, %v2226_v44 }
 0x10c   :  { %v476_v36 = vpop.f32.mrf.mxu0  ;;  %v1858_v37 = vpop.f32.mrf.mxu1 }
 0x10d   :  { %1519 = vst [vmem:[%s2808_s4] sm:$0xff] %v1756_v33  ;;  %v1024_v56 = vadd.f32 %v2222_v39, %v476_v36  ;;  %v1759_v38 = vpack.c.bf16 %v1858_v37, %v2262_v62 }
 0x10e   :  { %v2432_v40 = vpop.f32.mrf.mxu0  ;;  %v748_v43 = vpop.f32.mrf.mxu1 }
 0x10f   :  { %1088 = vst [vmem:[%s2807_s3 + $0x88] sm:$0xff] %v1024_v56  ;;  %1522 = vst [vmem:[%s2808_s4 + $0x18] sm:$0xff] %v1759_v38  ;;  %v1757_v44 = vpack.c.bf16 %v748_v43, %v2238_v50 }
 0x110   :  { %v482_v46 = vpop.f32.mrf.mxu0  ;;  %v1861_v47 = vpop.f32.mrf.mxu1 }
 0x111   :  { %1520 = vst [vmem:[%s2808_s4 + $0x8] sm:$0xff] %v1757_v44  ;;  %v1025_v62 = vadd.f32 %v2222_v39, %v482_v46  ;;  %v1762_v48 = vpack.c.bf16 %v1861_v47, %v2298_v16 }
 0x112   :  { %v2446_v53 = vpop.f32.mrf.mxu0  ;;  %v761_v54 = vpop.f32.mrf.mxu1 }
 0x113   :  { %1089 = vst [vmem:[%s2807_s3 + $0x90] sm:$0xff] %v1025_v62  ;;  %1525 = vst [vmem:[%s2808_s4 + $0x30] sm:$0xff] %v1762_v48  ;;  %v1760_v50 = vpack.c.bf16 %v761_v54, %v2274_v4 }
 0x114   :  { %v486_v55 = vpop.f32.mrf.mxu0  ;;  %v1862_v58 = vpop.f32.mrf.mxu1 }
 0x115   :  { %1523 = vst [vmem:[%s2808_s4 + $0x20] sm:$0xff] %v1760_v50  ;;  %v1026_v16 = vadd.f32 %v2222_v39, %v486_v55  ;;  %v1763_v61 = vpack.c.bf16 %v1862_v58, %v2310_v22 }
 0x116   :  { %v2460_v0 = vpop.f32.mrf.mxu0  ;;  %v764_v1 = vpop.f32.mrf.mxu1 }
 0x117   :  { %1090 = vst [vmem:[%s2807_s3 + $0x98] sm:$0xff] %v1026_v16  ;;  %1526 = vst [vmem:[%s2808_s4 + $0x38] sm:$0xff] %v1763_v61  ;;  %v1761_v4 = vpack.c.bf16 %v764_v1, %v2286_v10 }
 0x118   :  { %v492_v2 = vpop.f32.mrf.mxu0  ;;  %v1865_v7 = vpop.f32.mrf.mxu1 }
 0x119   :  { %1524 = vst [vmem:[%s2808_s4 + $0x28] sm:$0xff] %v1761_v4  ;;  %v1027_v22 = vadd.f32 %v2222_v39, %v492_v2  ;;  %v1766_v8 = vpack.c.bf16 %v1865_v7, %v2346_v41 }
 0x11a   :  { %v2474_v9 = vpop.f32.mrf.mxu0  ;;  %v777_v12 = vpop.f32.mrf.mxu1 }
 0x11b   :  { %1091 = vst [vmem:[%s2807_s3 + $0xa0] sm:$0xff] %v1027_v22  ;;  %1529 = vst [vmem:[%s2808_s4 + $0x50] sm:$0xff] %v1766_v8  ;;  %v1764_v10 = vpack.c.bf16 %v777_v12, %v2322_v28 }
 0x11c   :  { %v496_v15 = vpop.f32.mrf.mxu0  ;;  %v1866_v18 = vpop.f32.mrf.mxu1 }
 0x11d   :  { %1527 = vst [vmem:[%s2808_s4 + $0x40] sm:$0xff] %v1764_v10  ;;  %v1028_v41 = vadd.f32 %v2222_v39, %v496_v15  ;;  %v1767_v19 = vpack.c.bf16 %v1866_v18, %v2358_v49 }
 0x11e   :  { %v2488_v20 = vpop.f32.mrf.mxu0  ;;  %v780_v25 = vpop.f32.mrf.mxu1 }
 0x11f   :  { %1092 = vst [vmem:[%s2807_s3 + $0xa8] sm:$0xff] %v1028_v41  ;;  %1530 = vst [vmem:[%s2808_s4 + $0x58] sm:$0xff] %v1767_v19  ;;  %v1765_v28 = vpack.c.bf16 %v780_v25, %v2334_v34 }
 0x120   :  { %v502_v26 = vpop.f32.mrf.mxu0  ;;  %v1869_v27 = vpop.f32.mrf.mxu1 }
 0x121   :  { %1528 = vst [vmem:[%s2808_s4 + $0x48] sm:$0xff] %v1765_v28  ;;  %v1029_v49 = vadd.f32 %v2222_v39, %v502_v26  ;;  %v1770_v30 = vpack.c.bf16 %v1869_v27, %v2394_v13 }
 0x122   :  { %v504_v32 = vpop.f32.mrf.mxu0  ;;  %v793_v33 = vpop.f32.mrf.mxu1 }
 0x123   :  { %1093 = vst [vmem:[%s2807_s3 + $0xb0] sm:$0xff] %v1029_v49  ;;  %1533 = vst [vmem:[%s2808_s4 + $0x70] sm:$0xff] %v1770_v30  ;;  %v1768_v34 = vpack.c.bf16 %v793_v33, %v2370_v59 }
 0x124   :  { %v506_v36 = vpop.f32.mrf.mxu0  ;;  %v1870_v37 = vpop.f32.mrf.mxu1 }
 0x125   :  { %1531 = vst [vmem:[%s2808_s4 + $0x60] sm:$0xff] %v1768_v34  ;;  %v1030_v13 = vadd.f32 %v2222_v39, %v506_v36  ;;  %v1771_v56 = vpack.c.bf16 %v1870_v37, %v2406_v21 }
 0x126   :  { %v508_v38 = vpop.f32.mrf.mxu0  ;;  %v796_v43 = vpop.f32.mrf.mxu1 }
 0x127   :  { %1094 = vst [vmem:[%s2807_s3 + $0xb8] sm:$0xff] %v1030_v13  ;;  %1534 = vst [vmem:[%s2808_s4 + $0x78] sm:$0xff] %v1771_v56  ;;  %v1769_v59 = vpack.c.bf16 %v796_v43, %v2382_v3 }
 0x128   :  { %v512_v44 = vpop.f32.mrf.mxu0  ;;  %v1873_v46 = vpop.f32.mrf.mxu1 }
 0x129   :  { %1532 = vst [vmem:[%s2808_s4 + $0x68] sm:$0xff] %v1769_v59  ;;  %v1031_v21 = vadd.f32 %v2222_v39, %v512_v44  ;;  %v1774_v47 = vpack.c.bf16 %v1873_v46, %v2446_v53 }
 0x12a   :  { %v514_v62 = vpop.f32.mrf.mxu0  ;;  %v809_v48 = vpop.f32.mrf.mxu1 }
 0x12b   :  { %1095 = vst [vmem:[%s2807_s3 + $0xc0] sm:$0xff] %v1031_v21  ;;  %1537 = vst [vmem:[%s2808_s4 + $0x90] sm:$0xff] %v1774_v47  ;;  %v1772_v3 = vpack.c.bf16 %v809_v48, %v2418_v31 }
 0x12c   :  { %v516_v54 = vpop.f32.mrf.mxu0  ;;  %v1874_v50 = vpop.f32.mrf.mxu1 }
 0x12d   :  { %1535 = vst [vmem:[%s2808_s4 + $0x80] sm:$0xff] %v1772_v3  ;;  %v1032_v53 = vadd.f32 %v2222_v39, %v516_v54  ;;  %v1775_v55 = vpack.c.bf16 %v1874_v50, %v2460_v0 }
 0x12e   :  { %v518_v58 = vpop.f32.mrf.mxu0  ;;  %v812_v16 = vpop.f32.mrf.mxu1 }
 0x12f   :  { %1096 = vst [vmem:[%s2807_s3 + $0xc8] sm:$0xff] %v1032_v53  ;;  %1538 = vst [vmem:[%s2808_s4 + $0x98] sm:$0xff] %v1775_v55  ;;  %v1773_v31 = vpack.c.bf16 %v812_v16, %v2432_v40 }
 0x130   :  { %v522_v61 = vpop.f32.mrf.mxu0  ;;  %v1877_v1 = vpop.f32.mrf.mxu1 }
 0x131   :  { %1536 = vst [vmem:[%s2808_s4 + $0x88] sm:$0xff] %v1773_v31  ;;  %v1033_v0 = vadd.f32 %v2222_v39, %v522_v61  ;;  %v1778_v4 = vpack.c.bf16 %v1877_v1, %v504_v32 }
 0x132   :  { %v524_v2 = vpop.f32.mrf.mxu0  ;;  %v825_v7 = vpop.f32.mrf.mxu1 }
 0x133   :  { %1097 = vst [vmem:[%s2807_s3 + $0xd0] sm:$0xff] %v1033_v0  ;;  %1541 = vst [vmem:[%s2808_s4 + $0xb0] sm:$0xff] %v1778_v4  ;;  %v1776_v40 = vpack.c.bf16 %v825_v7, %v2474_v9 }
 0x134   :  { %v526_v22 = vpop.f32.mrf.mxu0  ;;  %v1878_v8 = vpop.f32.mrf.mxu1 }
 0x135   :  { %1539 = vst [vmem:[%s2808_s4 + $0xa0] sm:$0xff] %v1776_v40  ;;  %v1034_v12 = vadd.f32 %v2222_v39, %v526_v22  ;;  %v1779_v10 = vpack.c.bf16 %v1878_v8, %v508_v38 }
 0x136   :  { %v528_v15 = vpop.f32.mrf.mxu0  ;;  %v828_v18 = vpop.f32.mrf.mxu1 }
 0x137   :  { %1098 = vst [vmem:[%s2807_s3 + $0xd8] sm:$0xff] %v1034_v12  ;;  %1542 = vst [vmem:[%s2808_s4 + $0xb8] sm:$0xff] %v1779_v10  ;;  %v1777_v9 = vpack.c.bf16 %v828_v18, %v2488_v20 }
 0x138   :  { %v532_v41 = vpop.f32.mrf.mxu0  ;;  %v1881_v19 = vpop.f32.mrf.mxu1 }
 0x139   :  { %1540 = vst [vmem:[%s2808_s4 + $0xa8] sm:$0xff] %v1777_v9  ;;  %v1035_v25 = vadd.f32 %v2222_v39, %v532_v41  ;;  %v1782_v28 = vpack.c.bf16 %v1881_v19, %v524_v2 }
 0x13a   :  { %v534_v26 = vpop.f32.mrf.mxu0  ;;  %v841_v27 = vpop.f32.mrf.mxu1 }
 0x13b   :  { %1099 = vst [vmem:[%s2807_s3 + $0xe0] sm:$0xff] %v1035_v25  ;;  %1545 = vst [vmem:[%s2808_s4 + $0xd0] sm:$0xff] %v1782_v28  ;;  %v1780_v20 = vpack.c.bf16 %v841_v27, %v514_v62 }
 0x13c   :  { %v536_v49 = vpop.f32.mrf.mxu0  ;;  %v1882_v30 = vpop.f32.mrf.mxu1 }
 0x13d   :  { %1543 = vst [vmem:[%s2808_s4 + $0xc0] sm:$0xff] %v1780_v20  ;;  %v1036_v32 = vadd.f32 %v2222_v39, %v536_v49  ;;  %v1783_v33 = vpack.c.bf16 %v1882_v30, %v528_v15 }
 0x13e   :  { %v538_v34 = vpop.f32.mrf.mxu0  ;;  %v844_v36 = vpop.f32.mrf.mxu1 }
 0x13f   :  { %1100 = vst [vmem:[%s2807_s3 + $0xe8] sm:$0xff] %v1036_v32  ;;  %1546 = vst [vmem:[%s2808_s4 + $0xd8] sm:$0xff] %v1783_v33  ;;  %v1781_v37 = vpack.c.bf16 %v844_v36, %v518_v58 }
 0x140   :  { %v542_v13 = vpop.f32.mrf.mxu0  ;;  %v1885_v56 = vpop.f32.mrf.mxu1 }
 0x141   :  { %1544 = vst [vmem:[%s2808_s4 + $0xc8] sm:$0xff] %v1781_v37  ;;  %v1037_v38 = vadd.f32 %v2222_v39, %v542_v13 }
 0x142   :  { %v544_v43 = vpop.f32.mrf.mxu0  ;;  %v857_v59 = vpop.f32.mrf.mxu1 }
 0x143   :  { %1101 = vst [vmem:[%s2807_s3 + $0xf0] sm:$0xff] %v1037_v38  ;;  %v1786_v44 = vpack.c.bf16 %v1885_v56, %v544_v43  ;;  %v1784_v46 = vpack.c.bf16 %v857_v59, %v534_v26 }
 0x144   :  { %v546_v21 = vpop.f32.mrf.mxu0  ;;  %v1886_v47 = vpop.f32.mrf.mxu1 }
 0x145   :  { %1549 = vst [vmem:[%s2808_s4 + $0xf0] sm:$0xff] %v1786_v44  ;;  %1547 = vst [vmem:[%s2808_s4 + $0xe0] sm:$0xff] %v1784_v46  ;;  %v1038_v62 = vadd.f32 %v2222_v39, %v546_v21 }
 0x146   :  { %v548_v48 = vpop.f32.mrf.mxu0  ;;  %v860_v3 = vpop.f32.mrf.mxu1 }
 0x147   :  { %1102 = vst [vmem:[%s2807_s3 + $0xf8] sm:$0xff] %v1038_v62  ;;  %v1787_v54 = vpack.c.bf16 %v1886_v47, %v548_v48  ;;  %v1785_v50 = vpack.c.bf16 %v860_v3, %v538_v34 }
 0x148   :  { %v552_v53 = vpop.f32.mrf.mxu0  ;;  %v1889_v55 = vpop.f32.mrf.mxu1 }
 0x149   :  { %1550 = vst [vmem:[%s2808_s4 + $0xf8] sm:$0xff] %v1787_v54  ;;  %1548 = vst [vmem:[%s2808_s4 + $0xe8] sm:$0xff] %v1785_v50  ;;  %v1039_v58 = vadd.f32 %v2222_v39, %v552_v53 }
 0x14a   :  { %v554_v16 = vpop.f32.mrf.mxu0  ;;  %v873_v31 = vpop.f32.mrf.mxu1 }
 0x14b   :  { %1103 = vst [vmem:[%s2807_s3 + $0x100] sm:$0xff] %v1039_v58  ;;  %v1788_v61 = vpack.c.bf16 %v873_v31, %v554_v16 }
 0x14c   :  { %v556_v1 = vpop.f32.mrf.mxu0  ;;  %v1890_v0 = vpop.f32.mrf.mxu1 }
 0x14d   :  { %1551 = vst [vmem:[%s2808_s4 + $0x100] sm:$0xff] %v1788_v61  ;;  %v1040_v4 = vadd.f32 %v2222_v39, %v556_v1 }
 0x14e   :  { %v558_v2 = vpop.f32.mrf.mxu0  ;;  %v876_v7 = vpop.f32.mrf.mxu1 }
 0x14f   :  { %1104 = vst [vmem:[%s2807_s3 + $0x108] sm:$0xff] %v1040_v4  ;;  %v1789_v40 = vpack.c.bf16 %v876_v7, %v558_v2 }
 0x150   :  { %v562_v22 = vpop.f32.mrf.mxu0  ;;  %v1893_v8 = vpop.f32.mrf.mxu1 }
 0x151   :  { %1552 = vst [vmem:[%s2808_s4 + $0x108] sm:$0xff] %v1789_v40  ;;  %v1041_v12 = vadd.f32 %v2222_v39, %v562_v22 }
 0x152   :  { %v564_v10 = vpop.f32.mrf.mxu0  ;;  %v889_v15 = vpop.f32.mrf.mxu1 }
 0x153   :  { %1105 = vst [vmem:[%s2807_s3 + $0x110] sm:$0xff] %v1041_v12  ;;  %v1790_v18 = vpack.c.bf16 %v1889_v55, %v564_v10 }
 0x154   :  { %v566_v9 = vpop.f32.mrf.mxu0  ;;  %v1894_v41 = vpop.f32.mrf.mxu1 }
 0x155   :  { %1553 = vst [vmem:[%s2808_s4 + $0x110] sm:$0xff] %v1790_v18  ;;  %v1042_v19 = vadd.f32 %v2222_v39, %v566_v9 }
 0x156   :  { %v568_v25 = vpop.f32.mrf.mxu0  ;;  %v892_v28 = vpop.f32.mrf.mxu1 }
 0x157   :  { %1106 = vst [vmem:[%s2807_s3 + $0x118] sm:$0xff] %v1042_v19  ;;  %v1791_v26 = vpack.c.bf16 %v1890_v0, %v568_v25 }
 0x158   :  { %v572_v27 = vpop.f32.mrf.mxu0  ;;  %v2635_v20 = vpop.f32.mrf.mxu1 }
 0x159   :  { %1554 = vst [vmem:[%s2808_s4 + $0x118] sm:$0xff] %v1791_v26  ;;  %v1043_v49 = vadd.f32 %v2222_v39, %v572_v27 }
 0x15a   :  { %v574_v30 = vpop.f32.mrf.mxu0  ;;  %v905_v32 = vpop.f32.mrf.mxu1 }
 0x15b   :  { %1107 = vst [vmem:[%s2807_s3 + $0x120] sm:$0xff] %v1043_v49  ;;  %v1792_v33 = vpack.c.bf16 %v889_v15, %v574_v30 }
 0x15c   :  { %v576_v34 = vpop.f32.mrf.mxu0  ;;  %v2644_v36 = vpop.f32.mrf.mxu1 }
 0x15d   :  { %1555 = vst [vmem:[%s2808_s4 + $0x120] sm:$0xff] %v1792_v33  ;;  %v1044_v37 = vadd.f32 %v2222_v39, %v576_v34 }
 0x15e   :  { %v578_v13 = vpop.f32.mrf.mxu0  ;;  %v908_v56 = vpop.f32.mrf.mxu1 }
 0x15f   :  { %1108 = vst [vmem:[%s2807_s3 + $0x128] sm:$0xff] %v1044_v37  ;;  %v1793_v38 = vpack.c.bf16 %v892_v28, %v578_v13 }
 0x160   :  { %v582_v43 = vpop.f32.mrf.mxu0  ;;  %v2653_v59 = vpop.f32.mrf.mxu1 }
 0x161   :  { %1556 = vst [vmem:[%s2808_s4 + $0x128] sm:$0xff] %v1793_v38  ;;  %v1045_v44 = vadd.f32 %v2222_v39, %v582_v43 }
 0x162   :  { %v584_v46 = vpop.f32.mrf.mxu0  ;;  %v2659_v21 = vpop.f32.mrf.mxu1 }
 0x163   :  { %1109 = vst [vmem:[%s2807_s3 + $0x130] sm:$0xff] %v1045_v44  ;;  %v1794_v47 = vpack.c.bf16 %v1893_v8, %v584_v46 }
 0x164   :  { %v586_v62 = vpop.f32.mrf.mxu0  ;;  %v2664_v48 = vpop.f32.mrf.mxu1 }
 0x165   :  { %1557 = vst [vmem:[%s2808_s4 + $0x130] sm:$0xff] %v1794_v47  ;;  %v1046_v3 = vadd.f32 %v2222_v39, %v586_v62 }
 0x166   :  { %v588_v54 = vpop.f32.mrf.mxu0  ;;  %v2670_v50 = vpop.f32.mrf.mxu1 }
 0x167   :  { %1110 = vst [vmem:[%s2807_s3 + $0x138] sm:$0xff] %v1046_v3  ;;  %v1795_v53 = vpack.c.bf16 %v1894_v41, %v588_v54 }
 0x168   :  { %v592_v55 = vpop.f32.mrf.mxu0  ;;  %v1905_v58 = vpop.f32.mrf.mxu1 }
 0x169   :  { %1558 = vst [vmem:[%s2808_s4 + $0x138] sm:$0xff] %v1795_v53  ;;  %v1047_v16 = vadd.f32 %v2222_v39, %v592_v55  ;;  %v1806_v31 = vpack.c.bf16 %v1905_v58, %v2252_v57 }
 0x16a   :  { %v594_v61 = vpop.f32.mrf.mxu0  ;;  %v937_v1 = vpop.f32.mrf.mxu1 }
 0x16b   :  { %1111 = vst [vmem:[%s2807_s3 + $0x140] sm:$0xff] %v1047_v16  ;;  %1569 = vst [vmem:[%s2808_s4 + $0x190] sm:$0xff] %v1806_v31  ;;  %v1796_v0 = vpack.c.bf16 %v905_v32, %v594_v61  ;;  %v1804_v4 = vpack.c.bf16 %v937_v1, %v2228_v45 }
 0x16c   :  { %v596_v2 = vpop.f32.mrf.mxu0  ;;  %v1906_v7 = vpop.f32.mrf.mxu1 }
 0x16d   :  { %1559 = vst [vmem:[%s2808_s4 + $0x140] sm:$0xff] %v1796_v0  ;;  %1567 = vst [vmem:[%s2808_s4 + $0x180] sm:$0xff] %v1804_v4  ;;  %v1048_v57 = vadd.f32 %v2222_v39, %v596_v2  ;;  %v1807_v40 = vpack.c.bf16 %v1906_v7, %v2264_v63 }
 0x16e   :  { %v598_v22 = vpop.f32.mrf.mxu0  ;;  %v940_v8 = vpop.f32.mrf.mxu1 }
 0x16f   :  { %1112 = vst [vmem:[%s2807_s3 + $0x148] sm:$0xff] %v1048_v57  ;;  %1570 = vst [vmem:[%s2808_s4 + $0x198] sm:$0xff] %v1807_v40  ;;  %v1797_v45 = vpack.c.bf16 %v908_v56, %v598_v22  ;;  %v1805_v12 = vpack.c.bf16 %v940_v8, %v2240_v51 }
 0x170   :  { %v602_v10 = vpop.f32.mrf.mxu0  ;;  %v1909_v15 = vpop.f32.mrf.mxu1 }
 0x171   :  { %1560 = vst [vmem:[%s2808_s4 + $0x148] sm:$0xff] %v1797_v45  ;;  %1568 = vst [vmem:[%s2808_s4 + $0x188] sm:$0xff] %v1805_v12  ;;  %v1049_v63 = vadd.f32 %v2222_v39, %v602_v10  ;;  %v1810_v18 = vpack.c.bf16 %v1909_v15, %v2300_v17 }
 0x172   :  { %v604_v9 = vpop.f32.mrf.mxu0  ;;  %v953_v41 = vpop.f32.mrf.mxu1 }
 0x173   :  { %1113 = vst [vmem:[%s2807_s3 + $0x150] sm:$0xff] %v1049_v63  ;;  %1573 = vst [vmem:[%s2808_s4 + $0x1b0] sm:$0xff] %v1810_v18  ;;  %v1798_v51 = vpack.c.bf16 %v2635_v20, %v604_v9  ;;  %v1808_v19 = vpack.c.bf16 %v953_v41, %v2276_v5 }
 0x174   :  { %v606_v25 = vpop.f32.mrf.mxu0  ;;  %v1910_v28 = vpop.f32.mrf.mxu1 }
 0x175   :  { %1561 = vst [vmem:[%s2808_s4 + $0x150] sm:$0xff] %v1798_v51  ;;  %1571 = vst [vmem:[%s2808_s4 + $0x1a0] sm:$0xff] %v1808_v19  ;;  %v1050_v17 = vadd.f32 %v2222_v39, %v606_v25  ;;  %v1811_v26 = vpack.c.bf16 %v1910_v28, %v2312_v23 }
 0x176   :  { %v608_v27 = vpop.f32.mrf.mxu0  ;;  %v956_v49 = vpop.f32.mrf.mxu1 }
 0x177   :  { %1114 = vst [vmem:[%s2807_s3 + $0x158] sm:$0xff] %v1050_v17  ;;  %1574 = vst [vmem:[%s2808_s4 + $0x1b8] sm:$0xff] %v1811_v26  ;;  %v1799_v5 = vpack.c.bf16 %v2644_v36, %v608_v27  ;;  %v1809_v20 = vpack.c.bf16 %v956_v49, %v2288_v11 }
 0x178   :  { %v612_v30 = vpop.f32.mrf.mxu0  ;;  %v1913_v32 = vpop.f32.mrf.mxu1 }
 0x179   :  { %1562 = vst [vmem:[%s2808_s4 + $0x158] sm:$0xff] %v1799_v5  ;;  %1572 = vst [vmem:[%s2808_s4 + $0x1a8] sm:$0xff] %v1809_v20  ;;  %v1051_v23 = vadd.f32 %v2222_v39, %v612_v30  ;;  %v1814_v33 = vpack.c.bf16 %v1913_v32, %v2348_v42 }
 0x17a   :  { %v614_v34 = vpop.f32.mrf.mxu0  ;;  %v969_v37 = vpop.f32.mrf.mxu1 }
 0x17b   :  { %1115 = vst [vmem:[%s2807_s3 + $0x160] sm:$0xff] %v1051_v23  ;;  %1577 = vst [vmem:[%s2808_s4 + $0x1d0] sm:$0xff] %v1814_v33  ;;  %v1800_v11 = vpack.c.bf16 %v2659_v21, %v614_v34  ;;  %v1812_v36 = vpack.c.bf16 %v969_v37, %v2324_v29 }
 0x17c   :  { %v616_v13 = vpop.f32.mrf.mxu0  ;;  %v1914_v56 = vpop.f32.mrf.mxu1 }
 0x17d   :  { %1563 = vst [vmem:[%s2808_s4 + $0x160] sm:$0xff] %v1800_v11  ;;  %1575 = vst [vmem:[%s2808_s4 + $0x1c0] sm:$0xff] %v1812_v36  ;;  %v1052_v42 = vadd.f32 %v2222_v39, %v616_v13  ;;  %v1815_v38 = vpack.c.bf16 %v1914_v56, %v2360_v52 }
 0x17e   :  { %v618_v43 = vpop.f32.mrf.mxu0  ;;  %v972_v44 = vpop.f32.mrf.mxu1 }
 0x17f   :  { %1116 = vst [vmem:[%s2807_s3 + $0x168] sm:$0xff] %v1052_v42  ;;  %1578 = vst [vmem:[%s2808_s4 + $0x1d8] sm:$0xff] %v1815_v38  ;;  %v1801_v29 = vpack.c.bf16 %v2670_v50, %v618_v43  ;;  %v1813_v46 = vpack.c.bf16 %v972_v44, %v2336_v35 }
 0x180   :  { %v622_v21 = vpop.f32.mrf.mxu0  ;;  %v1917_v47 = vpop.f32.mrf.mxu1 }
 0x181   :  { %1564 = vst [vmem:[%s2808_s4 + $0x168] sm:$0xff] %v1801_v29  ;;  %1576 = vst [vmem:[%s2808_s4 + $0x1c8] sm:$0xff] %v1813_v46  ;;  %v1053_v52 = vadd.f32 %v2222_v39, %v622_v21  ;;  %v1818_v62 = vpack.c.bf16 %v1917_v47, %v2396_v14 }
 0x182   :  { %v624_v3 = vpop.f32.mrf.mxu0  ;;  %v985_v54 = vpop.f32.mrf.mxu1 }
 0x183   :  { %1117 = vst [vmem:[%s2807_s3 + $0x170] sm:$0xff] %v1053_v52  ;;  %1581 = vst [vmem:[%s2808_s4 + $0x1f0] sm:$0xff] %v1818_v62  ;;  %v1802_v35 = vpack.c.bf16 %v2653_v59, %v624_v3  ;;  %v1816_v50 = vpack.c.bf16 %v985_v54, %v2372_v60 }
 0x184   :  { %v626_v53 = vpop.f32.mrf.mxu0  ;;  %v1918_v55 = vpop.f32.mrf.mxu1 }
 0x185   :  { %1565 = vst [vmem:[%s2808_s4 + $0x170] sm:$0xff] %v1802_v35  ;;  %1579 = vst [vmem:[%s2808_s4 + $0x1e0] sm:$0xff] %v1816_v50  ;;  %v1054_v14 = vadd.f32 %v2222_v39, %v626_v53  ;;  %v1819_v58 = vpack.c.bf16 %v1918_v55, %v2408_v24 }
 0x186   :  { %v628_v16 = vpop.f32.mrf.mxu0  ;;  %v988_v31 = vpop.f32.mrf.mxu1 }
 0x187   :  { %1118 = vst [vmem:[%s2807_s3 + $0x178] sm:$0xff] %v1054_v14  ;;  %1582 = vst [vmem:[%s2808_s4 + $0x1f8] sm:$0xff] %v1819_v58  ;;  %v1803_v60 = vpack.c.bf16 %v2664_v48, %v628_v16  ;;  %v1817_v59 = vpack.c.bf16 %v988_v31, %v2384_v6 }
 0x189   :  { %1566 = vst [vmem:[%s2808_s4 + $0x178] sm:$0xff] %v1803_v60  ;;  %1580 = vst [vmem:[%s2808_s4 + $0x1e8] sm:$0xff] %v1817_v59 }

// kernel: digcn_inception_block.3
= control target key start
LH: loop header
LB: loop body
LE: loop exit
PB: predicated region body
PF: predicated region fallthrough
CT: control target
= control target key end

     0   :  { %v4824_v0 = vmov 0   ;;  %s6400_s2 = inlined_call_operand.vmem [shape: bf16[512,256], index: 2, kind: input, shape index: {}]   ;;  %s6401_s0 = inlined_call_operand.vmem [shape: bf16[512,512], index: 0, kind: input, shape index: {}]   ;;  %s6402_s1 = inlined_call_operand.vmem [shape: bf16[512,512], index: 1, kind: input, shape index: {}]   ;;  %s6403_s3 = inlined_call_operand.vmem [shape: f32[1,256], index: 3, kind: input, shape index: {}]   ;;  %s6404_s4 = inlined_call_operand.vmem [shape: f32[512,256], index: 4, kind: output, shape index: {}]  }
   0x1   :  { %1372 = vmatprep.subr.bf16.mxu0 %v4824_v0  ;;  %1661 = vmatprep.subr.bf16.mxu1 %v4824_v0  ;;  %v4343_v1 = vld [vmem:[%s6400_s2 + $0x70] ss:$8 sps:$4 sm:$0xff]   ;;  %v4349_v3 = vld [vmem:[%s6400_s2 + $0x60] ss:$8 sps:$4 sm:$0xff]   ;;  %v4441_v24 = vld [vmem:[%s6401_s0 + $0x4] ss:$16 sps:$4 sm:$0xff]  }
   0x2   :  { %1373 = vmatpush1.bf16.msra.mxu0 %v4343_v1  ;;  %v4346_v2 = vld [vmem:[%s6400_s2 + $0x170] ss:$8 sps:$4 sm:$0xff]   ;;  %v4352_v4 = vld [vmem:[%s6400_s2 + $0x160] ss:$8 sps:$4 sm:$0xff]   ;;  %1404 = vmatprep.mubr.bf16.mxu0 %v4441_v24  ;;  %v4444_v26 = vld [vmem:[%s6401_s0 + $0xc] ss:$16 sps:$4 sm:$0xff]  }
   0x3   :  { %1374 = vmatprep.subr.bf16.mxu0 %v4824_v0  ;;  %1662 = vmatpush1.bf16.msra.mxu1 %v4346_v2  ;;  %v4355_v5 = vld [vmem:[%s6400_s2 + $0x50] ss:$8 sps:$4 sm:$0xff]   ;;  %v4361_v7 = vld [vmem:[%s6400_s2 + $0x40] ss:$8 sps:$4 sm:$0xff]   ;;  %v4345_v34 = vld [vmem:[%s6400_s2 + $0x74] ss:$8 sps:$4 sm:$0xff]  }
   0x4   :  { %1663 = vmatprep.subr.bf16.mxu1 %v4824_v0  ;;  %v4358_v6 = vld [vmem:[%s6400_s2 + $0x150] ss:$8 sps:$4 sm:$0xff]   ;;  %v4364_v8 = vld [vmem:[%s6400_s2 + $0x140] ss:$8 sps:$4 sm:$0xff]   ;;  %1693 = vmatprep.mubr.bf16.mxu1 %v4444_v26  ;;  %v4445_v37 = vld [vmem:[%s6401_s0 + $0x24] ss:$16 sps:$4 sm:$0xff]  }
   0x5   :  { %v4367_v9 = vld [vmem:[%s6400_s2 + $0x30] ss:$8 sps:$4 sm:$0xff]   ;;  %v4373_v11 = vld [vmem:[%s6400_s2 + $0x20] ss:$8 sps:$4 sm:$0xff]   ;;  %v4348_v38 = vld [vmem:[%s6400_s2 + $0x174] ss:$8 sps:$4 sm:$0xff]  }
   0x6   :  { %1375 = vmatpush1.bf16.msra.mxu0 %v4349_v3  ;;  %v4370_v10 = vld [vmem:[%s6400_s2 + $0x130] ss:$8 sps:$4 sm:$0xff]   ;;  %v4376_v12 = vld [vmem:[%s6400_s2 + $0x120] ss:$8 sps:$4 sm:$0xff]   ;;  %v4447_v40 = vld [vmem:[%s6401_s0 + $0x2c] ss:$16 sps:$4 sm:$0xff]  }
   0x7   :  { %1376 = vmatprep.subr.bf16.mxu0 %v4824_v0  ;;  %1664 = vmatpush1.bf16.msra.mxu1 %v4352_v4  ;;  %v4379_v13 = vld [vmem:[%s6400_s2 + $0x10] ss:$8 sps:$4 sm:$0xff]   ;;  %v4385_v15 = vld [vmem:[%s6400_s2] ss:$8 sps:$4 sm:$0xff]   ;;  %v4351_v41 = vld [vmem:[%s6400_s2 + $0x64] ss:$8 sps:$4 sm:$0xff]  }
   0x8   :  { %1665 = vmatprep.subr.bf16.mxu1 %v4824_v0  ;;  %v4382_v14 = vld [vmem:[%s6400_s2 + $0x110] ss:$8 sps:$4 sm:$0xff]   ;;  %v4388_v16 = vld [vmem:[%s6400_s2 + $0x100] ss:$8 sps:$4 sm:$0xff]   ;;  %v4354_v42 = vld [vmem:[%s6400_s2 + $0x164] ss:$8 sps:$4 sm:$0xff]  }
   0x9   :  { %v4391_v17 = vld [vmem:[%s6400_s2 + $0xf0] ss:$8 sps:$4 sm:$0xff]   ;;  %v4397_v19 = vld [vmem:[%s6400_s2 + $0xe0] ss:$8 sps:$4 sm:$0xff]   ;;  %v4357_v43 = vld [vmem:[%s6400_s2 + $0x54] ss:$8 sps:$4 sm:$0xff]  }
   0xa   :  { %1377 = vmatpush1.bf16.msra.mxu0 %v4355_v5  ;;  %v4394_v18 = vld [vmem:[%s6400_s2 + $0x1f0] ss:$8 sps:$4 sm:$0xff]   ;;  %v4400_v20 = vld [vmem:[%s6400_s2 + $0x1e0] ss:$8 sps:$4 sm:$0xff]   ;;  %v4451_v45 = vld [vmem:[%s6401_s0 + $0x44] ss:$16 sps:$4 sm:$0xff]  }
   0xb   :  { %1378 = vmatprep.subr.bf16.mxu0 %v4824_v0  ;;  %1666 = vmatpush1.bf16.msra.mxu1 %v4358_v6  ;;  %v4403_v21 = vld [vmem:[%s6400_s2 + $0xd0] ss:$8 sps:$4 sm:$0xff]   ;;  %v4409_v23 = vld [vmem:[%s6400_s2 + $0xc0] ss:$8 sps:$4 sm:$0xff]   ;;  %v4360_v46 = vld [vmem:[%s6400_s2 + $0x154] ss:$8 sps:$4 sm:$0xff]  }
   0xc   :  { %1667 = vmatprep.subr.bf16.mxu1 %v4824_v0  ;;  %v4406_v22 = vld [vmem:[%s6400_s2 + $0x1d0] ss:$8 sps:$4 sm:$0xff]   ;;  %v4412_v25 = vld [vmem:[%s6400_s2 + $0x1c0] ss:$8 sps:$4 sm:$0xff]   ;;  %v4453_v48 = vld [vmem:[%s6401_s0 + $0x4c] ss:$16 sps:$4 sm:$0xff]  }
   0xd   :  { %v4415_v27 = vld [vmem:[%s6400_s2 + $0xb0] ss:$8 sps:$4 sm:$0xff]   ;;  %v4421_v29 = vld [vmem:[%s6400_s2 + $0xa0] ss:$8 sps:$4 sm:$0xff]   ;;  %v4363_v49 = vld [vmem:[%s6400_s2 + $0x44] ss:$8 sps:$4 sm:$0xff]  }
   0xe   :  { %1379 = vmatpush1.bf16.msra.mxu0 %v4361_v7  ;;  %v4418_v28 = vld [vmem:[%s6400_s2 + $0x1b0] ss:$8 sps:$4 sm:$0xff]   ;;  %v4424_v30 = vld [vmem:[%s6400_s2 + $0x1a0] ss:$8 sps:$4 sm:$0xff]   ;;  %v4366_v50 = vld [vmem:[%s6400_s2 + $0x144] ss:$8 sps:$4 sm:$0xff]  }
   0xf   :  { %1380 = vmatprep.subr.bf16.mxu0 %v4824_v0  ;;  %1668 = vmatpush1.bf16.msra.mxu1 %v4364_v8  ;;  %v4427_v31 = vld [vmem:[%s6400_s2 + $0x90] ss:$8 sps:$4 sm:$0xff]   ;;  %v4433_v33 = vld [vmem:[%s6400_s2 + $0x80] ss:$8 sps:$4 sm:$0xff]   ;;  %v4369_v51 = vld [vmem:[%s6400_s2 + $0x34] ss:$8 sps:$4 sm:$0xff]  }
  0x10   :  { %1669 = vmatprep.subr.bf16.mxu1 %v4824_v0  ;;  %v4430_v32 = vld [vmem:[%s6400_s2 + $0x190] ss:$8 sps:$4 sm:$0xff]   ;;  %v4436_v35 = vld [vmem:[%s6400_s2 + $0x180] ss:$8 sps:$4 sm:$0xff]   ;;  %v4457_v53 = vld [vmem:[%s6401_s0 + $0x64] ss:$16 sps:$4 sm:$0xff]  }
  0x11   :  { %v4439_v36 = vld [vmem:[%s6401_s0] ss:$16 sps:$4 sm:$0xff]   ;;  %v4442_v39 = vld [vmem:[%s6401_s0 + $0x8] ss:$16 sps:$4 sm:$0xff]   ;;  %v4372_v54 = vld [vmem:[%s6400_s2 + $0x134] ss:$8 sps:$4 sm:$0xff]  }
  0x12   :  { %1381 = vmatpush1.bf16.msra.mxu0 %v4367_v9  ;;  %v4449_v44 = vld [vmem:[%s6401_s0 + $0x20] ss:$16 sps:$4 sm:$0xff]   ;;  %v4450_v47 = vld [vmem:[%s6401_s0 + $0x28] ss:$16 sps:$4 sm:$0xff]   ;;  %v4459_v56 = vld [vmem:[%s6401_s0 + $0x6c] ss:$16 sps:$4 sm:$0xff]  }
  0x13   :  { %1382 = vmatprep.subr.bf16.mxu0 %v4824_v0  ;;  %1670 = vmatpush1.bf16.msra.mxu1 %v4370_v10  ;;  %v4455_v52 = vld [vmem:[%s6401_s0 + $0x40] ss:$16 sps:$4 sm:$0xff]   ;;  %v4456_v55 = vld [vmem:[%s6401_s0 + $0x48] ss:$16 sps:$4 sm:$0xff]   ;;  %v4375_v57 = vld [vmem:[%s6400_s2 + $0x24] ss:$8 sps:$4 sm:$0xff]  }
  0x14   :  { %1671 = vmatprep.subr.bf16.mxu1 %v4824_v0  ;;  %v4378_v58 = vld [vmem:[%s6400_s2 + $0x124] ss:$8 sps:$4 sm:$0xff]   ;;  %v4381_v59 = vld [vmem:[%s6400_s2 + $0x14] ss:$8 sps:$4 sm:$0xff]   ;;  %v4461_v60 = vld [vmem:[%s6401_s0 + $0x60] ss:$16 sps:$4 sm:$0xff]  }
  0x15   :  { %v4463_v61 = vld [vmem:[%s6401_s0 + $0x84] ss:$16 sps:$4 sm:$0xff]   ;;  %v4462_v63 = vld [vmem:[%s6401_s0 + $0x68] ss:$16 sps:$4 sm:$0xff]   ;;  %v4465_v1 = vld [vmem:[%s6401_s0 + $0x8c] ss:$16 sps:$4 sm:$0xff]  }
  0x16   :  { %1383 = vmatpush1.bf16.msra.mxu0 %v4373_v11  ;;  %v4384_v62 = vld [vmem:[%s6400_s2 + $0x114] ss:$8 sps:$4 sm:$0xff]   ;;  %v4387_v2 = vld [vmem:[%s6400_s2 + $0x4] ss:$8 sps:$4 sm:$0xff]   ;;  %v4467_v5 = vld [vmem:[%s6401_s0 + $0x80] ss:$16 sps:$4 sm:$0xff]  }
  0x17   :  { %1384 = vmatprep.subr.bf16.mxu0 %v4824_v0  ;;  %1672 = vmatpush1.bf16.msra.mxu1 %v4376_v12  ;;  %v4390_v3 = vld [vmem:[%s6400_s2 + $0x104] ss:$8 sps:$4 sm:$0xff]   ;;  %v4393_v4 = vld [vmem:[%s6400_s2 + $0xf4] ss:$8 sps:$4 sm:$0xff]   ;;  %v4468_v8 = vld [vmem:[%s6401_s0 + $0x88] ss:$16 sps:$4 sm:$0xff]  }
  0x18   :  { %1673 = vmatprep.subr.bf16.mxu1 %v4824_v0  ;;  %v4469_v6 = vld [vmem:[%s6401_s0 + $0xa4] ss:$16 sps:$4 sm:$0xff]   ;;  %v4471_v9 = vld [vmem:[%s6401_s0 + $0xac] ss:$16 sps:$4 sm:$0xff]  }
  0x19   :  { %v4396_v7 = vld [vmem:[%s6400_s2 + $0x1f4] ss:$8 sps:$4 sm:$0xff]   ;;  %v4399_v10 = vld [vmem:[%s6400_s2 + $0xe4] ss:$8 sps:$4 sm:$0xff]  }
  0x1a   :  { %1385 = vmatpush1.bf16.msra.mxu0 %v4379_v13  ;;  %v4402_v11 = vld [vmem:[%s6400_s2 + $0x1e4] ss:$8 sps:$4 sm:$0xff]   ;;  %v4405_v12 = vld [vmem:[%s6400_s2 + $0xd4] ss:$8 sps:$4 sm:$0xff]   ;;  %v4473_v13 = vld [vmem:[%s6401_s0 + $0xa0] ss:$16 sps:$4 sm:$0xff]  }
  0x1b   :  { %1386 = vmatprep.subr.bf16.mxu0 %v4824_v0  ;;  %1674 = vmatpush1.bf16.msra.mxu1 %v4382_v14  ;;  %v4475_v14 = vld [vmem:[%s6401_s0 + $0xc4] ss:$16 sps:$4 sm:$0xff]  }
  0x1c   :  { %1675 = vmatprep.subr.bf16.mxu1 %v4824_v0  ;;  %v4420_v24 = vld [vmem:[%s6400_s2 + $0x1b4] ss:$8 sps:$4 sm:$0xff]   ;;  %v4423_v26 = vld [vmem:[%s6400_s2 + $0xa4] ss:$8 sps:$4 sm:$0xff]  }
  0x1e   :  { %1387 = vmatpush1.bf16.msra.mxu0 %v4385_v15  ;;  %v4474_v15 = vld [vmem:[%s6401_s0 + $0xa8] ss:$16 sps:$4 sm:$0xff]  }
  0x1f   :  { %1388 = vmatprep.subr.bf16.mxu0 %v4824_v0  ;;  %1676 = vmatpush1.bf16.msra.mxu1 %v4388_v16  ;;  %v4408_v16 = vld [vmem:[%s6400_s2 + $0x1d4] ss:$8 sps:$4 sm:$0xff]  }
  0x20   :  { %1677 = vmatprep.subr.bf16.mxu1 %v4824_v0 }
  0x22   :  { %1389 = vmatpush2.bf16.msra.mxu0 %v4391_v17  ;;  %v4477_v17 = vld [vmem:[%s6401_s0 + $0xcc] ss:$16 sps:$4 sm:$0xff]  }
  0x23   :  { %1390 = vmatprep.subr.bf16.mxu0 %v4824_v0  ;;  %1678 = vmatpush2.bf16.msra.mxu1 %v4394_v18  ;;  %v4411_v18 = vld [vmem:[%s6400_s2 + $0xc4] ss:$8 sps:$4 sm:$0xff]  }
  0x24   :  { %1679 = vmatprep.subr.bf16.mxu1 %v4824_v0 }
  0x26   :  { %1391 = vmatpush2.bf16.msra.mxu0 %v4397_v19  ;;  %v4414_v19 = vld [vmem:[%s6400_s2 + $0x1c4] ss:$8 sps:$4 sm:$0xff]  }
  0x27   :  { %1392 = vmatprep.subr.bf16.mxu0 %v4824_v0  ;;  %1680 = vmatpush2.bf16.msra.mxu1 %v4400_v20  ;;  %v4479_v20 = vld [vmem:[%s6401_s0 + $0xc0] ss:$16 sps:$4 sm:$0xff]  }
  0x28   :  { %1681 = vmatprep.subr.bf16.mxu1 %v4824_v0 }
  0x2a   :  { %1393 = vmatpush2.bf16.msra.mxu0 %v4403_v21  ;;  %v4417_v21 = vld [vmem:[%s6400_s2 + $0xb4] ss:$8 sps:$4 sm:$0xff]  }
  0x2b   :  { %1394 = vmatprep.subr.bf16.mxu0 %v4824_v0  ;;  %1682 = vmatpush2.bf16.msra.mxu1 %v4406_v22  ;;  %v4481_v22 = vld [vmem:[%s6401_s0 + $0xe4] ss:$16 sps:$4 sm:$0xff]  }
  0x2c   :  { %1683 = vmatprep.subr.bf16.mxu1 %v4824_v0 }
  0x2e   :  { %1395 = vmatpush2.bf16.msra.mxu0 %v4409_v23  ;;  %v4480_v23 = vld [vmem:[%s6401_s0 + $0xc8] ss:$16 sps:$4 sm:$0xff]  }
  0x2f   :  { %1396 = vmatprep.subr.bf16.mxu0 %v4824_v0  ;;  %1684 = vmatpush2.bf16.msra.mxu1 %v4412_v25  ;;  %v4483_v25 = vld [vmem:[%s6401_s0 + $0xec] ss:$16 sps:$4 sm:$0xff]  }
  0x30   :  { %1685 = vmatprep.subr.bf16.mxu1 %v4824_v0 }
  0x32   :  { %1397 = vmatpush2.bf16.msra.mxu0 %v4415_v27  ;;  %v4426_v27 = vld [vmem:[%s6400_s2 + $0x1a4] ss:$8 sps:$4 sm:$0xff]  }
  0x33   :  { %1398 = vmatprep.subr.bf16.mxu0 %v4824_v0  ;;  %1686 = vmatpush2.bf16.msra.mxu1 %v4418_v28  ;;  %v4485_v28 = vld [vmem:[%s6401_s0 + $0xe0] ss:$16 sps:$4 sm:$0xff]  }
  0x34   :  { %1687 = vmatprep.subr.bf16.mxu1 %v4824_v0 }
  0x36   :  { %1399 = vmatpush2.bf16.msra.mxu0 %v4421_v29  ;;  %v4429_v29 = vld [vmem:[%s6400_s2 + $0x94] ss:$8 sps:$4 sm:$0xff]  }
  0x37   :  { %1400 = vmatprep.subr.bf16.mxu0 %v4824_v0  ;;  %1688 = vmatpush2.bf16.msra.mxu1 %v4424_v30  ;;  %v4487_v30 = vld [vmem:[%s6401_s0 + $0x104] ss:$16 sps:$4 sm:$0xff]  }
  0x38   :  { %1689 = vmatprep.subr.bf16.mxu1 %v4824_v0 }
  0x3a   :  { %1401 = vmatpush2.bf16.msra.mxu0 %v4427_v31  ;;  %v4486_v31 = vld [vmem:[%s6401_s0 + $0xe8] ss:$16 sps:$4 sm:$0xff]  }
  0x3b   :  { %1402 = vmatprep.subr.bf16.mxu0 %v4824_v0  ;;  %1690 = vmatpush2.bf16.msra.mxu1 %v4430_v32  ;;  %v4432_v32 = vld [vmem:[%s6400_s2 + $0x194] ss:$8 sps:$4 sm:$0xff]  }
  0x3c   :  { %1691 = vmatprep.subr.bf16.mxu1 %v4824_v0 }
  0x3e   :  { %1403 = vmatpush2.bf16.msra.mxu0 %v4433_v33  ;;  %v4489_v33 = vld [vmem:[%s6401_s0 + $0x10c] ss:$16 sps:$4 sm:$0xff]  }
  0x3f   :  { %2910 = vmatprep.subr.bf16.mxu0 %v4824_v0  ;;  %1692 = vmatpush2.bf16.msra.mxu1 %v4436_v35  ;;  %v4438_v35 = vld [vmem:[%s6400_s2 + $0x184] ss:$8 sps:$4 sm:$0xff]  }
  0x40   :  { %3199 = vmatprep.subr.bf16.mxu1 %v4824_v0 }
  0x41   :  { %1405 = vmatmul.mubr.bf16.vlgmr.msra.gmra.mxu0 %v4439_v36  ;;  %v4491_v36 = vld [vmem:[%s6401_s0 + $0x100] ss:$16 sps:$4 sm:$0xff]  }
  0x42   :  { %2911 = vmatpush1.bf16.msra.mxu0 %v4345_v34  ;;  %1412 = vmatprep.mubr.bf16.mxu0 %v4445_v37  ;;  %v4435_v34 = vld [vmem:[%s6400_s2 + $0x84] ss:$8 sps:$4 sm:$0xff]  }
  0x43   :  { %1694 = vmatmul.mubr.bf16.vlgmr.msra.gmra.mxu1 %v4442_v39  ;;  %2912 = vmatprep.subr.bf16.mxu0 %v4824_v0  ;;  %v4493_v37 = vld [vmem:[%s6401_s0 + $0x124] ss:$16 sps:$4 sm:$0xff]   ;;  %v4495_v39 = vld [vmem:[%s6401_s0 + $0x12c] ss:$16 sps:$4 sm:$0xff]  }
  0x44   :  { %3200 = vmatpush1.bf16.msra.mxu1 %v4348_v38  ;;  %1701 = vmatprep.mubr.bf16.mxu1 %v4447_v40  ;;  %v4492_v38 = vld [vmem:[%s6401_s0 + $0x108] ss:$16 sps:$4 sm:$0xff]   ;;  %v4499_v40 = vld [vmem:[%s6401_s0 + $0x144] ss:$16 sps:$4 sm:$0xff]  }
  0x45   :  { %3201 = vmatprep.subr.bf16.mxu1 %v4824_v0 }
  0x46   :  { %2913 = vmatpush1.bf16.msra.mxu0 %v4351_v41  ;;  %v4498_v41 = vld [vmem:[%s6401_s0 + $0x128] ss:$16 sps:$4 sm:$0xff]  }
  0x47   :  { %2914 = vmatprep.subr.bf16.mxu0 %v4824_v0 }
  0x48   :  { %3202 = vmatpush1.bf16.msra.mxu1 %v4354_v42  ;;  %v4501_v42 = vld [vmem:[%s6401_s0 + $0x14c] ss:$16 sps:$4 sm:$0xff]  }
  0x49   :  { %1413 = vmatmul.mubr.bf16.gmra.mxu0 %v4449_v44  ;;  %3203 = vmatprep.subr.bf16.mxu1 %v4824_v0  ;;  %v4505_v44 = vld [vmem:[%s6401_s0 + $0x164] ss:$16 sps:$4 sm:$0xff]  }
  0x4a   :  { %1420 = vmatprep.mubr.bf16.mxu0 %v4451_v45  ;;  %2915 = vmatpush1.bf16.msra.mxu0 %v4357_v43  ;;  %v4503_v43 = vld [vmem:[%s6401_s0 + $0x140] ss:$16 sps:$4 sm:$0xff]   ;;  %v4504_v45 = vld [vmem:[%s6401_s0 + $0x148] ss:$16 sps:$4 sm:$0xff]  }
  0x4b   :  { %1702 = vmatmul.mubr.bf16.gmra.mxu1 %v4450_v47  ;;  %2916 = vmatprep.subr.bf16.mxu0 %v4824_v0  ;;  %v4509_v47 = vld [vmem:[%s6401_s0 + $0x160] ss:$16 sps:$4 sm:$0xff]  }
  0x4c   :  { %1709 = vmatprep.mubr.bf16.mxu1 %v4453_v48  ;;  %3204 = vmatpush1.bf16.msra.mxu1 %v4360_v46  ;;  %v4507_v46 = vld [vmem:[%s6401_s0 + $0x16c] ss:$16 sps:$4 sm:$0xff]   ;;  %v4511_v48 = vld [vmem:[%s6401_s0 + $0x184] ss:$16 sps:$4 sm:$0xff]  }
  0x4d   :  { %3205 = vmatprep.subr.bf16.mxu1 %v4824_v0 }
  0x4e   :  { %2917 = vmatpush1.bf16.msra.mxu0 %v4363_v49  ;;  %v4510_v49 = vld [vmem:[%s6401_s0 + $0x168] ss:$16 sps:$4 sm:$0xff]  }
  0x4f   :  { %2918 = vmatprep.subr.bf16.mxu0 %v4824_v0 }
  0x50   :  { %3206 = vmatpush1.bf16.msra.mxu1 %v4366_v50  ;;  %v4513_v50 = vld [vmem:[%s6401_s0 + $0x18c] ss:$16 sps:$4 sm:$0xff]  }
  0x51   :  { %1421 = vmatmul.mubr.bf16.gmra.mxu0 %v4455_v52  ;;  %3207 = vmatprep.subr.bf16.mxu1 %v4824_v0  ;;  %v4517_v52 = vld [vmem:[%s6401_s0 + $0x1a4] ss:$16 sps:$4 sm:$0xff]  }
  0x52   :  { %1428 = vmatprep.mubr.bf16.mxu0 %v4457_v53  ;;  %2919 = vmatpush1.bf16.msra.mxu0 %v4369_v51  ;;  %v4515_v51 = vld [vmem:[%s6401_s0 + $0x180] ss:$16 sps:$4 sm:$0xff]   ;;  %v4516_v53 = vld [vmem:[%s6401_s0 + $0x188] ss:$16 sps:$4 sm:$0xff]  }
  0x53   :  { %1710 = vmatmul.mubr.bf16.gmra.mxu1 %v4456_v55  ;;  %2920 = vmatprep.subr.bf16.mxu0 %v4824_v0  ;;  %v4521_v55 = vld [vmem:[%s6401_s0 + $0x1a0] ss:$16 sps:$4 sm:$0xff]  }
  0x54   :  { %1717 = vmatprep.mubr.bf16.mxu1 %v4459_v56  ;;  %3208 = vmatpush1.bf16.msra.mxu1 %v4372_v54  ;;  %v4519_v54 = vld [vmem:[%s6401_s0 + $0x1ac] ss:$16 sps:$4 sm:$0xff]   ;;  %v4523_v56 = vld [vmem:[%s6401_s0 + $0x1c4] ss:$16 sps:$4 sm:$0xff]  }
  0x55   :  { %3209 = vmatprep.subr.bf16.mxu1 %v4824_v0 }
  0x56   :  { %2921 = vmatpush1.bf16.msra.mxu0 %v4375_v57  ;;  %v4522_v57 = vld [vmem:[%s6401_s0 + $0x1a8] ss:$16 sps:$4 sm:$0xff]  }
  0x57   :  { %2922 = vmatprep.subr.bf16.mxu0 %v4824_v0 }
  0x58   :  { %3210 = vmatpush1.bf16.msra.mxu1 %v4378_v58  ;;  %v4525_v58 = vld [vmem:[%s6401_s0 + $0x1cc] ss:$16 sps:$4 sm:$0xff]  }
  0x59   :  { %1429 = vmatmul.mubr.bf16.gmra.mxu0 %v4461_v60  ;;  %3211 = vmatprep.subr.bf16.mxu1 %v4824_v0  ;;  %v4529_v60 = vld [vmem:[%s6401_s0 + $0x1e4] ss:$16 sps:$4 sm:$0xff]  }
  0x5a   :  { %1436 = vmatprep.mubr.bf16.mxu0 %v4463_v61  ;;  %2923 = vmatpush1.bf16.msra.mxu0 %v4381_v59  ;;  %v4527_v59 = vld [vmem:[%s6401_s0 + $0x1c0] ss:$16 sps:$4 sm:$0xff]   ;;  %v4528_v61 = vld [vmem:[%s6401_s0 + $0x1c8] ss:$16 sps:$4 sm:$0xff]  }
  0x5b   :  { %1718 = vmatmul.mubr.bf16.gmra.mxu1 %v4462_v63  ;;  %2924 = vmatprep.subr.bf16.mxu0 %v4824_v0  ;;  %v4533_v63 = vld [vmem:[%s6401_s0 + $0x1e0] ss:$16 sps:$4 sm:$0xff]  }
  0x5c   :  { %1725 = vmatprep.mubr.bf16.mxu1 %v4465_v1  ;;  %3212 = vmatpush1.bf16.msra.mxu1 %v4384_v62  ;;  %v4531_v62 = vld [vmem:[%s6401_s0 + $0x1ec] ss:$16 sps:$4 sm:$0xff]   ;;  %v4535_v1 = vld [vmem:[%s6401_s0 + $0x204] ss:$16 sps:$4 sm:$0xff]  }
  0x5d   :  { %3213 = vmatprep.subr.bf16.mxu1 %v4824_v0 }
  0x5e   :  { %2925 = vmatpush1.bf16.msra.mxu0 %v4387_v2  ;;  %v4534_v2 = vld [vmem:[%s6401_s0 + $0x1e8] ss:$16 sps:$4 sm:$0xff]  }
  0x5f   :  { %2926 = vmatprep.subr.bf16.mxu0 %v4824_v0 }
  0x60   :  { %3214 = vmatpush1.bf16.msra.mxu1 %v4390_v3  ;;  %v4537_v3 = vld [vmem:[%s6401_s0 + $0x20c] ss:$16 sps:$4 sm:$0xff]  }
  0x61   :  { %1437 = vmatmul.mubr.bf16.gmra.mxu0 %v4467_v5  ;;  %3215 = vmatprep.subr.bf16.mxu1 %v4824_v0  ;;  %v4541_v5 = vld [vmem:[%s6401_s0 + $0x224] ss:$16 sps:$4 sm:$0xff]  }
  0x62   :  { %1444 = vmatprep.mubr.bf16.mxu0 %v4469_v6  ;;  %2927 = vmatpush2.bf16.msra.mxu0 %v4393_v4  ;;  %v4539_v4 = vld [vmem:[%s6401_s0 + $0x200] ss:$16 sps:$4 sm:$0xff]   ;;  %v4540_v6 = vld [vmem:[%s6401_s0 + $0x208] ss:$16 sps:$4 sm:$0xff]  }
  0x63   :  { %1726 = vmatmul.mubr.bf16.gmra.mxu1 %v4468_v8  ;;  %2928 = vmatprep.subr.bf16.mxu0 %v4824_v0  ;;  %v4545_v8 = vld [vmem:[%s6401_s0 + $0x220] ss:$16 sps:$4 sm:$0xff]  }
  0x64   :  { %1733 = vmatprep.mubr.bf16.mxu1 %v4471_v9  ;;  %3216 = vmatpush2.bf16.msra.mxu1 %v4396_v7  ;;  %v4543_v7 = vld [vmem:[%s6401_s0 + $0x22c] ss:$16 sps:$4 sm:$0xff]   ;;  %v4547_v9 = vld [vmem:[%s6401_s0 + $0x244] ss:$16 sps:$4 sm:$0xff]  }
  0x65   :  { %3217 = vmatprep.subr.bf16.mxu1 %v4824_v0 }
  0x66   :  { %2929 = vmatpush2.bf16.msra.mxu0 %v4399_v10  ;;  %v4546_v10 = vld [vmem:[%s6401_s0 + $0x228] ss:$16 sps:$4 sm:$0xff]  }
  0x67   :  { %2930 = vmatprep.subr.bf16.mxu0 %v4824_v0 }
  0x68   :  { %3218 = vmatpush2.bf16.msra.mxu1 %v4402_v11  ;;  %v4549_v11 = vld [vmem:[%s6401_s0 + $0x24c] ss:$16 sps:$4 sm:$0xff]  }
  0x69   :  { %1445 = vmatmul.mubr.bf16.gmra.mxu0 %v4473_v13  ;;  %3219 = vmatprep.subr.bf16.mxu1 %v4824_v0  ;;  %v4553_v13 = vld [vmem:[%s6401_s0 + $0x264] ss:$16 sps:$4 sm:$0xff]  }
  0x6a   :  { %1452 = vmatprep.mubr.bf16.mxu0 %v4475_v14  ;;  %2931 = vmatpush2.bf16.msra.mxu0 %v4405_v12  ;;  %v4551_v12 = vld [vmem:[%s6401_s0 + $0x240] ss:$16 sps:$4 sm:$0xff]   ;;  %v4552_v14 = vld [vmem:[%s6401_s0 + $0x248] ss:$16 sps:$4 sm:$0xff]  }
  0x6b   :  { %1734 = vmatmul.mubr.bf16.gmra.mxu1 %v4474_v15  ;;  %2932 = vmatprep.subr.bf16.mxu0 %v4824_v0  ;;  %v4555_v15 = vld [vmem:[%s6401_s0 + $0x26c] ss:$16 sps:$4 sm:$0xff]  }
  0x6c   :  { %1741 = vmatprep.mubr.bf16.mxu1 %v4477_v17  ;;  %3220 = vmatpush2.bf16.msra.mxu1 %v4408_v16  ;;  %v4557_v16 = vld [vmem:[%s6401_s0 + $0x260] ss:$16 sps:$4 sm:$0xff]   ;;  %v4559_v17 = vld [vmem:[%s6401_s0 + $0x284] ss:$16 sps:$4 sm:$0xff]  }
  0x6d   :  { %3221 = vmatprep.subr.bf16.mxu1 %v4824_v0 }
  0x6e   :  { %2933 = vmatpush2.bf16.msra.mxu0 %v4411_v18  ;;  %v4558_v18 = vld [vmem:[%s6401_s0 + $0x268] ss:$16 sps:$4 sm:$0xff]  }
  0x6f   :  { %2934 = vmatprep.subr.bf16.mxu0 %v4824_v0 }
  0x70   :  { %3222 = vmatpush2.bf16.msra.mxu1 %v4414_v19  ;;  %v4561_v19 = vld [vmem:[%s6401_s0 + $0x28c] ss:$16 sps:$4 sm:$0xff]  }
  0x71   :  { %1453 = vmatmul.mubr.bf16.gmra.mxu0 %v4479_v20  ;;  %3223 = vmatprep.subr.bf16.mxu1 %v4824_v0  ;;  %v4563_v20 = vld [vmem:[%s6401_s0 + $0x280] ss:$16 sps:$4 sm:$0xff]  }
  0x72   :  { %1460 = vmatprep.mubr.bf16.mxu0 %v4481_v22  ;;  %2935 = vmatpush2.bf16.msra.mxu0 %v4417_v21  ;;  %v4565_v21 = vld [vmem:[%s6401_s0 + $0x2a4] ss:$16 sps:$4 sm:$0xff]   ;;  %v4564_v22 = vld [vmem:[%s6401_s0 + $0x288] ss:$16 sps:$4 sm:$0xff]  }
  0x73   :  { %1742 = vmatmul.mubr.bf16.gmra.mxu1 %v4480_v23  ;;  %2936 = vmatprep.subr.bf16.mxu0 %v4824_v0  ;;  %v4567_v23 = vld [vmem:[%s6401_s0 + $0x2ac] ss:$16 sps:$4 sm:$0xff]  }
  0x74   :  { %1749 = vmatprep.mubr.bf16.mxu1 %v4483_v25  ;;  %3224 = vmatpush2.bf16.msra.mxu1 %v4420_v24  ;;  %v4569_v24 = vld [vmem:[%s6401_s0 + $0x2a0] ss:$16 sps:$4 sm:$0xff]   ;;  %v4571_v25 = vld [vmem:[%s6401_s0 + $0x2c4] ss:$16 sps:$4 sm:$0xff]  }
  0x75   :  { %3225 = vmatprep.subr.bf16.mxu1 %v4824_v0 }
  0x76   :  { %2937 = vmatpush2.bf16.msra.mxu0 %v4423_v26  ;;  %v4570_v26 = vld [vmem:[%s6401_s0 + $0x2a8] ss:$16 sps:$4 sm:$0xff]  }
  0x77   :  { %2938 = vmatprep.subr.bf16.mxu0 %v4824_v0 }
  0x78   :  { %3226 = vmatpush2.bf16.msra.mxu1 %v4426_v27  ;;  %v4573_v27 = vld [vmem:[%s6401_s0 + $0x2cc] ss:$16 sps:$4 sm:$0xff]  }
  0x79   :  { %1461 = vmatmul.mubr.bf16.gmra.mxu0 %v4485_v28  ;;  %3227 = vmatprep.subr.bf16.mxu1 %v4824_v0  ;;  %v4575_v28 = vld [vmem:[%s6401_s0 + $0x2c0] ss:$16 sps:$4 sm:$0xff]  }
  0x7a   :  { %1468 = vmatprep.mubr.bf16.mxu0 %v4487_v30  ;;  %2939 = vmatpush2.bf16.msra.mxu0 %v4429_v29  ;;  %v4577_v29 = vld [vmem:[%s6401_s0 + $0x2e4] ss:$16 sps:$4 sm:$0xff]   ;;  %v4576_v30 = vld [vmem:[%s6401_s0 + $0x2c8] ss:$16 sps:$4 sm:$0xff]  }
  0x7b   :  { %1750 = vmatmul.mubr.bf16.gmra.mxu1 %v4486_v31  ;;  %2940 = vmatprep.subr.bf16.mxu0 %v4824_v0  ;;  %v4579_v31 = vld [vmem:[%s6401_s0 + $0x2ec] ss:$16 sps:$4 sm:$0xff]  }
  0x7c   :  { %1757 = vmatprep.mubr.bf16.mxu1 %v4489_v33  ;;  %3228 = vmatpush2.bf16.msra.mxu1 %v4432_v32  ;;  %v4581_v32 = vld [vmem:[%s6401_s0 + $0x2e0] ss:$16 sps:$4 sm:$0xff]   ;;  %v4583_v33 = vld [vmem:[%s6401_s0 + $0x304] ss:$16 sps:$4 sm:$0xff]  }
  0x7d   :  { %3229 = vmatprep.subr.bf16.mxu1 %v4824_v0  ;;  %v4497_v0 = vld [vmem:[%s6401_s0 + $0x120] ss:$16 sps:$4 sm:$0xff]  }
  0x7e   :  { %2941 = vmatpush2.bf16.msra.mxu0 %v4435_v34  ;;  %v4582_v34 = vld [vmem:[%s6401_s0 + $0x2e8] ss:$16 sps:$4 sm:$0xff]  }
  0x80   :  { %3230 = vmatpush2.bf16.msra.mxu1 %v4438_v35  ;;  %v4585_v35 = vld [vmem:[%s6401_s0 + $0x30c] ss:$16 sps:$4 sm:$0xff]  }
  0x81   :  { %1469 = vmatmul.mubr.bf16.gmra.mxu0 %v4491_v36  ;;  %v3749_v36 = vlaneseq }
  0x82   :  { %1476 = vmatprep.mubr.bf16.mxu0 %v4493_v37 }
  0x83   :  { %1758 = vmatmul.mubr.bf16.gmra.mxu1 %v4492_v38  ;;  %v5400_v37 = vshrl.u32 %v3749_v36, 7  ;;  %v4587_v38 = vld [vmem:[%s6401_s0 + $0x300] ss:$16 sps:$4 sm:$0xff]   ;;  %v4615_v36 = vld [vmem:[%s6401_s0 + $0x3a4] ss:$16 sps:$4 sm:$0xff]  }
  0x84   :  { %1765 = vmatprep.mubr.bf16.mxu1 %v4495_v39  ;;  %v4589_v39 = vld [vmem:[%s6401_s0 + $0x324] ss:$16 sps:$4 sm:$0xff]  }
  0x89   :  { %1477 = vmatmul.mubr.bf16.gmra.mxu0 %v4497_v0  ;;  %v4588_v0 = vld [vmem:[%s6401_s0 + $0x308] ss:$16 sps:$4 sm:$0xff]  }
  0x8a   :  { %1484 = vmatprep.mubr.bf16.mxu0 %v4499_v40  ;;  %v3751_v40 = vsub.s32 0, %v5400_v37 }
  0x8b   :  { %1766 = vmatmul.mubr.bf16.gmra.mxu1 %v4498_v41  ;;  %v4591_v41 = vld [vmem:[%s6401_s0 + $0x32c] ss:$16 sps:$4 sm:$0xff]  }
  0x8c   :  { %1773 = vmatprep.mubr.bf16.mxu1 %v4501_v42 }
  0x91   :  { %1485 = vmatmul.mubr.bf16.gmra.mxu0 %v4503_v43  ;;  %v3747_v43 = vld [vmem:[%s6403_s3] sm:$0x3] }
  0x92   :  { %1492 = vmatprep.mubr.bf16.mxu0 %v4505_v44 }
  0x93   :  { %1774 = vmatmul.mubr.bf16.gmra.mxu1 %v4504_v45 }
  0x94   :  { %1781 = vmatprep.mubr.bf16.mxu1 %v4507_v46 }
  0x99   :  { %1493 = vmatmul.mubr.bf16.gmra.mxu0 %v4509_v47  ;;  %v5418_v47 = vrot.slane %v3747_v43, %v3751_v40 }
  0x9a   :  { %1500 = vmatprep.mubr.bf16.mxu0 %v4511_v48 }
  0x9b   :  { %1782 = vmatmul.mubr.bf16.gmra.mxu1 %v4510_v49 }
  0x9c   :  { %1789 = vmatprep.mubr.bf16.mxu1 %v4513_v50  ;;  %v4593_v50 = vld [vmem:[%s6401_s0 + $0x320] ss:$16 sps:$4 sm:$0xff]  }
  0xa1   :  { %1501 = vmatmul.mubr.bf16.gmra.mxu0 %v4515_v51  ;;  %v4595_v51 = vld [vmem:[%s6401_s0 + $0x344] ss:$16 sps:$4 sm:$0xff]  }
  0xa2   :  { %1508 = vmatprep.mubr.bf16.mxu0 %v4517_v52 }
  0xa3   :  { %1790 = vmatmul.mubr.bf16.gmra.mxu1 %v4516_v53 }
  0xa4   :  { %1797 = vmatprep.mubr.bf16.mxu1 %v4519_v54  ;;  %v4594_v54 = vld [vmem:[%s6401_s0 + $0x328] ss:$16 sps:$4 sm:$0xff]  }
  0xa9   :  { %1509 = vmatmul.mubr.bf16.gmra.mxu0 %v4521_v55 }
  0xaa   :  { %1516 = vmatprep.mubr.bf16.mxu0 %v4523_v56 }
  0xab   :  { %1798 = vmatmul.mubr.bf16.gmra.mxu1 %v4522_v57  ;;  %v4597_v57 = vld [vmem:[%s6401_s0 + $0x34c] ss:$16 sps:$4 sm:$0xff]  }
  0xac   :  { %1805 = vmatprep.mubr.bf16.mxu1 %v4525_v58 }
  0xb1   :  { %1517 = vmatmul.mubr.bf16.gmra.mxu0 %v4527_v59 }
  0xb2   :  { %1524 = vmatprep.mubr.bf16.mxu0 %v4529_v60 }
  0xb3   :  { %1806 = vmatmul.mubr.bf16.gmra.mxu1 %v4528_v61 }
  0xb4   :  { %1813 = vmatprep.mubr.bf16.mxu1 %v4531_v62 }
  0xb9   :  { %1525 = vmatmul.mubr.bf16.gmra.mxu0 %v4533_v63 }
  0xba   :  { %1532 = vmatprep.mubr.bf16.mxu0 %v4535_v1 }
  0xbb   :  { %1814 = vmatmul.mubr.bf16.gmra.mxu1 %v4534_v2 }
  0xbc   :  { %1821 = vmatprep.mubr.bf16.mxu1 %v4537_v3  ;;  %v4599_v3 = vld [vmem:[%s6401_s0 + $0x340] ss:$16 sps:$4 sm:$0xff]  }
  0xc1   :  { %1533 = vmatmul.mubr.bf16.gmra.mxu0 %v4539_v4  ;;  %v4601_v4 = vld [vmem:[%s6401_s0 + $0x364] ss:$16 sps:$4 sm:$0xff]  }
  0xc2   :  { %1540 = vmatprep.mubr.bf16.mxu0 %v4541_v5 }
  0xc3   :  { %1822 = vmatmul.mubr.bf16.gmra.mxu1 %v4540_v6 }
  0xc4   :  { %1829 = vmatprep.mubr.bf16.mxu1 %v4543_v7  ;;  %v4600_v7 = vld [vmem:[%s6401_s0 + $0x348] ss:$16 sps:$4 sm:$0xff]  }
  0xc9   :  { %1541 = vmatmul.mubr.bf16.gmra.mxu0 %v4545_v8 }
  0xca   :  { %1548 = vmatprep.mubr.bf16.mxu0 %v4547_v9 }
  0xcb   :  { %1830 = vmatmul.mubr.bf16.gmra.mxu1 %v4546_v10  ;;  %v4603_v10 = vld [vmem:[%s6401_s0 + $0x36c] ss:$16 sps:$4 sm:$0xff]  }
  0xcc   :  { %1837 = vmatprep.mubr.bf16.mxu1 %v4549_v11 }
  0xd1   :  { %1549 = vmatmul.mubr.bf16.gmra.mxu0 %v4551_v12 }
  0xd2   :  { %1556 = vmatprep.mubr.bf16.mxu0 %v4553_v13 }
  0xd3   :  { %1838 = vmatmul.mubr.bf16.gmra.mxu1 %v4552_v14 }
  0xd4   :  { %1845 = vmatprep.mubr.bf16.mxu1 %v4555_v15 }
  0xd9   :  { %1557 = vmatmul.mubr.bf16.gmra.mxu0 %v4557_v16 }
  0xda   :  { %1564 = vmatprep.mubr.bf16.mxu0 %v4559_v17 }
  0xdb   :  { %1846 = vmatmul.mubr.bf16.gmra.mxu1 %v4558_v18 }
  0xdc   :  { %1853 = vmatprep.mubr.bf16.mxu1 %v4561_v19  ;;  %v4605_v19 = vld [vmem:[%s6401_s0 + $0x360] ss:$16 sps:$4 sm:$0xff]  }
  0xe1   :  { %1565 = vmatmul.mubr.bf16.gmra.mxu0 %v4563_v20  ;;  %v4609_v20 = vld [vmem:[%s6401_s0 + $0x384] ss:$16 sps:$4 sm:$0xff]  }
  0xe2   :  { %1572 = vmatprep.mubr.bf16.mxu0 %v4565_v21 }
  0xe3   :  { %1854 = vmatmul.mubr.bf16.gmra.mxu1 %v4564_v22 }
  0xe4   :  { %1861 = vmatprep.mubr.bf16.mxu1 %v4567_v23  ;;  %v4606_v23 = vld [vmem:[%s6401_s0 + $0x368] ss:$16 sps:$4 sm:$0xff]  }
  0xe9   :  { %1573 = vmatmul.mubr.bf16.gmra.mxu0 %v4569_v24 }
  0xea   :  { %1580 = vmatprep.mubr.bf16.mxu0 %v4571_v25 }
  0xeb   :  { %1862 = vmatmul.mubr.bf16.gmra.mxu1 %v4570_v26  ;;  %v4612_v26 = vld [vmem:[%s6401_s0 + $0x38c] ss:$16 sps:$4 sm:$0xff]  }
  0xec   :  { %1869 = vmatprep.mubr.bf16.mxu1 %v4573_v27 }
  0xf1   :  { %1581 = vmatmul.mubr.bf16.gmra.mxu0 %v4575_v28 }
  0xf2   :  { %1588 = vmatprep.mubr.bf16.mxu0 %v4577_v29 }
  0xf3   :  { %1870 = vmatmul.mubr.bf16.gmra.mxu1 %v4576_v30 }
  0xf4   :  { %1877 = vmatprep.mubr.bf16.mxu1 %v4579_v31 }
  0xf9   :  { %1589 = vmatmul.mubr.bf16.gmra.mxu0 %v4581_v32 }
  0xfa   :  { %1596 = vmatprep.mubr.bf16.mxu0 %v4583_v33 }
  0xfb   :  { %1878 = vmatmul.mubr.bf16.gmra.mxu1 %v4582_v34 }
  0xfc   :  { %1885 = vmatprep.mubr.bf16.mxu1 %v4585_v35  ;;  %v4607_v35 = vld [vmem:[%s6401_s0 + $0x380] ss:$16 sps:$4 sm:$0xff]  }
 0x101   :  { %v1406_v42 = vpop.f32.mrf.mxu0  ;;  %1597 = vmatmul.mubr.bf16.gmra.mxu0 %v4587_v38 }
 0x102   :  { %1604 = vmatprep.mubr.bf16.mxu0 %v4589_v39 }
 0x103   :  { %v1695_v44 = vpop.f32.mrf.mxu1  ;;  %1886 = vmatmul.mubr.bf16.gmra.mxu1 %v4588_v0  ;;  %v1408_v45 = vpop.f32.mrf.mxu0  ;;  %v4610_v0 = vld [vmem:[%s6401_s0 + $0x388] ss:$16 sps:$4 sm:$0xff]  }
 0x104   :  { %v1696_v46 = vadd.f32 %v1695_v44, %v1406_v42  ;;  %1893 = vmatprep.mubr.bf16.mxu1 %v4591_v41  ;;  %v4618_v42 = vld [vmem:[%s6401_s0 + $0x3ac] ss:$16 sps:$4 sm:$0xff]  }
 0x105   :  { %v1697_v48 = vpop.f32.mrf.mxu1  ;;  %v1409_v49 = vpop.f32.mrf.mxu0 }
 0x106   :  { %v3759_v55 = vadd.f32 %v5418_v47, %v1696_v46 }
 0x107   :  { %v1698_v52 = vpop.f32.mrf.mxu1  ;;  %v1411_v53 = vpop.f32.mrf.mxu0 }
 0x108   :  { %v1699_v56 = vadd.f32 %v1698_v52, %v1409_v49  ;;  %3887 = vst [vmem:[%s6404_s4] sm:$0xff] %v3759_v55  ;;  %v4613_v52 = vld [vmem:[%s6401_s0 + $0x3a0] ss:$16 sps:$4 sm:$0xff]   ;;  %v4621_v53 = vld [vmem:[%s6401_s0 + $0x3c4] ss:$16 sps:$4 sm:$0xff]  }
 0x109   :  { %v1700_v58 = vpop.f32.mrf.mxu1  ;;  %v1414_v59 = vpop.f32.mrf.mxu0  ;;  %1605 = vmatmul.mubr.bf16.gmra.mxu0 %v4593_v50 }
 0x10a   :  { %1612 = vmatprep.mubr.bf16.mxu0 %v4595_v51  ;;  %v3761_v62 = vadd.f32 %v5418_v47, %v1699_v56  ;;  %v4616_v56 = vld [vmem:[%s6401_s0 + $0x3a8] ss:$16 sps:$4 sm:$0xff]  }
 0x10b   :  { %v1703_v60 = vpop.f32.mrf.mxu1  ;;  %1894 = vmatmul.mubr.bf16.gmra.mxu1 %v4594_v54  ;;  %v1416_v61 = vpop.f32.mrf.mxu0 }
 0x10c   :  { %v1704_v63 = vadd.f32 %v1703_v60, %v1414_v59  ;;  %1901 = vmatprep.mubr.bf16.mxu1 %v4597_v57  ;;  %3889 = vst [vmem:[%s6404_s4 + $0x10] sm:$0xff] %v3761_v62  ;;  %v4624_v59 = vld [vmem:[%s6401_s0 + $0x3cc] ss:$16 sps:$4 sm:$0xff]  }
 0x10d   :  { %v1705_v1 = vpop.f32.mrf.mxu1  ;;  %v1417_v2 = vpop.f32.mrf.mxu0 }
 0x10e   :  { %v3763_v8 = vadd.f32 %v5418_v47, %v1704_v63 }
 0x10f   :  { %v1706_v5 = vpop.f32.mrf.mxu1  ;;  %v1419_v6 = vpop.f32.mrf.mxu0 }
 0x110   :  { %v1707_v9 = vadd.f32 %v1706_v5, %v1417_v2  ;;  %3891 = vst [vmem:[%s6404_s4 + $0x20] sm:$0xff] %v3763_v8  ;;  %v4619_v5 = vld [vmem:[%s6401_s0 + $0x3c0] ss:$16 sps:$4 sm:$0xff]   ;;  %v4627_v6 = vld [vmem:[%s6401_s0 + $0x3e4] ss:$16 sps:$4 sm:$0xff]  }
 0x111   :  { %v1708_v11 = vpop.f32.mrf.mxu1  ;;  %v1422_v12 = vpop.f32.mrf.mxu0  ;;  %1613 = vmatmul.mubr.bf16.gmra.mxu0 %v4599_v3 }
 0x112   :  { %1620 = vmatprep.mubr.bf16.mxu0 %v4601_v4  ;;  %v3765_v15 = vadd.f32 %v5418_v47, %v1707_v9  ;;  %v4622_v9 = vld [vmem:[%s6401_s0 + $0x3c8] ss:$16 sps:$4 sm:$0xff]  }
 0x113   :  { %v1711_v13 = vpop.f32.mrf.mxu1  ;;  %1902 = vmatmul.mubr.bf16.gmra.mxu1 %v4600_v7  ;;  %v1424_v14 = vpop.f32.mrf.mxu0 }
 0x114   :  { %v1712_v16 = vadd.f32 %v1711_v13, %v1422_v12  ;;  %1909 = vmatprep.mubr.bf16.mxu1 %v4603_v10  ;;  %3893 = vst [vmem:[%s6404_s4 + $0x30] sm:$0xff] %v3765_v15  ;;  %v4630_v12 = vld [vmem:[%s6401_s0 + $0x3ec] ss:$16 sps:$4 sm:$0xff]  }
 0x115   :  { %v1713_v17 = vpop.f32.mrf.mxu1  ;;  %v1425_v18 = vpop.f32.mrf.mxu0 }
 0x116   :  { %v3767_v24 = vadd.f32 %v5418_v47, %v1712_v16 }
 0x117   :  { %v1714_v21 = vpop.f32.mrf.mxu1  ;;  %v1427_v22 = vpop.f32.mrf.mxu0 }
 0x118   :  { %v1715_v25 = vadd.f32 %v1714_v21, %v1425_v18  ;;  %3895 = vst [vmem:[%s6404_s4 + $0x40] sm:$0xff] %v3767_v24  ;;  %v4625_v21 = vld [vmem:[%s6401_s0 + $0x3e0] ss:$16 sps:$4 sm:$0xff]   ;;  %v4633_v22 = vld [vmem:[%s6402_s1 + $0x4] ss:$16 sps:$4 sm:$0xff]  }
 0x119   :  { %v1716_v27 = vpop.f32.mrf.mxu1  ;;  %v1430_v28 = vpop.f32.mrf.mxu0  ;;  %1621 = vmatmul.mubr.bf16.gmra.mxu0 %v4605_v19 }
 0x11a   :  { %1628 = vmatprep.mubr.bf16.mxu0 %v4609_v20  ;;  %v3769_v31 = vadd.f32 %v5418_v47, %v1715_v25  ;;  %v4628_v25 = vld [vmem:[%s6401_s0 + $0x3e8] ss:$16 sps:$4 sm:$0xff]  }
 0x11b   :  { %v1719_v29 = vpop.f32.mrf.mxu1  ;;  %1910 = vmatmul.mubr.bf16.gmra.mxu1 %v4606_v23  ;;  %v1432_v30 = vpop.f32.mrf.mxu0 }
 0x11c   :  { %v1720_v32 = vadd.f32 %v1719_v29, %v1430_v28  ;;  %1917 = vmatprep.mubr.bf16.mxu1 %v4612_v26  ;;  %3897 = vst [vmem:[%s6404_s4 + $0x50] sm:$0xff] %v3769_v31  ;;  %v4636_v28 = vld [vmem:[%s6402_s1 + $0xc] ss:$16 sps:$4 sm:$0xff]  }
 0x11d   :  { %v1721_v33 = vpop.f32.mrf.mxu1  ;;  %v1433_v34 = vpop.f32.mrf.mxu0 }
 0x11e   :  { %v3771_v40 = vadd.f32 %v5418_v47, %v1720_v32 }
 0x11f   :  { %v1722_v38 = vpop.f32.mrf.mxu1  ;;  %v1435_v39 = vpop.f32.mrf.mxu0 }
 0x120   :  { %v1723_v41 = vadd.f32 %v1722_v38, %v1433_v34  ;;  %3899 = vst [vmem:[%s6404_s4 + $0x60] sm:$0xff] %v3771_v40  ;;  %v4631_v38 = vld [vmem:[%s6402_s1] ss:$16 sps:$4 sm:$0xff]   ;;  %v4639_v39 = vld [vmem:[%s6402_s1 + $0x24] ss:$16 sps:$4 sm:$0xff]  }
 0x121   :  { %v1724_v43 = vpop.f32.mrf.mxu1  ;;  %v1438_v44 = vpop.f32.mrf.mxu0  ;;  %1629 = vmatmul.mubr.bf16.gmra.mxu0 %v4607_v35 }
 0x122   :  { %1636 = vmatprep.mubr.bf16.mxu0 %v4615_v36  ;;  %v3773_v48 = vadd.f32 %v5418_v47, %v1723_v41  ;;  %v4634_v41 = vld [vmem:[%s6402_s1 + $0x8] ss:$16 sps:$4 sm:$0xff]  }
 0x123   :  { %v1727_v45 = vpop.f32.mrf.mxu1  ;;  %1918 = vmatmul.mubr.bf16.gmra.mxu1 %v4610_v0  ;;  %v1440_v46 = vpop.f32.mrf.mxu0 }
 0x124   :  { %v1728_v49 = vadd.f32 %v1727_v45, %v1438_v44  ;;  %1925 = vmatprep.mubr.bf16.mxu1 %v4618_v42  ;;  %3901 = vst [vmem:[%s6404_s4 + $0x70] sm:$0xff] %v3773_v48  ;;  %v4642_v44 = vld [vmem:[%s6402_s1 + $0x2c] ss:$16 sps:$4 sm:$0xff]  }
 0x125   :  { %v1729_v50 = vpop.f32.mrf.mxu1  ;;  %v1441_v51 = vpop.f32.mrf.mxu0 }
 0x126   :  { %v3775_v57 = vadd.f32 %v5418_v47, %v1728_v49 }
 0x127   :  { %v1730_v54 = vpop.f32.mrf.mxu1  ;;  %v1443_v55 = vpop.f32.mrf.mxu0 }
 0x128   :  { %v1731_v58 = vadd.f32 %v1730_v54, %v1441_v51  ;;  %3903 = vst [vmem:[%s6404_s4 + $0x80] sm:$0xff] %v3775_v57  ;;  %v4637_v54 = vld [vmem:[%s6402_s1 + $0x20] ss:$16 sps:$4 sm:$0xff]   ;;  %v4645_v55 = vld [vmem:[%s6402_s1 + $0x44] ss:$16 sps:$4 sm:$0xff]  }
 0x129   :  { %v1732_v60 = vpop.f32.mrf.mxu1  ;;  %v1446_v61 = vpop.f32.mrf.mxu0  ;;  %1637 = vmatmul.mubr.bf16.gmra.mxu0 %v4613_v52 }
 0x12a   :  { %1644 = vmatprep.mubr.bf16.mxu0 %v4621_v53  ;;  %v3777_v1 = vadd.f32 %v5418_v47, %v1731_v58  ;;  %v4640_v58 = vld [vmem:[%s6402_s1 + $0x28] ss:$16 sps:$4 sm:$0xff]  }
 0x12b   :  { %v1735_v62 = vpop.f32.mrf.mxu1  ;;  %1926 = vmatmul.mubr.bf16.gmra.mxu1 %v4616_v56  ;;  %v1448_v63 = vpop.f32.mrf.mxu0 }
 0x12c   :  { %v1736_v2 = vadd.f32 %v1735_v62, %v1446_v61  ;;  %1933 = vmatprep.mubr.bf16.mxu1 %v4624_v59  ;;  %3905 = vst [vmem:[%s6404_s4 + $0x90] sm:$0xff] %v3777_v1  ;;  %v4648_v61 = vld [vmem:[%s6402_s1 + $0x4c] ss:$16 sps:$4 sm:$0xff]  }
 0x12d   :  { %v1737_v3 = vpop.f32.mrf.mxu1  ;;  %v1449_v4 = vpop.f32.mrf.mxu0 }
 0x12e   :  { %v3779_v10 = vadd.f32 %v5418_v47, %v1736_v2 }
 0x12f   :  { %v1738_v7 = vpop.f32.mrf.mxu1  ;;  %v1451_v8 = vpop.f32.mrf.mxu0 }
 0x130   :  { %v1739_v11 = vadd.f32 %v1738_v7, %v1449_v4  ;;  %3907 = vst [vmem:[%s6404_s4 + $0xa0] sm:$0xff] %v3779_v10  ;;  %v4643_v7 = vld [vmem:[%s6402_s1 + $0x40] ss:$16 sps:$4 sm:$0xff]   ;;  %v4651_v8 = vld [vmem:[%s6402_s1 + $0x64] ss:$16 sps:$4 sm:$0xff]  }
 0x131   :  { %v1740_v13 = vpop.f32.mrf.mxu1  ;;  %v1454_v14 = vpop.f32.mrf.mxu0  ;;  %1645 = vmatmul.mubr.bf16.gmra.mxu0 %v4619_v5 }
 0x132   :  { %1652 = vmatprep.mubr.bf16.mxu0 %v4627_v6  ;;  %v3781_v17 = vadd.f32 %v5418_v47, %v1739_v11  ;;  %v4646_v11 = vld [vmem:[%s6402_s1 + $0x48] ss:$16 sps:$4 sm:$0xff]  }
 0x133   :  { %v1743_v15 = vpop.f32.mrf.mxu1  ;;  %1934 = vmatmul.mubr.bf16.gmra.mxu1 %v4622_v9  ;;  %v1456_v16 = vpop.f32.mrf.mxu0 }
 0x134   :  { %v1744_v18 = vadd.f32 %v1743_v15, %v1454_v14  ;;  %1941 = vmatprep.mubr.bf16.mxu1 %v4630_v12  ;;  %3909 = vst [vmem:[%s6404_s4 + $0xb0] sm:$0xff] %v3781_v17  ;;  %v4654_v14 = vld [vmem:[%s6402_s1 + $0x6c] ss:$16 sps:$4 sm:$0xff]  }
 0x135   :  { %v1745_v19 = vpop.f32.mrf.mxu1  ;;  %v1457_v20 = vpop.f32.mrf.mxu0 }
 0x136   :  { %v3783_v26 = vadd.f32 %v5418_v47, %v1744_v18 }
 0x137   :  { %v1746_v23 = vpop.f32.mrf.mxu1  ;;  %v1459_v24 = vpop.f32.mrf.mxu0 }
 0x138   :  { %v1747_v27 = vadd.f32 %v1746_v23, %v1457_v20  ;;  %3911 = vst [vmem:[%s6404_s4 + $0xc0] sm:$0xff] %v3783_v26  ;;  %v4649_v23 = vld [vmem:[%s6402_s1 + $0x60] ss:$16 sps:$4 sm:$0xff]   ;;  %v4657_v24 = vld [vmem:[%s6402_s1 + $0x84] ss:$16 sps:$4 sm:$0xff]  }
 0x139   :  { %v1748_v29 = vpop.f32.mrf.mxu1  ;;  %v1462_v30 = vpop.f32.mrf.mxu0  ;;  %1653 = vmatmul.mubr.bf16.gmra.mxu0 %v4625_v21 }
 0x13a   :  { %2942 = vmatprep.mubr.bf16.mxu0 %v4633_v22  ;;  %v3785_v33 = vadd.f32 %v5418_v47, %v1747_v27  ;;  %v4652_v27 = vld [vmem:[%s6402_s1 + $0x68] ss:$16 sps:$4 sm:$0xff]  }
 0x13b   :  { %v1751_v31 = vpop.f32.mrf.mxu1  ;;  %1942 = vmatmul.mubr.bf16.gmra.mxu1 %v4628_v25  ;;  %v1464_v32 = vpop.f32.mrf.mxu0 }
 0x13c   :  { %v1752_v34 = vadd.f32 %v1751_v31, %v1462_v30  ;;  %3231 = vmatprep.mubr.bf16.mxu1 %v4636_v28  ;;  %3913 = vst [vmem:[%s6404_s4 + $0xd0] sm:$0xff] %v3785_v33  ;;  %v4660_v30 = vld [vmem:[%s6402_s1 + $0x8c] ss:$16 sps:$4 sm:$0xff]  }
 0x13d   :  { %v1753_v35 = vpop.f32.mrf.mxu1  ;;  %v1465_v36 = vpop.f32.mrf.mxu0 }
 0x13e   :  { %v3787_v42 = vadd.f32 %v5418_v47, %v1752_v34 }
 0x13f   :  { %v1754_v0 = vpop.f32.mrf.mxu1  ;;  %v1467_v40 = vpop.f32.mrf.mxu0 }
 0x140   :  { %v1755_v43 = vadd.f32 %v1754_v0, %v1465_v36  ;;  %3915 = vst [vmem:[%s6404_s4 + $0xe0] sm:$0xff] %v3787_v42  ;;  %v4655_v0 = vld [vmem:[%s6402_s1 + $0x80] ss:$16 sps:$4 sm:$0xff]   ;;  %v4663_v40 = vld [vmem:[%s6402_s1 + $0xa4] ss:$16 sps:$4 sm:$0xff]  }
 0x141   :  { %v1756_v45 = vpop.f32.mrf.mxu1  ;;  %v1470_v46 = vpop.f32.mrf.mxu0  ;;  %2943 = vmatmul.mubr.bf16.vlgmr.msra.gmra.mxu0 %v4631_v38 }
 0x142   :  { %2950 = vmatprep.mubr.bf16.mxu0 %v4639_v39  ;;  %v3789_v50 = vadd.f32 %v5418_v47, %v1755_v43  ;;  %v4658_v43 = vld [vmem:[%s6402_s1 + $0x88] ss:$16 sps:$4 sm:$0xff]  }
 0x143   :  { %v1759_v48 = vpop.f32.mrf.mxu1  ;;  %3232 = vmatmul.mubr.bf16.vlgmr.msra.gmra.mxu1 %v4634_v41  ;;  %v1472_v49 = vpop.f32.mrf.mxu0 }
 0x144   :  { %v1760_v51 = vadd.f32 %v1759_v48, %v1470_v46  ;;  %3239 = vmatprep.mubr.bf16.mxu1 %v4642_v44  ;;  %3917 = vst [vmem:[%s6404_s4 + $0xf0] sm:$0xff] %v3789_v50  ;;  %v4666_v46 = vld [vmem:[%s6402_s1 + $0xac] ss:$16 sps:$4 sm:$0xff]  }
 0x145   :  { %v1761_v52 = vpop.f32.mrf.mxu1  ;;  %v1473_v53 = vpop.f32.mrf.mxu0 }
 0x146   :  { %v3791_v59 = vadd.f32 %v5418_v47, %v1760_v51 }
 0x147   :  { %v1762_v56 = vpop.f32.mrf.mxu1  ;;  %v1475_v57 = vpop.f32.mrf.mxu0 }
 0x148   :  { %v1763_v60 = vadd.f32 %v1762_v56, %v1473_v53  ;;  %3919 = vst [vmem:[%s6404_s4 + $0x100] sm:$0xff] %v3791_v59  ;;  %v4661_v56 = vld [vmem:[%s6402_s1 + $0xa0] ss:$16 sps:$4 sm:$0xff]   ;;  %v4669_v57 = vld [vmem:[%s6402_s1 + $0xc4] ss:$16 sps:$4 sm:$0xff]  }
 0x149   :  { %v1764_v62 = vpop.f32.mrf.mxu1  ;;  %v1478_v63 = vpop.f32.mrf.mxu0  ;;  %2951 = vmatmul.mubr.bf16.gmra.mxu0 %v4637_v54 }
 0x14a   :  { %2958 = vmatprep.mubr.bf16.mxu0 %v4645_v55  ;;  %v3793_v3 = vadd.f32 %v5418_v47, %v1763_v60  ;;  %v4664_v60 = vld [vmem:[%s6402_s1 + $0xa8] ss:$16 sps:$4 sm:$0xff]  }
 0x14b   :  { %v1767_v1 = vpop.f32.mrf.mxu1  ;;  %3240 = vmatmul.mubr.bf16.gmra.mxu1 %v4640_v58  ;;  %v1480_v2 = vpop.f32.mrf.mxu0 }
 0x14c   :  { %v1768_v4 = vadd.f32 %v1767_v1, %v1478_v63  ;;  %3247 = vmatprep.mubr.bf16.mxu1 %v4648_v61  ;;  %3921 = vst [vmem:[%s6404_s4 + $0x110] sm:$0xff] %v3793_v3  ;;  %v4672_v63 = vld [vmem:[%s6402_s1 + $0xcc] ss:$16 sps:$4 sm:$0xff]  }
 0x14d   :  { %v1769_v5 = vpop.f32.mrf.mxu1  ;;  %v1481_v6 = vpop.f32.mrf.mxu0 }
 0x14e   :  { %v3795_v12 = vadd.f32 %v5418_v47, %v1768_v4 }
 0x14f   :  { %v1770_v9 = vpop.f32.mrf.mxu1  ;;  %v1483_v10 = vpop.f32.mrf.mxu0 }
 0x150   :  { %v1771_v13 = vadd.f32 %v1770_v9, %v1481_v6  ;;  %3923 = vst [vmem:[%s6404_s4 + $0x120] sm:$0xff] %v3795_v12  ;;  %v4667_v9 = vld [vmem:[%s6402_s1 + $0xc0] ss:$16 sps:$4 sm:$0xff]   ;;  %v4675_v10 = vld [vmem:[%s6402_s1 + $0xe4] ss:$16 sps:$4 sm:$0xff]  }
 0x151   :  { %v1772_v15 = vpop.f32.mrf.mxu1  ;;  %v1486_v16 = vpop.f32.mrf.mxu0  ;;  %2959 = vmatmul.mubr.bf16.gmra.mxu0 %v4643_v7 }
 0x152   :  { %2966 = vmatprep.mubr.bf16.mxu0 %v4651_v8  ;;  %v3797_v19 = vadd.f32 %v5418_v47, %v1771_v13  ;;  %v4670_v13 = vld [vmem:[%s6402_s1 + $0xc8] ss:$16 sps:$4 sm:$0xff]  }
 0x153   :  { %v1775_v17 = vpop.f32.mrf.mxu1  ;;  %3248 = vmatmul.mubr.bf16.gmra.mxu1 %v4646_v11  ;;  %v1488_v18 = vpop.f32.mrf.mxu0 }
 0x154   :  { %v1776_v20 = vadd.f32 %v1775_v17, %v1486_v16  ;;  %3255 = vmatprep.mubr.bf16.mxu1 %v4654_v14  ;;  %3925 = vst [vmem:[%s6404_s4 + $0x130] sm:$0xff] %v3797_v19  ;;  %v4678_v16 = vld [vmem:[%s6402_s1 + $0xec] ss:$16 sps:$4 sm:$0xff]  }
 0x155   :  { %v1777_v21 = vpop.f32.mrf.mxu1  ;;  %v1489_v22 = vpop.f32.mrf.mxu0 }
 0x156   :  { %v3799_v28 = vadd.f32 %v5418_v47, %v1776_v20 }
 0x157   :  { %v1778_v25 = vpop.f32.mrf.mxu1  ;;  %v1491_v26 = vpop.f32.mrf.mxu0 }
 0x158   :  { %v1779_v29 = vadd.f32 %v1778_v25, %v1489_v22  ;;  %3927 = vst [vmem:[%s6404_s4 + $0x140] sm:$0xff] %v3799_v28  ;;  %v4673_v25 = vld [vmem:[%s6402_s1 + $0xe0] ss:$16 sps:$4 sm:$0xff]   ;;  %v4681_v26 = vld [vmem:[%s6402_s1 + $0x104] ss:$16 sps:$4 sm:$0xff]  }
 0x159   :  { %v1780_v31 = vpop.f32.mrf.mxu1  ;;  %v1494_v32 = vpop.f32.mrf.mxu0  ;;  %2967 = vmatmul.mubr.bf16.gmra.mxu0 %v4649_v23 }
 0x15a   :  { %2974 = vmatprep.mubr.bf16.mxu0 %v4657_v24  ;;  %v3801_v35 = vadd.f32 %v5418_v47, %v1779_v29  ;;  %v4676_v29 = vld [vmem:[%s6402_s1 + $0xe8] ss:$16 sps:$4 sm:$0xff]  }
 0x15b   :  { %v1783_v33 = vpop.f32.mrf.mxu1  ;;  %3256 = vmatmul.mubr.bf16.gmra.mxu1 %v4652_v27  ;;  %v1496_v34 = vpop.f32.mrf.mxu0 }
 0x15c   :  { %v1784_v36 = vadd.f32 %v1783_v33, %v1494_v32  ;;  %3263 = vmatprep.mubr.bf16.mxu1 %v4660_v30  ;;  %3929 = vst [vmem:[%s6404_s4 + $0x150] sm:$0xff] %v3801_v35  ;;  %v4684_v32 = vld [vmem:[%s6402_s1 + $0x10c] ss:$16 sps:$4 sm:$0xff]  }
 0x15d   :  { %v1785_v38 = vpop.f32.mrf.mxu1  ;;  %v1497_v39 = vpop.f32.mrf.mxu0 }
 0x15e   :  { %v3803_v44 = vadd.f32 %v5418_v47, %v1784_v36 }
 0x15f   :  { %v1786_v41 = vpop.f32.mrf.mxu1  ;;  %v1499_v42 = vpop.f32.mrf.mxu0 }
 0x160   :  { %v1787_v45 = vadd.f32 %v1786_v41, %v1497_v39  ;;  %3931 = vst [vmem:[%s6404_s4 + $0x160] sm:$0xff] %v3803_v44  ;;  %v4679_v41 = vld [vmem:[%s6402_s1 + $0x100] ss:$16 sps:$4 sm:$0xff]   ;;  %v4687_v42 = vld [vmem:[%s6402_s1 + $0x124] ss:$16 sps:$4 sm:$0xff]  }
 0x161   :  { %v1788_v48 = vpop.f32.mrf.mxu1  ;;  %v1502_v49 = vpop.f32.mrf.mxu0  ;;  %2975 = vmatmul.mubr.bf16.gmra.mxu0 %v4655_v0 }
 0x162   :  { %2982 = vmatprep.mubr.bf16.mxu0 %v4663_v40  ;;  %v3805_v52 = vadd.f32 %v5418_v47, %v1787_v45  ;;  %v4682_v45 = vld [vmem:[%s6402_s1 + $0x108] ss:$16 sps:$4 sm:$0xff]  }
 0x163   :  { %v1791_v50 = vpop.f32.mrf.mxu1  ;;  %3264 = vmatmul.mubr.bf16.gmra.mxu1 %v4658_v43  ;;  %v1504_v51 = vpop.f32.mrf.mxu0 }
 0x164   :  { %v1792_v53 = vadd.f32 %v1791_v50, %v1502_v49  ;;  %3271 = vmatprep.mubr.bf16.mxu1 %v4666_v46  ;;  %3933 = vst [vmem:[%s6404_s4 + $0x170] sm:$0xff] %v3805_v52  ;;  %v4690_v49 = vld [vmem:[%s6402_s1 + $0x12c] ss:$16 sps:$4 sm:$0xff]  }
 0x165   :  { %v1793_v54 = vpop.f32.mrf.mxu1  ;;  %v1505_v55 = vpop.f32.mrf.mxu0 }
 0x166   :  { %v3807_v61 = vadd.f32 %v5418_v47, %v1792_v53 }
 0x167   :  { %v1794_v58 = vpop.f32.mrf.mxu1  ;;  %v1507_v59 = vpop.f32.mrf.mxu0 }
 0x168   :  { %v1795_v62 = vadd.f32 %v1794_v58, %v1505_v55  ;;  %3935 = vst [vmem:[%s6404_s4 + $0x180] sm:$0xff] %v3807_v61  ;;  %v4685_v58 = vld [vmem:[%s6402_s1 + $0x120] ss:$16 sps:$4 sm:$0xff]   ;;  %v4693_v59 = vld [vmem:[%s6402_s1 + $0x144] ss:$16 sps:$4 sm:$0xff]  }
 0x169   :  { %v1796_v1 = vpop.f32.mrf.mxu1  ;;  %v1510_v2 = vpop.f32.mrf.mxu0  ;;  %2983 = vmatmul.mubr.bf16.gmra.mxu0 %v4661_v56 }
 0x16a   :  { %2990 = vmatprep.mubr.bf16.mxu0 %v4669_v57  ;;  %v3809_v5 = vadd.f32 %v5418_v47, %v1795_v62  ;;  %v4688_v62 = vld [vmem:[%s6402_s1 + $0x128] ss:$16 sps:$4 sm:$0xff]  }
 0x16b   :  { %v1799_v3 = vpop.f32.mrf.mxu1  ;;  %3272 = vmatmul.mubr.bf16.gmra.mxu1 %v4664_v60  ;;  %v1512_v4 = vpop.f32.mrf.mxu0 }
 0x16c   :  { %v1800_v6 = vadd.f32 %v1799_v3, %v1510_v2  ;;  %3279 = vmatprep.mubr.bf16.mxu1 %v4672_v63  ;;  %3937 = vst [vmem:[%s6404_s4 + $0x190] sm:$0xff] %v3809_v5  ;;  %v4696_v2 = vld [vmem:[%s6402_s1 + $0x14c] ss:$16 sps:$4 sm:$0xff]  }
 0x16d   :  { %v1801_v7 = vpop.f32.mrf.mxu1  ;;  %v1513_v8 = vpop.f32.mrf.mxu0 }
 0x16e   :  { %v3811_v14 = vadd.f32 %v5418_v47, %v1800_v6 }
 0x16f   :  { %v1802_v11 = vpop.f32.mrf.mxu1  ;;  %v1515_v12 = vpop.f32.mrf.mxu0 }
 0x170   :  { %v1803_v15 = vadd.f32 %v1802_v11, %v1513_v8  ;;  %3939 = vst [vmem:[%s6404_s4 + $0x1a0] sm:$0xff] %v3811_v14  ;;  %v4691_v11 = vld [vmem:[%s6402_s1 + $0x140] ss:$16 sps:$4 sm:$0xff]   ;;  %v4699_v12 = vld [vmem:[%s6402_s1 + $0x164] ss:$16 sps:$4 sm:$0xff]  }
 0x171   :  { %v1804_v17 = vpop.f32.mrf.mxu1  ;;  %v1518_v18 = vpop.f32.mrf.mxu0  ;;  %2991 = vmatmul.mubr.bf16.gmra.mxu0 %v4667_v9 }
 0x172   :  { %2998 = vmatprep.mubr.bf16.mxu0 %v4675_v10  ;;  %v3813_v21 = vadd.f32 %v5418_v47, %v1803_v15  ;;  %v4694_v15 = vld [vmem:[%s6402_s1 + $0x148] ss:$16 sps:$4 sm:$0xff]  }
 0x173   :  { %v1807_v19 = vpop.f32.mrf.mxu1  ;;  %3280 = vmatmul.mubr.bf16.gmra.mxu1 %v4670_v13  ;;  %v1520_v20 = vpop.f32.mrf.mxu0 }
 0x174   :  { %v1808_v22 = vadd.f32 %v1807_v19, %v1518_v18  ;;  %3287 = vmatprep.mubr.bf16.mxu1 %v4678_v16  ;;  %3941 = vst [vmem:[%s6404_s4 + $0x1b0] sm:$0xff] %v3813_v21  ;;  %v4702_v18 = vld [vmem:[%s6402_s1 + $0x16c] ss:$16 sps:$4 sm:$0xff]  }
 0x175   :  { %v1809_v23 = vpop.f32.mrf.mxu1  ;;  %v1521_v24 = vpop.f32.mrf.mxu0 }
 0x176   :  { %v3815_v30 = vadd.f32 %v5418_v47, %v1808_v22 }
 0x177   :  { %v1810_v27 = vpop.f32.mrf.mxu1  ;;  %v1523_v28 = vpop.f32.mrf.mxu0 }
 0x178   :  { %v1811_v31 = vadd.f32 %v1810_v27, %v1521_v24  ;;  %3943 = vst [vmem:[%s6404_s4 + $0x1c0] sm:$0xff] %v3815_v30  ;;  %v4697_v27 = vld [vmem:[%s6402_s1 + $0x160] ss:$16 sps:$4 sm:$0xff]   ;;  %v4705_v28 = vld [vmem:[%s6402_s1 + $0x184] ss:$16 sps:$4 sm:$0xff]  }
 0x179   :  { %v1812_v33 = vpop.f32.mrf.mxu1  ;;  %v1526_v34 = vpop.f32.mrf.mxu0  ;;  %2999 = vmatmul.mubr.bf16.gmra.mxu0 %v4673_v25 }
 0x17a   :  { %3006 = vmatprep.mubr.bf16.mxu0 %v4681_v26  ;;  %v3817_v38 = vadd.f32 %v5418_v47, %v1811_v31  ;;  %v4700_v31 = vld [vmem:[%s6402_s1 + $0x168] ss:$16 sps:$4 sm:$0xff]  }
 0x17b   :  { %v1815_v35 = vpop.f32.mrf.mxu1  ;;  %3288 = vmatmul.mubr.bf16.gmra.mxu1 %v4676_v29  ;;  %v1528_v36 = vpop.f32.mrf.mxu0 }
 0x17c   :  { %v1816_v39 = vadd.f32 %v1815_v35, %v1526_v34  ;;  %3295 = vmatprep.mubr.bf16.mxu1 %v4684_v32  ;;  %3945 = vst [vmem:[%s6404_s4 + $0x1d0] sm:$0xff] %v3817_v38  ;;  %v4708_v34 = vld [vmem:[%s6402_s1 + $0x18c] ss:$16 sps:$4 sm:$0xff]  }
 0x17d   :  { %v1817_v0 = vpop.f32.mrf.mxu1  ;;  %v1529_v40 = vpop.f32.mrf.mxu0 }
 0x17e   :  { %v3819_v46 = vadd.f32 %v5418_v47, %v1816_v39 }
 0x17f   :  { %v1818_v43 = vpop.f32.mrf.mxu1  ;;  %v1531_v44 = vpop.f32.mrf.mxu0 }
 0x180   :  { %v1819_v48 = vadd.f32 %v1818_v43, %v1529_v40  ;;  %3947 = vst [vmem:[%s6404_s4 + $0x1e0] sm:$0xff] %v3819_v46  ;;  %v4703_v43 = vld [vmem:[%s6402_s1 + $0x180] ss:$16 sps:$4 sm:$0xff]   ;;  %v4711_v44 = vld [vmem:[%s6402_s1 + $0x1a4] ss:$16 sps:$4 sm:$0xff]  }
 0x181   :  { %v1820_v50 = vpop.f32.mrf.mxu1  ;;  %v1534_v51 = vpop.f32.mrf.mxu0  ;;  %3007 = vmatmul.mubr.bf16.gmra.mxu0 %v4679_v41 }
 0x182   :  { %3014 = vmatprep.mubr.bf16.mxu0 %v4687_v42  ;;  %v3821_v54 = vadd.f32 %v5418_v47, %v1819_v48  ;;  %v4706_v48 = vld [vmem:[%s6402_s1 + $0x188] ss:$16 sps:$4 sm:$0xff]  }
 0x183   :  { %v1823_v52 = vpop.f32.mrf.mxu1  ;;  %3296 = vmatmul.mubr.bf16.gmra.mxu1 %v4682_v45  ;;  %v1536_v53 = vpop.f32.mrf.mxu0 }
 0x184   :  { %v1824_v55 = vadd.f32 %v1823_v52, %v1534_v51  ;;  %3303 = vmatprep.mubr.bf16.mxu1 %v4690_v49  ;;  %3949 = vst [vmem:[%s6404_s4 + $0x1f0] sm:$0xff] %v3821_v54  ;;  %v4714_v51 = vld [vmem:[%s6402_s1 + $0x1ac] ss:$16 sps:$4 sm:$0xff]  }
 0x185   :  { %v1825_v56 = vpop.f32.mrf.mxu1  ;;  %v1537_v57 = vpop.f32.mrf.mxu0 }
 0x186   :  { %v3823_v63 = vadd.f32 %v5418_v47, %v1824_v55 }
 0x187   :  { %v1826_v60 = vpop.f32.mrf.mxu1  ;;  %v1539_v61 = vpop.f32.mrf.mxu0 }
 0x188   :  { %v1827_v1 = vadd.f32 %v1826_v60, %v1537_v57  ;;  %3951 = vst [vmem:[%s6404_s4 + $0x200] sm:$0xff] %v3823_v63  ;;  %v4709_v60 = vld [vmem:[%s6402_s1 + $0x1a0] ss:$16 sps:$4 sm:$0xff]   ;;  %v4717_v61 = vld [vmem:[%s6402_s1 + $0x1c4] ss:$16 sps:$4 sm:$0xff]  }
 0x189   :  { %v1828_v3 = vpop.f32.mrf.mxu1  ;;  %v1542_v4 = vpop.f32.mrf.mxu0  ;;  %3015 = vmatmul.mubr.bf16.gmra.mxu0 %v4685_v58 }
 0x18a   :  { %3022 = vmatprep.mubr.bf16.mxu0 %v4693_v59  ;;  %v3825_v7 = vadd.f32 %v5418_v47, %v1827_v1  ;;  %v4712_v1 = vld [vmem:[%s6402_s1 + $0x1a8] ss:$16 sps:$4 sm:$0xff]  }
 0x18b   :  { %v1831_v5 = vpop.f32.mrf.mxu1  ;;  %3304 = vmatmul.mubr.bf16.gmra.mxu1 %v4688_v62  ;;  %v1544_v6 = vpop.f32.mrf.mxu0 }
 0x18c   :  { %v1832_v8 = vadd.f32 %v1831_v5, %v1542_v4  ;;  %3311 = vmatprep.mubr.bf16.mxu1 %v4696_v2  ;;  %3953 = vst [vmem:[%s6404_s4 + $0x210] sm:$0xff] %v3825_v7  ;;  %v4720_v4 = vld [vmem:[%s6402_s1 + $0x1cc] ss:$16 sps:$4 sm:$0xff]  }
 0x18d   :  { %v1833_v9 = vpop.f32.mrf.mxu1  ;;  %v1545_v10 = vpop.f32.mrf.mxu0 }
 0x18e   :  { %v3827_v16 = vadd.f32 %v5418_v47, %v1832_v8 }
 0x18f   :  { %v1834_v13 = vpop.f32.mrf.mxu1  ;;  %v1547_v14 = vpop.f32.mrf.mxu0 }
 0x190   :  { %v1835_v17 = vadd.f32 %v1834_v13, %v1545_v10  ;;  %3955 = vst [vmem:[%s6404_s4 + $0x220] sm:$0xff] %v3827_v16  ;;  %v4715_v13 = vld [vmem:[%s6402_s1 + $0x1c0] ss:$16 sps:$4 sm:$0xff]   ;;  %v4723_v14 = vld [vmem:[%s6402_s1 + $0x1e4] ss:$16 sps:$4 sm:$0xff]  }
 0x191   :  { %v1836_v19 = vpop.f32.mrf.mxu1  ;;  %v1550_v20 = vpop.f32.mrf.mxu0  ;;  %3023 = vmatmul.mubr.bf16.gmra.mxu0 %v4691_v11 }
 0x192   :  { %3030 = vmatprep.mubr.bf16.mxu0 %v4699_v12  ;;  %v3829_v23 = vadd.f32 %v5418_v47, %v1835_v17  ;;  %v4718_v17 = vld [vmem:[%s6402_s1 + $0x1c8] ss:$16 sps:$4 sm:$0xff]  }
 0x193   :  { %v1839_v21 = vpop.f32.mrf.mxu1  ;;  %3312 = vmatmul.mubr.bf16.gmra.mxu1 %v4694_v15  ;;  %v1552_v22 = vpop.f32.mrf.mxu0 }
 0x194   :  { %v1840_v24 = vadd.f32 %v1839_v21, %v1550_v20  ;;  %3319 = vmatprep.mubr.bf16.mxu1 %v4702_v18  ;;  %3957 = vst [vmem:[%s6404_s4 + $0x230] sm:$0xff] %v3829_v23  ;;  %v4726_v20 = vld [vmem:[%s6402_s1 + $0x1ec] ss:$16 sps:$4 sm:$0xff]  }
 0x195   :  { %v1841_v25 = vpop.f32.mrf.mxu1  ;;  %v1553_v26 = vpop.f32.mrf.mxu0 }
 0x196   :  { %v3831_v32 = vadd.f32 %v5418_v47, %v1840_v24 }
 0x197   :  { %v1842_v29 = vpop.f32.mrf.mxu1  ;;  %v1555_v30 = vpop.f32.mrf.mxu0 }
 0x198   :  { %v1843_v33 = vadd.f32 %v1842_v29, %v1553_v26  ;;  %3959 = vst [vmem:[%s6404_s4 + $0x240] sm:$0xff] %v3831_v32  ;;  %v4721_v29 = vld [vmem:[%s6402_s1 + $0x1e0] ss:$16 sps:$4 sm:$0xff]   ;;  %v4729_v30 = vld [vmem:[%s6402_s1 + $0x204] ss:$16 sps:$4 sm:$0xff]  }
 0x199   :  { %v1844_v35 = vpop.f32.mrf.mxu1  ;;  %v1558_v36 = vpop.f32.mrf.mxu0  ;;  %3031 = vmatmul.mubr.bf16.gmra.mxu0 %v4697_v27 }
 0x19a   :  { %3038 = vmatprep.mubr.bf16.mxu0 %v4705_v28  ;;  %v3833_v0 = vadd.f32 %v5418_v47, %v1843_v33  ;;  %v4724_v33 = vld [vmem:[%s6402_s1 + $0x1e8] ss:$16 sps:$4 sm:$0xff]  }
 0x19b   :  { %v1847_v38 = vpop.f32.mrf.mxu1  ;;  %3320 = vmatmul.mubr.bf16.gmra.mxu1 %v4700_v31  ;;  %v1560_v39 = vpop.f32.mrf.mxu0 }
 0x19c   :  { %v1848_v40 = vadd.f32 %v1847_v38, %v1558_v36  ;;  %3327 = vmatprep.mubr.bf16.mxu1 %v4708_v34  ;;  %3961 = vst [vmem:[%s6404_s4 + $0x250] sm:$0xff] %v3833_v0  ;;  %v4732_v36 = vld [vmem:[%s6402_s1 + $0x20c] ss:$16 sps:$4 sm:$0xff]  }
 0x19d   :  { %v1849_v41 = vpop.f32.mrf.mxu1  ;;  %v1561_v42 = vpop.f32.mrf.mxu0 }
 0x19e   :  { %v3835_v49 = vadd.f32 %v5418_v47, %v1848_v40 }
 0x19f   :  { %v1850_v45 = vpop.f32.mrf.mxu1  ;;  %v1563_v46 = vpop.f32.mrf.mxu0 }
 0x1a0   :  { %v1851_v50 = vadd.f32 %v1850_v45, %v1561_v42  ;;  %3963 = vst [vmem:[%s6404_s4 + $0x260] sm:$0xff] %v3835_v49  ;;  %v4727_v45 = vld [vmem:[%s6402_s1 + $0x200] ss:$16 sps:$4 sm:$0xff]   ;;  %v4735_v46 = vld [vmem:[%s6402_s1 + $0x224] ss:$16 sps:$4 sm:$0xff]  }
 0x1a1   :  { %v1852_v52 = vpop.f32.mrf.mxu1  ;;  %v1566_v53 = vpop.f32.mrf.mxu0  ;;  %3039 = vmatmul.mubr.bf16.gmra.mxu0 %v4703_v43 }
 0x1a2   :  { %3046 = vmatprep.mubr.bf16.mxu0 %v4711_v44  ;;  %v3837_v56 = vadd.f32 %v5418_v47, %v1851_v50  ;;  %v4730_v50 = vld [vmem:[%s6402_s1 + $0x208] ss:$16 sps:$4 sm:$0xff]  }
 0x1a3   :  { %v1855_v54 = vpop.f32.mrf.mxu1  ;;  %3328 = vmatmul.mubr.bf16.gmra.mxu1 %v4706_v48  ;;  %v1568_v55 = vpop.f32.mrf.mxu0 }
 0x1a4   :  { %v1856_v57 = vadd.f32 %v1855_v54, %v1566_v53  ;;  %3335 = vmatprep.mubr.bf16.mxu1 %v4714_v51  ;;  %3965 = vst [vmem:[%s6404_s4 + $0x270] sm:$0xff] %v3837_v56  ;;  %v4738_v53 = vld [vmem:[%s6402_s1 + $0x22c] ss:$16 sps:$4 sm:$0xff]  }
 0x1a5   :  { %v1857_v58 = vpop.f32.mrf.mxu1  ;;  %v1569_v59 = vpop.f32.mrf.mxu0 }
 0x1a6   :  { %v3839_v2 = vadd.f32 %v5418_v47, %v1856_v57 }
 0x1a7   :  { %v1858_v62 = vpop.f32.mrf.mxu1  ;;  %v1571_v63 = vpop.f32.mrf.mxu0 }
 0x1a8   :  { %v1859_v3 = vadd.f32 %v1858_v62, %v1569_v59  ;;  %3967 = vst [vmem:[%s6404_s4 + $0x280] sm:$0xff] %v3839_v2  ;;  %v4733_v62 = vld [vmem:[%s6402_s1 + $0x220] ss:$16 sps:$4 sm:$0xff]   ;;  %v4741_v63 = vld [vmem:[%s6402_s1 + $0x244] ss:$16 sps:$4 sm:$0xff]  }
 0x1a9   :  { %v1860_v5 = vpop.f32.mrf.mxu1  ;;  %v1574_v6 = vpop.f32.mrf.mxu0  ;;  %3047 = vmatmul.mubr.bf16.gmra.mxu0 %v4709_v60 }
 0x1aa   :  { %3054 = vmatprep.mubr.bf16.mxu0 %v4717_v61  ;;  %v3841_v9 = vadd.f32 %v5418_v47, %v1859_v3  ;;  %v4736_v3 = vld [vmem:[%s6402_s1 + $0x228] ss:$16 sps:$4 sm:$0xff]  }
 0x1ab   :  { %v1863_v7 = vpop.f32.mrf.mxu1  ;;  %3336 = vmatmul.mubr.bf16.gmra.mxu1 %v4712_v1  ;;  %v1576_v8 = vpop.f32.mrf.mxu0 }
 0x1ac   :  { %v1864_v10 = vadd.f32 %v1863_v7, %v1574_v6  ;;  %3343 = vmatprep.mubr.bf16.mxu1 %v4720_v4  ;;  %3969 = vst [vmem:[%s6404_s4 + $0x290] sm:$0xff] %v3841_v9  ;;  %v4744_v6 = vld [vmem:[%s6402_s1 + $0x24c] ss:$16 sps:$4 sm:$0xff]  }
 0x1ad   :  { %v1865_v11 = vpop.f32.mrf.mxu1  ;;  %v1577_v12 = vpop.f32.mrf.mxu0 }
 0x1ae   :  { %v3843_v18 = vadd.f32 %v5418_v47, %v1864_v10 }
 0x1af   :  { %v1866_v15 = vpop.f32.mrf.mxu1  ;;  %v1579_v16 = vpop.f32.mrf.mxu0 }
 0x1b0   :  { %v1867_v19 = vadd.f32 %v1866_v15, %v1577_v12  ;;  %3971 = vst [vmem:[%s6404_s4 + $0x2a0] sm:$0xff] %v3843_v18  ;;  %v4739_v15 = vld [vmem:[%s6402_s1 + $0x240] ss:$16 sps:$4 sm:$0xff]   ;;  %v4747_v16 = vld [vmem:[%s6402_s1 + $0x264] ss:$16 sps:$4 sm:$0xff]  }
 0x1b1   :  { %v1868_v21 = vpop.f32.mrf.mxu1  ;;  %v1582_v22 = vpop.f32.mrf.mxu0  ;;  %3055 = vmatmul.mubr.bf16.gmra.mxu0 %v4715_v13 }
 0x1b2   :  { %3062 = vmatprep.mubr.bf16.mxu0 %v4723_v14  ;;  %v3845_v25 = vadd.f32 %v5418_v47, %v1867_v19  ;;  %v4742_v19 = vld [vmem:[%s6402_s1 + $0x248] ss:$16 sps:$4 sm:$0xff]  }
 0x1b3   :  { %v1871_v23 = vpop.f32.mrf.mxu1  ;;  %3344 = vmatmul.mubr.bf16.gmra.mxu1 %v4718_v17  ;;  %v1584_v24 = vpop.f32.mrf.mxu0 }
 0x1b4   :  { %v1872_v26 = vadd.f32 %v1871_v23, %v1582_v22  ;;  %3351 = vmatprep.mubr.bf16.mxu1 %v4726_v20  ;;  %3973 = vst [vmem:[%s6404_s4 + $0x2b0] sm:$0xff] %v3845_v25  ;;  %v4750_v22 = vld [vmem:[%s6402_s1 + $0x26c] ss:$16 sps:$4 sm:$0xff]  }
 0x1b5   :  { %v1873_v27 = vpop.f32.mrf.mxu1  ;;  %v1585_v28 = vpop.f32.mrf.mxu0 }
 0x1b6   :  { %v3847_v34 = vadd.f32 %v5418_v47, %v1872_v26 }
 0x1b7   :  { %v1874_v31 = vpop.f32.mrf.mxu1  ;;  %v1587_v32 = vpop.f32.mrf.mxu0 }
 0x1b8   :  { %v1875_v35 = vadd.f32 %v1874_v31, %v1585_v28  ;;  %3975 = vst [vmem:[%s6404_s4 + $0x2c0] sm:$0xff] %v3847_v34  ;;  %v4745_v31 = vld [vmem:[%s6402_s1 + $0x260] ss:$16 sps:$4 sm:$0xff]   ;;  %v4753_v32 = vld [vmem:[%s6402_s1 + $0x284] ss:$16 sps:$4 sm:$0xff]  }
 0x1b9   :  { %v1876_v38 = vpop.f32.mrf.mxu1  ;;  %v1590_v39 = vpop.f32.mrf.mxu0  ;;  %3063 = vmatmul.mubr.bf16.gmra.mxu0 %v4721_v29 }
 0x1ba   :  { %3070 = vmatprep.mubr.bf16.mxu0 %v4729_v30  ;;  %v3849_v41 = vadd.f32 %v5418_v47, %v1875_v35  ;;  %v4748_v35 = vld [vmem:[%s6402_s1 + $0x268] ss:$16 sps:$4 sm:$0xff]  }
 0x1bb   :  { %v1879_v0 = vpop.f32.mrf.mxu1  ;;  %3352 = vmatmul.mubr.bf16.gmra.mxu1 %v4724_v33  ;;  %v1592_v40 = vpop.f32.mrf.mxu0 }
 0x1bc   :  { %v1880_v42 = vadd.f32 %v1879_v0, %v1590_v39  ;;  %3359 = vmatprep.mubr.bf16.mxu1 %v4732_v36  ;;  %3977 = vst [vmem:[%s6404_s4 + $0x2d0] sm:$0xff] %v3849_v41  ;;  %v4756_v39 = vld [vmem:[%s6402_s1 + $0x28c] ss:$16 sps:$4 sm:$0xff]  }
 0x1bd   :  { %v1881_v43 = vpop.f32.mrf.mxu1  ;;  %v1593_v44 = vpop.f32.mrf.mxu0 }
 0x1be   :  { %v3851_v51 = vadd.f32 %v5418_v47, %v1880_v42 }
 0x1bf   :  { %v1882_v48 = vpop.f32.mrf.mxu1  ;;  %v1595_v49 = vpop.f32.mrf.mxu0 }
 0x1c0   :  { %v1883_v52 = vadd.f32 %v1882_v48, %v1593_v44  ;;  %3979 = vst [vmem:[%s6404_s4 + $0x2e0] sm:$0xff] %v3851_v51  ;;  %v4751_v48 = vld [vmem:[%s6402_s1 + $0x280] ss:$16 sps:$4 sm:$0xff]   ;;  %v4759_v49 = vld [vmem:[%s6402_s1 + $0x2a4] ss:$16 sps:$4 sm:$0xff]  }
 0x1c1   :  { %v1884_v54 = vpop.f32.mrf.mxu1  ;;  %v1598_v55 = vpop.f32.mrf.mxu0  ;;  %3071 = vmatmul.mubr.bf16.gmra.mxu0 %v4727_v45 }
 0x1c2   :  { %3078 = vmatprep.mubr.bf16.mxu0 %v4735_v46  ;;  %v3853_v58 = vadd.f32 %v5418_v47, %v1883_v52  ;;  %v4754_v52 = vld [vmem:[%s6402_s1 + $0x288] ss:$16 sps:$4 sm:$0xff]  }
 0x1c3   :  { %v1887_v56 = vpop.f32.mrf.mxu1  ;;  %3360 = vmatmul.mubr.bf16.gmra.mxu1 %v4730_v50  ;;  %v1600_v57 = vpop.f32.mrf.mxu0 }
 0x1c4   :  { %v1888_v59 = vadd.f32 %v1887_v56, %v1598_v55  ;;  %3367 = vmatprep.mubr.bf16.mxu1 %v4738_v53  ;;  %3981 = vst [vmem:[%s6404_s4 + $0x2f0] sm:$0xff] %v3853_v58  ;;  %v4762_v55 = vld [vmem:[%s6402_s1 + $0x2ac] ss:$16 sps:$4 sm:$0xff]  }
 0x1c5   :  { %v1889_v60 = vpop.f32.mrf.mxu1  ;;  %v1601_v61 = vpop.f32.mrf.mxu0 }
 0x1c6   :  { %v3855_v4 = vadd.f32 %v5418_v47, %v1888_v59 }
 0x1c7   :  { %v1890_v1 = vpop.f32.mrf.mxu1  ;;  %v1603_v2 = vpop.f32.mrf.mxu0 }
 0x1c8   :  { %v1891_v5 = vadd.f32 %v1890_v1, %v1601_v61  ;;  %3983 = vst [vmem:[%s6404_s4 + $0x300] sm:$0xff] %v3855_v4  ;;  %v4757_v1 = vld [vmem:[%s6402_s1 + $0x2a0] ss:$16 sps:$4 sm:$0xff]   ;;  %v4765_v2 = vld [vmem:[%s6402_s1 + $0x2c4] ss:$16 sps:$4 sm:$0xff]  }
 0x1c9   :  { %v1892_v7 = vpop.f32.mrf.mxu1  ;;  %v1606_v8 = vpop.f32.mrf.mxu0  ;;  %3079 = vmatmul.mubr.bf16.gmra.mxu0 %v4733_v62 }
 0x1ca   :  { %3086 = vmatprep.mubr.bf16.mxu0 %v4741_v63  ;;  %v3857_v11 = vadd.f32 %v5418_v47, %v1891_v5  ;;  %v4760_v5 = vld [vmem:[%s6402_s1 + $0x2a8] ss:$16 sps:$4 sm:$0xff]  }
 0x1cb   :  { %v1895_v9 = vpop.f32.mrf.mxu1  ;;  %3368 = vmatmul.mubr.bf16.gmra.mxu1 %v4736_v3  ;;  %v1608_v10 = vpop.f32.mrf.mxu0 }
 0x1cc   :  { %v1896_v12 = vadd.f32 %v1895_v9, %v1606_v8  ;;  %3375 = vmatprep.mubr.bf16.mxu1 %v4744_v6  ;;  %3985 = vst [vmem:[%s6404_s4 + $0x310] sm:$0xff] %v3857_v11  ;;  %v4768_v8 = vld [vmem:[%s6402_s1 + $0x2cc] ss:$16 sps:$4 sm:$0xff]  }
 0x1cd   :  { %v1897_v13 = vpop.f32.mrf.mxu1  ;;  %v1609_v14 = vpop.f32.mrf.mxu0 }
 0x1ce   :  { %v3859_v20 = vadd.f32 %v5418_v47, %v1896_v12 }
 0x1cf   :  { %v1898_v17 = vpop.f32.mrf.mxu1  ;;  %v1611_v18 = vpop.f32.mrf.mxu0 }
 0x1d0   :  { %v1899_v21 = vadd.f32 %v1898_v17, %v1609_v14  ;;  %3987 = vst [vmem:[%s6404_s4 + $0x320] sm:$0xff] %v3859_v20  ;;  %v4763_v17 = vld [vmem:[%s6402_s1 + $0x2c0] ss:$16 sps:$4 sm:$0xff]   ;;  %v4771_v18 = vld [vmem:[%s6402_s1 + $0x2e4] ss:$16 sps:$4 sm:$0xff]  }
 0x1d1   :  { %v1900_v23 = vpop.f32.mrf.mxu1  ;;  %v1614_v24 = vpop.f32.mrf.mxu0  ;;  %3087 = vmatmul.mubr.bf16.gmra.mxu0 %v4739_v15 }
 0x1d2   :  { %3094 = vmatprep.mubr.bf16.mxu0 %v4747_v16  ;;  %v3861_v27 = vadd.f32 %v5418_v47, %v1899_v21  ;;  %v4766_v21 = vld [vmem:[%s6402_s1 + $0x2c8] ss:$16 sps:$4 sm:$0xff]  }
 0x1d3   :  { %v1903_v25 = vpop.f32.mrf.mxu1  ;;  %3376 = vmatmul.mubr.bf16.gmra.mxu1 %v4742_v19  ;;  %v1616_v26 = vpop.f32.mrf.mxu0 }
 0x1d4   :  { %v1904_v28 = vadd.f32 %v1903_v25, %v1614_v24  ;;  %3383 = vmatprep.mubr.bf16.mxu1 %v4750_v22  ;;  %3989 = vst [vmem:[%s6404_s4 + $0x330] sm:$0xff] %v3861_v27  ;;  %v4774_v24 = vld [vmem:[%s6402_s1 + $0x2ec] ss:$16 sps:$4 sm:$0xff]  }
 0x1d5   :  { %v1905_v29 = vpop.f32.mrf.mxu1  ;;  %v1617_v30 = vpop.f32.mrf.mxu0 }
 0x1d6   :  { %v3863_v36 = vadd.f32 %v5418_v47, %v1904_v28 }
 0x1d7   :  { %v1906_v33 = vpop.f32.mrf.mxu1  ;;  %v1619_v34 = vpop.f32.mrf.mxu0 }
 0x1d8   :  { %v1907_v38 = vadd.f32 %v1906_v33, %v1617_v30  ;;  %3991 = vst [vmem:[%s6404_s4 + $0x340] sm:$0xff] %v3863_v36  ;;  %v4769_v33 = vld [vmem:[%s6402_s1 + $0x2e0] ss:$16 sps:$4 sm:$0xff]   ;;  %v4777_v34 = vld [vmem:[%s6402_s1 + $0x304] ss:$16 sps:$4 sm:$0xff]  }
 0x1d9   :  { %v1908_v0 = vpop.f32.mrf.mxu1  ;;  %v1622_v40 = vpop.f32.mrf.mxu0  ;;  %3095 = vmatmul.mubr.bf16.gmra.mxu0 %v4745_v31 }
 0x1da   :  { %3102 = vmatprep.mubr.bf16.mxu0 %v4753_v32  ;;  %v3865_v43 = vadd.f32 %v5418_v47, %v1907_v38  ;;  %v4772_v38 = vld [vmem:[%s6402_s1 + $0x2e8] ss:$16 sps:$4 sm:$0xff]  }
 0x1db   :  { %v1911_v41 = vpop.f32.mrf.mxu1  ;;  %3384 = vmatmul.mubr.bf16.gmra.mxu1 %v4748_v35  ;;  %v1624_v42 = vpop.f32.mrf.mxu0 }
 0x1dc   :  { %v1912_v44 = vadd.f32 %v1911_v41, %v1622_v40  ;;  %3391 = vmatprep.mubr.bf16.mxu1 %v4756_v39  ;;  %3993 = vst [vmem:[%s6404_s4 + $0x350] sm:$0xff] %v3865_v43  ;;  %v4780_v40 = vld [vmem:[%s6402_s1 + $0x30c] ss:$16 sps:$4 sm:$0xff]  }
 0x1dd   :  { %v1913_v45 = vpop.f32.mrf.mxu1  ;;  %v1625_v46 = vpop.f32.mrf.mxu0 }
 0x1de   :  { %v3867_v53 = vadd.f32 %v5418_v47, %v1912_v44 }
 0x1df   :  { %v1914_v50 = vpop.f32.mrf.mxu1  ;;  %v1627_v51 = vpop.f32.mrf.mxu0 }
 0x1e0   :  { %v1915_v54 = vadd.f32 %v1914_v50, %v1625_v46  ;;  %3995 = vst [vmem:[%s6404_s4 + $0x360] sm:$0xff] %v3867_v53  ;;  %v4775_v50 = vld [vmem:[%s6402_s1 + $0x300] ss:$16 sps:$4 sm:$0xff]   ;;  %v4783_v51 = vld [vmem:[%s6402_s1 + $0x324] ss:$16 sps:$4 sm:$0xff]  }
 0x1e1   :  { %v1916_v56 = vpop.f32.mrf.mxu1  ;;  %v1630_v57 = vpop.f32.mrf.mxu0  ;;  %3103 = vmatmul.mubr.bf16.gmra.mxu0 %v4751_v48 }
 0x1e2   :  { %3110 = vmatprep.mubr.bf16.mxu0 %v4759_v49  ;;  %v3869_v60 = vadd.f32 %v5418_v47, %v1915_v54  ;;  %v4778_v54 = vld [vmem:[%s6402_s1 + $0x308] ss:$16 sps:$4 sm:$0xff]  }
 0x1e3   :  { %v1919_v58 = vpop.f32.mrf.mxu1  ;;  %3392 = vmatmul.mubr.bf16.gmra.mxu1 %v4754_v52  ;;  %v1632_v59 = vpop.f32.mrf.mxu0 }
 0x1e4   :  { %v1920_v61 = vadd.f32 %v1919_v58, %v1630_v57  ;;  %3399 = vmatprep.mubr.bf16.mxu1 %v4762_v55  ;;  %3997 = vst [vmem:[%s6404_s4 + $0x370] sm:$0xff] %v3869_v60  ;;  %v3755_v57 = vsub.s32 1, %v5400_v37  ;;  %v4786_v58 = vld [vmem:[%s6402_s1 + $0x32c] ss:$16 sps:$4 sm:$0xff]   ;;  %v4823_v37 = vld [vmem:[%s6403_s3] sm:$0x3] }
 0x1e5   :  { %v1921_v62 = vpop.f32.mrf.mxu1  ;;  %v1633_v63 = vpop.f32.mrf.mxu0 }
 0x1e6   :  { %v3871_v6 = vadd.f32 %v5418_v47, %v1920_v61 }
 0x1e7   :  { %v1922_v3 = vpop.f32.mrf.mxu1  ;;  %v1635_v4 = vpop.f32.mrf.mxu0 }
 0x1e8   :  { %v1923_v7 = vadd.f32 %v1922_v3, %v1633_v63  ;;  %3999 = vst [vmem:[%s6404_s4 + $0x380] sm:$0xff] %v3871_v6 }
 0x1e9   :  { %v1924_v9 = vpop.f32.mrf.mxu1  ;;  %v1638_v10 = vpop.f32.mrf.mxu0  ;;  %3111 = vmatmul.mubr.bf16.gmra.mxu0 %v4757_v1 }
 0x1ea   :  { %3118 = vmatprep.mubr.bf16.mxu0 %v4765_v2  ;;  %v3873_v13 = vadd.f32 %v5418_v47, %v1923_v7  ;;  %v6061_v2 = vrot.slane %v4823_v37, %v3755_v57  ;;  %v4802_v57 = vld [vmem:[%s6402_s1 + $0x388] ss:$16 sps:$4 sm:$0xff]  }
 0x1eb   :  { %v1927_v11 = vpop.f32.mrf.mxu1  ;;  %3400 = vmatmul.mubr.bf16.gmra.mxu1 %v4760_v5  ;;  %v1640_v12 = vpop.f32.mrf.mxu0  ;;  %v4781_v5 = vld [vmem:[%s6402_s1 + $0x320] ss:$16 sps:$4 sm:$0xff]  }
 0x1ec   :  { %v1928_v14 = vadd.f32 %v1927_v11, %v1638_v10  ;;  %3407 = vmatprep.mubr.bf16.mxu1 %v4768_v8  ;;  %4001 = vst [vmem:[%s6404_s4 + $0x390] sm:$0xff] %v3873_v13  ;;  %v4784_v8 = vld [vmem:[%s6402_s1 + $0x328] ss:$16 sps:$4 sm:$0xff]   ;;  %v4792_v11 = vld [vmem:[%s6402_s1 + $0x34c] ss:$16 sps:$4 sm:$0xff]  }
 0x1ed   :  { %v1929_v15 = vpop.f32.mrf.mxu1  ;;  %v1641_v16 = vpop.f32.mrf.mxu0 }
 0x1ee   :  { %v3875_v22 = vadd.f32 %v5418_v47, %v1928_v14 }
 0x1ef   :  { %v1930_v19 = vpop.f32.mrf.mxu1  ;;  %v1643_v20 = vpop.f32.mrf.mxu0 }
 0x1f0   :  { %v1931_v23 = vadd.f32 %v1930_v19, %v1641_v16  ;;  %4003 = vst [vmem:[%s6404_s4 + $0x3a0] sm:$0xff] %v3875_v22  ;;  %v4787_v20 = vld [vmem:[%s6402_s1 + $0x340] ss:$16 sps:$4 sm:$0xff]  }
 0x1f1   :  { %v1932_v25 = vpop.f32.mrf.mxu1  ;;  %v1646_v26 = vpop.f32.mrf.mxu0  ;;  %3119 = vmatmul.mubr.bf16.gmra.mxu0 %v4763_v17 }
 0x1f2   :  { %3126 = vmatprep.mubr.bf16.mxu0 %v4771_v18  ;;  %v3877_v29 = vadd.f32 %v5418_v47, %v1931_v23 }
 0x1f3   :  { %v1935_v27 = vpop.f32.mrf.mxu1  ;;  %3408 = vmatmul.mubr.bf16.gmra.mxu1 %v4766_v21  ;;  %v1648_v28 = vpop.f32.mrf.mxu0  ;;  %v4795_v21 = vld [vmem:[%s6402_s1 + $0x364] ss:$16 sps:$4 sm:$0xff]  }
 0x1f4   :  { %v1936_v30 = vadd.f32 %v1935_v27, %v1646_v26  ;;  %3415 = vmatprep.mubr.bf16.mxu1 %v4774_v24  ;;  %4005 = vst [vmem:[%s6404_s4 + $0x3b0] sm:$0xff] %v3877_v29  ;;  %v4790_v24 = vld [vmem:[%s6402_s1 + $0x348] ss:$16 sps:$4 sm:$0xff]   ;;  %v4798_v27 = vld [vmem:[%s6402_s1 + $0x36c] ss:$16 sps:$4 sm:$0xff]  }
 0x1f5   :  { %v1937_v31 = vpop.f32.mrf.mxu1  ;;  %v1649_v32 = vpop.f32.mrf.mxu0 }
 0x1f6   :  { %v3879_v39 = vadd.f32 %v5418_v47, %v1936_v30 }
 0x1f7   :  { %v1938_v35 = vpop.f32.mrf.mxu1  ;;  %v1651_v36 = vpop.f32.mrf.mxu0 }
 0x1f8   :  { %v1939_v0 = vadd.f32 %v1938_v35, %v1649_v32  ;;  %4007 = vst [vmem:[%s6404_s4 + $0x3c0] sm:$0xff] %v3879_v39  ;;  %v4793_v36 = vld [vmem:[%s6402_s1 + $0x360] ss:$16 sps:$4 sm:$0xff]  }
 0x1f9   :  { %v1940_v41 = vpop.f32.mrf.mxu1  ;;  %v1654_v42 = vpop.f32.mrf.mxu0  ;;  %3127 = vmatmul.mubr.bf16.gmra.mxu0 %v4769_v33 }
 0x1fa   :  { %3134 = vmatprep.mubr.bf16.mxu0 %v4777_v34  ;;  %v3881_v45 = vadd.f32 %v5418_v47, %v1939_v0 }
 0x1fb   :  { %v1943_v43 = vpop.f32.mrf.mxu1  ;;  %3416 = vmatmul.mubr.bf16.gmra.mxu1 %v4772_v38  ;;  %v1656_v44 = vpop.f32.mrf.mxu0  ;;  %v4801_v38 = vld [vmem:[%s6402_s1 + $0x384] ss:$16 sps:$4 sm:$0xff]  }
 0x1fc   :  { %v1944_v46 = vadd.f32 %v1943_v43, %v1654_v42  ;;  %3423 = vmatprep.mubr.bf16.mxu1 %v4780_v40  ;;  %4009 = vst [vmem:[%s6404_s4 + $0x3d0] sm:$0xff] %v3881_v45  ;;  %v4796_v40 = vld [vmem:[%s6402_s1 + $0x368] ss:$16 sps:$4 sm:$0xff]   ;;  %v4804_v43 = vld [vmem:[%s6402_s1 + $0x38c] ss:$16 sps:$4 sm:$0xff]  }
 0x1fd   :  { %v1945_v48 = vpop.f32.mrf.mxu1  ;;  %v1657_v49 = vpop.f32.mrf.mxu0 }
 0x1fe   :  { %v3883_v55 = vadd.f32 %v5418_v47, %v1944_v46 }
 0x1ff   :  { %v1946_v52 = vpop.f32.mrf.mxu1  ;;  %v1659_v53 = vpop.f32.mrf.mxu0 }
 0x200   :  { %v1947_v56 = vadd.f32 %v1946_v52, %v1657_v49  ;;  %4011 = vst [vmem:[%s6404_s4 + $0x3e0] sm:$0xff] %v3883_v55  ;;  %v4799_v53 = vld [vmem:[%s6402_s1 + $0x380] ss:$16 sps:$4 sm:$0xff]  }
 0x201   :  { %v1948_v59 = vpop.f32.mrf.mxu1  ;;  %v2944_v60 = vpop.f32.mrf.mxu0  ;;  %3135 = vmatmul.mubr.bf16.gmra.mxu0 %v4775_v50 }
 0x202   :  { %3142 = vmatprep.mubr.bf16.mxu0 %v4783_v51  ;;  %v3885_v63 = vadd.f32 %v5418_v47, %v1947_v56  ;;  %v4789_v47 = vld [vmem:[%s6402_s1 + $0x344] ss:$16 sps:$4 sm:$0xff]  }
 0x203   :  { %v3233_v61 = vpop.f32.mrf.mxu1  ;;  %3424 = vmatmul.mubr.bf16.gmra.mxu1 %v4778_v54  ;;  %v2946_v62 = vpop.f32.mrf.mxu0  ;;  %v4807_v54 = vld [vmem:[%s6402_s1 + $0x3a4] ss:$16 sps:$4 sm:$0xff]  }
 0x204   :  { %v3234_v1 = vadd.f32 %v3233_v61, %v2944_v60  ;;  %3431 = vmatprep.mubr.bf16.mxu1 %v4786_v58  ;;  %4013 = vst [vmem:[%s6404_s4 + $0x3f0] sm:$0xff] %v3885_v63  ;;  %v4810_v60 = vld [vmem:[%s6402_s1 + $0x3ac] ss:$16 sps:$4 sm:$0xff]  }
 0x205   :  { %v3235_v3 = vpop.f32.mrf.mxu1  ;;  %v2947_v4 = vpop.f32.mrf.mxu0 }
 0x206   :  { %v3760_v9 = vadd.f32 %v6061_v2, %v3234_v1 }
 0x207   :  { %v3236_v6 = vpop.f32.mrf.mxu1  ;;  %v2949_v7 = vpop.f32.mrf.mxu0 }
 0x208   :  { %v3237_v10 = vadd.f32 %v3236_v6, %v2947_v4  ;;  %3888 = vst [vmem:[%s6404_s4 + $0x8] sm:$0xff] %v3760_v9  ;;  %v4813_v6 = vld [vmem:[%s6402_s1 + $0x3c4] ss:$16 sps:$4 sm:$0xff]   ;;  %v4808_v9 = vld [vmem:[%s6402_s1 + $0x3a8] ss:$16 sps:$4 sm:$0xff]  }
 0x209   :  { %v3238_v12 = vpop.f32.mrf.mxu1  ;;  %v2952_v13 = vpop.f32.mrf.mxu0  ;;  %3143 = vmatmul.mubr.bf16.gmra.mxu0 %v4781_v5 }
 0x20a   :  { %3150 = vmatprep.mubr.bf16.mxu0 %v4789_v47  ;;  %v3762_v16 = vadd.f32 %v6061_v2, %v3237_v10  ;;  %v4805_v47 = vld [vmem:[%s6402_s1 + $0x3a0] ss:$16 sps:$4 sm:$0xff]   ;;  %v4816_v12 = vld [vmem:[%s6402_s1 + $0x3cc] ss:$16 sps:$4 sm:$0xff]  }
 0x20b   :  { %v3241_v14 = vpop.f32.mrf.mxu1  ;;  %3432 = vmatmul.mubr.bf16.gmra.mxu1 %v4784_v8  ;;  %v2954_v15 = vpop.f32.mrf.mxu0 }
 0x20c   :  { %v3242_v17 = vadd.f32 %v3241_v14, %v2952_v13  ;;  %3439 = vmatprep.mubr.bf16.mxu1 %v4792_v11  ;;  %3890 = vst [vmem:[%s6404_s4 + $0x18] sm:$0xff] %v3762_v16 }
 0x20d   :  { %v3243_v18 = vpop.f32.mrf.mxu1  ;;  %v2955_v19 = vpop.f32.mrf.mxu0 }
 0x20e   :  { %v3764_v25 = vadd.f32 %v6061_v2, %v3242_v17 }
 0x20f   :  { %v3244_v22 = vpop.f32.mrf.mxu1  ;;  %v2957_v23 = vpop.f32.mrf.mxu0 }
 0x210   :  { %v3245_v26 = vadd.f32 %v3244_v22, %v2955_v19  ;;  %3892 = vst [vmem:[%s6404_s4 + $0x28] sm:$0xff] %v3764_v25  ;;  %v4819_v22 = vld [vmem:[%s6402_s1 + $0x3e4] ss:$16 sps:$4 sm:$0xff]   ;;  %v4814_v25 = vld [vmem:[%s6402_s1 + $0x3c8] ss:$16 sps:$4 sm:$0xff]  }
 0x211   :  { %v3246_v28 = vpop.f32.mrf.mxu1  ;;  %v2960_v29 = vpop.f32.mrf.mxu0  ;;  %3151 = vmatmul.mubr.bf16.gmra.mxu0 %v4787_v20 }
 0x212   :  { %3158 = vmatprep.mubr.bf16.mxu0 %v4795_v21  ;;  %v3766_v32 = vadd.f32 %v6061_v2, %v3245_v26  ;;  %v4811_v21 = vld [vmem:[%s6402_s1 + $0x3c0] ss:$16 sps:$4 sm:$0xff]   ;;  %v4822_v28 = vld [vmem:[%s6402_s1 + $0x3ec] ss:$16 sps:$4 sm:$0xff]  }
 0x213   :  { %v3249_v30 = vpop.f32.mrf.mxu1  ;;  %3440 = vmatmul.mubr.bf16.gmra.mxu1 %v4790_v24  ;;  %v2962_v31 = vpop.f32.mrf.mxu0 }
 0x214   :  { %v3250_v33 = vadd.f32 %v3249_v30, %v2960_v29  ;;  %3447 = vmatprep.mubr.bf16.mxu1 %v4798_v27  ;;  %3894 = vst [vmem:[%s6404_s4 + $0x38] sm:$0xff] %v3766_v32 }
 0x215   :  { %v3251_v34 = vpop.f32.mrf.mxu1  ;;  %v2963_v35 = vpop.f32.mrf.mxu0 }
 0x216   :  { %v3768_v41 = vadd.f32 %v6061_v2, %v3250_v33 }
 0x217   :  { %v3252_v39 = vpop.f32.mrf.mxu1  ;;  %v2965_v0 = vpop.f32.mrf.mxu0 }
 0x218   :  { %v3253_v42 = vadd.f32 %v3252_v39, %v2963_v35  ;;  %3896 = vst [vmem:[%s6404_s4 + $0x48] sm:$0xff] %v3768_v41 }
 0x219   :  { %v3254_v44 = vpop.f32.mrf.mxu1  ;;  %v2968_v45 = vpop.f32.mrf.mxu0  ;;  %3159 = vmatmul.mubr.bf16.gmra.mxu0 %v4793_v36 }
 0x21a   :  { %3166 = vmatprep.mubr.bf16.mxu0 %v4801_v38  ;;  %v3770_v49 = vadd.f32 %v6061_v2, %v3253_v42  ;;  %v4817_v38 = vld [vmem:[%s6402_s1 + $0x3e0] ss:$16 sps:$4 sm:$0xff]  }
 0x21b   :  { %v3257_v46 = vpop.f32.mrf.mxu1  ;;  %3448 = vmatmul.mubr.bf16.gmra.mxu1 %v4796_v40  ;;  %v2970_v48 = vpop.f32.mrf.mxu0  ;;  %v4820_v40 = vld [vmem:[%s6402_s1 + $0x3e8] ss:$16 sps:$4 sm:$0xff]  }
 0x21c   :  { %v3258_v50 = vadd.f32 %v3257_v46, %v2968_v45  ;;  %3455 = vmatprep.mubr.bf16.mxu1 %v4804_v43  ;;  %3898 = vst [vmem:[%s6404_s4 + $0x58] sm:$0xff] %v3770_v49 }
 0x21d   :  { %v3259_v51 = vpop.f32.mrf.mxu1  ;;  %v2971_v52 = vpop.f32.mrf.mxu0 }
 0x21e   :  { %v3772_v58 = vadd.f32 %v6061_v2, %v3258_v50 }
 0x21f   :  { %v3260_v55 = vpop.f32.mrf.mxu1  ;;  %v2973_v56 = vpop.f32.mrf.mxu0 }
 0x220   :  { %v3261_v59 = vadd.f32 %v3260_v55, %v2971_v52  ;;  %3900 = vst [vmem:[%s6404_s4 + $0x68] sm:$0xff] %v3772_v58 }
 0x221   :  { %v3262_v61 = vpop.f32.mrf.mxu1  ;;  %v2976_v62 = vpop.f32.mrf.mxu0  ;;  %3167 = vmatmul.mubr.bf16.gmra.mxu0 %v4799_v53 }
 0x222   :  { %3174 = vmatprep.mubr.bf16.mxu0 %v4807_v54  ;;  %v3774_v37 = vadd.f32 %v6061_v2, %v3261_v59 }
 0x223   :  { %v3265_v63 = vpop.f32.mrf.mxu1  ;;  %3456 = vmatmul.mubr.bf16.gmra.mxu1 %v4802_v57  ;;  %v2978_v1 = vpop.f32.mrf.mxu0 }
 0x224   :  { %v3266_v3 = vadd.f32 %v3265_v63, %v2976_v62  ;;  %3463 = vmatprep.mubr.bf16.mxu1 %v4810_v60  ;;  %3902 = vst [vmem:[%s6404_s4 + $0x78] sm:$0xff] %v3774_v37 }
 0x225   :  { %v3267_v4 = vpop.f32.mrf.mxu1  ;;  %v2979_v5 = vpop.f32.mrf.mxu0 }
 0x226   :  { %v3776_v10 = vadd.f32 %v6061_v2, %v3266_v3 }
 0x227   :  { %v3268_v7 = vpop.f32.mrf.mxu1  ;;  %v2981_v8 = vpop.f32.mrf.mxu0 }
 0x228   :  { %v3269_v11 = vadd.f32 %v3268_v7, %v2979_v5  ;;  %3904 = vst [vmem:[%s6404_s4 + $0x88] sm:$0xff] %v3776_v10 }
 0x229   :  { %v3270_v13 = vpop.f32.mrf.mxu1  ;;  %v2984_v14 = vpop.f32.mrf.mxu0  ;;  %3175 = vmatmul.mubr.bf16.gmra.mxu0 %v4805_v47 }
 0x22a   :  { %3182 = vmatprep.mubr.bf16.mxu0 %v4813_v6  ;;  %v3778_v17 = vadd.f32 %v6061_v2, %v3269_v11 }
 0x22b   :  { %v3273_v15 = vpop.f32.mrf.mxu1  ;;  %3464 = vmatmul.mubr.bf16.gmra.mxu1 %v4808_v9  ;;  %v2986_v16 = vpop.f32.mrf.mxu0 }
 0x22c   :  { %v3274_v18 = vadd.f32 %v3273_v15, %v2984_v14  ;;  %3471 = vmatprep.mubr.bf16.mxu1 %v4816_v12  ;;  %3906 = vst [vmem:[%s6404_s4 + $0x98] sm:$0xff] %v3778_v17 }
 0x22d   :  { %v3275_v19 = vpop.f32.mrf.mxu1  ;;  %v2987_v20 = vpop.f32.mrf.mxu0 }
 0x22e   :  { %v3780_v26 = vadd.f32 %v6061_v2, %v3274_v18 }
 0x22f   :  { %v3276_v23 = vpop.f32.mrf.mxu1  ;;  %v2989_v24 = vpop.f32.mrf.mxu0 }
 0x230   :  { %v3277_v27 = vadd.f32 %v3276_v23, %v2987_v20  ;;  %3908 = vst [vmem:[%s6404_s4 + $0xa8] sm:$0xff] %v3780_v26 }
 0x231   :  { %v3278_v29 = vpop.f32.mrf.mxu1  ;;  %v2992_v30 = vpop.f32.mrf.mxu0  ;;  %3183 = vmatmul.mubr.bf16.gmra.mxu0 %v4811_v21 }
 0x232   :  { %3190 = vmatprep.mubr.bf16.mxu0 %v4819_v22  ;;  %v3782_v33 = vadd.f32 %v6061_v2, %v3277_v27 }
 0x233   :  { %v3281_v31 = vpop.f32.mrf.mxu1  ;;  %3472 = vmatmul.mubr.bf16.gmra.mxu1 %v4814_v25  ;;  %v2994_v32 = vpop.f32.mrf.mxu0 }
 0x234   :  { %v3282_v34 = vadd.f32 %v3281_v31, %v2992_v30  ;;  %3479 = vmatprep.mubr.bf16.mxu1 %v4822_v28  ;;  %3910 = vst [vmem:[%s6404_s4 + $0xb8] sm:$0xff] %v3782_v33 }
 0x235   :  { %v3283_v35 = vpop.f32.mrf.mxu1  ;;  %v2995_v36 = vpop.f32.mrf.mxu0 }
 0x236   :  { %v3784_v41 = vadd.f32 %v6061_v2, %v3282_v34 }
 0x237   :  { %v3284_v39 = vpop.f32.mrf.mxu1  ;;  %v2997_v0 = vpop.f32.mrf.mxu0 }
 0x238   :  { %v3285_v42 = vadd.f32 %v3284_v39, %v2995_v36  ;;  %3912 = vst [vmem:[%s6404_s4 + $0xc8] sm:$0xff] %v3784_v41 }
 0x239   :  { %v3286_v43 = vpop.f32.mrf.mxu1  ;;  %v3000_v44 = vpop.f32.mrf.mxu0  ;;  %3191 = vmatmul.mubr.bf16.gmra.mxu0 %v4817_v38 }
 0x23a   :  { %v3786_v48 = vadd.f32 %v6061_v2, %v3285_v42 }
 0x23b   :  { %v3289_v45 = vpop.f32.mrf.mxu1  ;;  %3480 = vmatmul.mubr.bf16.gmra.mxu1 %v4820_v40  ;;  %v3002_v46 = vpop.f32.mrf.mxu0 }
 0x23c   :  { %v3290_v49 = vadd.f32 %v3289_v45, %v3000_v44  ;;  %3914 = vst [vmem:[%s6404_s4 + $0xd8] sm:$0xff] %v3786_v48 }
 0x23d   :  { %v3291_v50 = vpop.f32.mrf.mxu1  ;;  %v3003_v51 = vpop.f32.mrf.mxu0 }
 0x23e   :  { %v3788_v54 = vadd.f32 %v6061_v2, %v3290_v49 }
 0x23f   :  { %v3292_v52 = vpop.f32.mrf.mxu1  ;;  %v3005_v53 = vpop.f32.mrf.mxu0 }
 0x240   :  { %v3293_v55 = vadd.f32 %v3292_v52, %v3003_v51  ;;  %3916 = vst [vmem:[%s6404_s4 + $0xe8] sm:$0xff] %v3788_v54 }
 0x241   :  { %v3294_v56 = vpop.f32.mrf.mxu1  ;;  %v3008_v57 = vpop.f32.mrf.mxu0 }
 0x242   :  { %v3790_v60 = vadd.f32 %v6061_v2, %v3293_v55 }
 0x243   :  { %v3297_v58 = vpop.f32.mrf.mxu1  ;;  %v3010_v59 = vpop.f32.mrf.mxu0 }
 0x244   :  { %v3298_v61 = vadd.f32 %v3297_v58, %v3008_v57  ;;  %3918 = vst [vmem:[%s6404_s4 + $0xf8] sm:$0xff] %v3790_v60 }
 0x245   :  { %v3299_v62 = vpop.f32.mrf.mxu1  ;;  %v3011_v63 = vpop.f32.mrf.mxu0 }
 0x246   :  { %v3792_v3 = vadd.f32 %v6061_v2, %v3298_v61 }
 0x247   :  { %v3300_v1 = vpop.f32.mrf.mxu1  ;;  %v3013_v37 = vpop.f32.mrf.mxu0 }
 0x248   :  { %v3301_v4 = vadd.f32 %v3300_v1, %v3011_v63  ;;  %3920 = vst [vmem:[%s6404_s4 + $0x108] sm:$0xff] %v3792_v3 }
 0x249   :  { %v3302_v5 = vpop.f32.mrf.mxu1  ;;  %v3016_v47 = vpop.f32.mrf.mxu0 }
 0x24a   :  { %v3794_v8 = vadd.f32 %v6061_v2, %v3301_v4 }
 0x24b   :  { %v3305_v6 = vpop.f32.mrf.mxu1  ;;  %v3018_v7 = vpop.f32.mrf.mxu0 }
 0x24c   :  { %v3306_v9 = vadd.f32 %v3305_v6, %v3016_v47  ;;  %3922 = vst [vmem:[%s6404_s4 + $0x118] sm:$0xff] %v3794_v8 }
 0x24d   :  { %v3307_v10 = vpop.f32.mrf.mxu1  ;;  %v3019_v11 = vpop.f32.mrf.mxu0 }
 0x24e   :  { %v3796_v14 = vadd.f32 %v6061_v2, %v3306_v9 }
 0x24f   :  { %v3308_v12 = vpop.f32.mrf.mxu1  ;;  %v3021_v13 = vpop.f32.mrf.mxu0 }
 0x250   :  { %v3309_v15 = vadd.f32 %v3308_v12, %v3019_v11  ;;  %3924 = vst [vmem:[%s6404_s4 + $0x128] sm:$0xff] %v3796_v14 }
 0x251   :  { %v3310_v16 = vpop.f32.mrf.mxu1  ;;  %v3024_v17 = vpop.f32.mrf.mxu0 }
 0x252   :  { %v3798_v20 = vadd.f32 %v6061_v2, %v3309_v15 }
 0x253   :  { %v3313_v18 = vpop.f32.mrf.mxu1  ;;  %v3026_v19 = vpop.f32.mrf.mxu0 }
 0x254   :  { %v3314_v21 = vadd.f32 %v3313_v18, %v3024_v17  ;;  %3926 = vst [vmem:[%s6404_s4 + $0x138] sm:$0xff] %v3798_v20 }
 0x255   :  { %v3315_v22 = vpop.f32.mrf.mxu1  ;;  %v3027_v23 = vpop.f32.mrf.mxu0 }
 0x256   :  { %v3800_v26 = vadd.f32 %v6061_v2, %v3314_v21 }
 0x257   :  { %v3316_v24 = vpop.f32.mrf.mxu1  ;;  %v3029_v25 = vpop.f32.mrf.mxu0 }
 0x258   :  { %v3317_v27 = vadd.f32 %v3316_v24, %v3027_v23  ;;  %3928 = vst [vmem:[%s6404_s4 + $0x148] sm:$0xff] %v3800_v26 }
 0x259   :  { %v3318_v28 = vpop.f32.mrf.mxu1  ;;  %v3032_v29 = vpop.f32.mrf.mxu0 }
 0x25a   :  { %v3802_v32 = vadd.f32 %v6061_v2, %v3317_v27 }
 0x25b   :  { %v3321_v30 = vpop.f32.mrf.mxu1  ;;  %v3034_v31 = vpop.f32.mrf.mxu0 }
 0x25c   :  { %v3322_v33 = vadd.f32 %v3321_v30, %v3032_v29  ;;  %3930 = vst [vmem:[%s6404_s4 + $0x158] sm:$0xff] %v3802_v32 }
 0x25d   :  { %v3323_v34 = vpop.f32.mrf.mxu1  ;;  %v3035_v35 = vpop.f32.mrf.mxu0 }
 0x25e   :  { %v3804_v39 = vadd.f32 %v6061_v2, %v3322_v33 }
 0x25f   :  { %v3324_v36 = vpop.f32.mrf.mxu1  ;;  %v3037_v38 = vpop.f32.mrf.mxu0 }
 0x260   :  { %v3325_v0 = vadd.f32 %v3324_v36, %v3035_v35  ;;  %3932 = vst [vmem:[%s6404_s4 + $0x168] sm:$0xff] %v3804_v39 }
 0x261   :  { %v3326_v40 = vpop.f32.mrf.mxu1  ;;  %v3040_v41 = vpop.f32.mrf.mxu0 }
 0x262   :  { %v3806_v44 = vadd.f32 %v6061_v2, %v3325_v0 }
 0x263   :  { %v3329_v42 = vpop.f32.mrf.mxu1  ;;  %v3042_v43 = vpop.f32.mrf.mxu0 }
 0x264   :  { %v3330_v45 = vadd.f32 %v3329_v42, %v3040_v41  ;;  %3934 = vst [vmem:[%s6404_s4 + $0x178] sm:$0xff] %v3806_v44 }
 0x265   :  { %v3331_v46 = vpop.f32.mrf.mxu1  ;;  %v3043_v48 = vpop.f32.mrf.mxu0 }
 0x266   :  { %v3808_v51 = vadd.f32 %v6061_v2, %v3330_v45 }
 0x267   :  { %v3332_v49 = vpop.f32.mrf.mxu1  ;;  %v3045_v50 = vpop.f32.mrf.mxu0 }
 0x268   :  { %v3333_v52 = vadd.f32 %v3332_v49, %v3043_v48  ;;  %3936 = vst [vmem:[%s6404_s4 + $0x188] sm:$0xff] %v3808_v51 }
 0x269   :  { %v3334_v53 = vpop.f32.mrf.mxu1  ;;  %v3048_v54 = vpop.f32.mrf.mxu0 }
 0x26a   :  { %v3810_v57 = vadd.f32 %v6061_v2, %v3333_v52 }
 0x26b   :  { %v3337_v55 = vpop.f32.mrf.mxu1  ;;  %v3050_v56 = vpop.f32.mrf.mxu0 }
 0x26c   :  { %v3338_v58 = vadd.f32 %v3337_v55, %v3048_v54  ;;  %3938 = vst [vmem:[%s6404_s4 + $0x198] sm:$0xff] %v3810_v57 }
 0x26d   :  { %v3339_v59 = vpop.f32.mrf.mxu1  ;;  %v3051_v60 = vpop.f32.mrf.mxu0 }
 0x26e   :  { %v3812_v63 = vadd.f32 %v6061_v2, %v3338_v58 }
 0x26f   :  { %v3340_v61 = vpop.f32.mrf.mxu1  ;;  %v3053_v62 = vpop.f32.mrf.mxu0 }
 0x270   :  { %v3341_v1 = vadd.f32 %v3340_v61, %v3051_v60  ;;  %3940 = vst [vmem:[%s6404_s4 + $0x1a8] sm:$0xff] %v3812_v63 }
 0x271   :  { %v3342_v37 = vpop.f32.mrf.mxu1  ;;  %v3056_v3 = vpop.f32.mrf.mxu0 }
 0x272   :  { %v3814_v47 = vadd.f32 %v6061_v2, %v3341_v1 }
 0x273   :  { %v3345_v4 = vpop.f32.mrf.mxu1  ;;  %v3058_v5 = vpop.f32.mrf.mxu0 }
 0x274   :  { %v3346_v6 = vadd.f32 %v3345_v4, %v3056_v3  ;;  %3942 = vst [vmem:[%s6404_s4 + $0x1b8] sm:$0xff] %v3814_v47 }
 0x275   :  { %v3347_v7 = vpop.f32.mrf.mxu1  ;;  %v3059_v8 = vpop.f32.mrf.mxu0 }
 0x276   :  { %v3816_v11 = vadd.f32 %v6061_v2, %v3346_v6 }
 0x277   :  { %v3348_v9 = vpop.f32.mrf.mxu1  ;;  %v3061_v10 = vpop.f32.mrf.mxu0 }
 0x278   :  { %v3349_v12 = vadd.f32 %v3348_v9, %v3059_v8  ;;  %3944 = vst [vmem:[%s6404_s4 + $0x1c8] sm:$0xff] %v3816_v11 }
 0x279   :  { %v3350_v13 = vpop.f32.mrf.mxu1  ;;  %v3064_v14 = vpop.f32.mrf.mxu0 }
 0x27a   :  { %v3818_v17 = vadd.f32 %v6061_v2, %v3349_v12 }
 0x27b   :  { %v3353_v15 = vpop.f32.mrf.mxu1  ;;  %v3066_v16 = vpop.f32.mrf.mxu0 }
 0x27c   :  { %v3354_v18 = vadd.f32 %v3353_v15, %v3064_v14  ;;  %3946 = vst [vmem:[%s6404_s4 + $0x1d8] sm:$0xff] %v3818_v17 }
 0x27d   :  { %v3355_v19 = vpop.f32.mrf.mxu1  ;;  %v3067_v20 = vpop.f32.mrf.mxu0 }
 0x27e   :  { %v3820_v23 = vadd.f32 %v6061_v2, %v3354_v18 }
 0x27f   :  { %v3356_v21 = vpop.f32.mrf.mxu1  ;;  %v3069_v22 = vpop.f32.mrf.mxu0 }
 0x280   :  { %v3357_v24 = vadd.f32 %v3356_v21, %v3067_v20  ;;  %3948 = vst [vmem:[%s6404_s4 + $0x1e8] sm:$0xff] %v3820_v23 }
 0x281   :  { %v3358_v25 = vpop.f32.mrf.mxu1  ;;  %v3072_v26 = vpop.f32.mrf.mxu0 }
 0x282   :  { %v3822_v29 = vadd.f32 %v6061_v2, %v3357_v24 }
 0x283   :  { %v3361_v27 = vpop.f32.mrf.mxu1  ;;  %v3074_v28 = vpop.f32.mrf.mxu0 }
 0x284   :  { %v3362_v30 = vadd.f32 %v3361_v27, %v3072_v26  ;;  %3950 = vst [vmem:[%s6404_s4 + $0x1f8] sm:$0xff] %v3822_v29 }
 0x285   :  { %v3363_v31 = vpop.f32.mrf.mxu1  ;;  %v3075_v32 = vpop.f32.mrf.mxu0 }
 0x286   :  { %v3824_v35 = vadd.f32 %v6061_v2, %v3362_v30 }
 0x287   :  { %v3364_v33 = vpop.f32.mrf.mxu1  ;;  %v3077_v34 = vpop.f32.mrf.mxu0 }
 0x288   :  { %v3365_v36 = vadd.f32 %v3364_v33, %v3075_v32  ;;  %3952 = vst [vmem:[%s6404_s4 + $0x208] sm:$0xff] %v3824_v35 }
 0x289   :  { %v3366_v38 = vpop.f32.mrf.mxu1  ;;  %v3080_v39 = vpop.f32.mrf.mxu0 }
 0x28a   :  { %v3826_v41 = vadd.f32 %v6061_v2, %v3365_v36 }
 0x28b   :  { %v3369_v0 = vpop.f32.mrf.mxu1  ;;  %v3082_v40 = vpop.f32.mrf.mxu0 }
 0x28c   :  { %v3370_v42 = vadd.f32 %v3369_v0, %v3080_v39  ;;  %3954 = vst [vmem:[%s6404_s4 + $0x218] sm:$0xff] %v3826_v41 }
 0x28d   :  { %v3371_v43 = vpop.f32.mrf.mxu1  ;;  %v3083_v44 = vpop.f32.mrf.mxu0 }
 0x28e   :  { %v3828_v48 = vadd.f32 %v6061_v2, %v3370_v42 }
 0x28f   :  { %v3372_v45 = vpop.f32.mrf.mxu1  ;;  %v3085_v46 = vpop.f32.mrf.mxu0 }
 0x290   :  { %v3373_v49 = vadd.f32 %v3372_v45, %v3083_v44  ;;  %3956 = vst [vmem:[%s6404_s4 + $0x228] sm:$0xff] %v3828_v48 }
 0x291   :  { %v3374_v50 = vpop.f32.mrf.mxu1  ;;  %v3088_v51 = vpop.f32.mrf.mxu0 }
 0x292   :  { %v3830_v54 = vadd.f32 %v6061_v2, %v3373_v49 }
 0x293   :  { %v3377_v52 = vpop.f32.mrf.mxu1  ;;  %v3090_v53 = vpop.f32.mrf.mxu0 }
 0x294   :  { %v3378_v55 = vadd.f32 %v3377_v52, %v3088_v51  ;;  %3958 = vst [vmem:[%s6404_s4 + $0x238] sm:$0xff] %v3830_v54 }
 0x295   :  { %v3379_v56 = vpop.f32.mrf.mxu1  ;;  %v3091_v57 = vpop.f32.mrf.mxu0 }
 0x296   :  { %v3832_v60 = vadd.f32 %v6061_v2, %v3378_v55 }
 0x297   :  { %v3380_v58 = vpop.f32.mrf.mxu1  ;;  %v3093_v59 = vpop.f32.mrf.mxu0 }
 0x298   :  { %v3381_v61 = vadd.f32 %v3380_v58, %v3091_v57  ;;  %3960 = vst [vmem:[%s6404_s4 + $0x248] sm:$0xff] %v3832_v60 }
 0x299   :  { %v3382_v62 = vpop.f32.mrf.mxu1  ;;  %v3096_v63 = vpop.f32.mrf.mxu0 }
 0x29a   :  { %v3834_v3 = vadd.f32 %v6061_v2, %v3381_v61 }
 0x29b   :  { %v3385_v1 = vpop.f32.mrf.mxu1  ;;  %v3098_v37 = vpop.f32.mrf.mxu0 }
 0x29c   :  { %v3386_v4 = vadd.f32 %v3385_v1, %v3096_v63  ;;  %3962 = vst [vmem:[%s6404_s4 + $0x258] sm:$0xff] %v3834_v3 }
 0x29d   :  { %v3387_v5 = vpop.f32.mrf.mxu1  ;;  %v3099_v47 = vpop.f32.mrf.mxu0 }
 0x29e   :  { %v3836_v8 = vadd.f32 %v6061_v2, %v3386_v4 }
 0x29f   :  { %v3388_v6 = vpop.f32.mrf.mxu1  ;;  %v3101_v7 = vpop.f32.mrf.mxu0 }
 0x2a0   :  { %v3389_v9 = vadd.f32 %v3388_v6, %v3099_v47  ;;  %3964 = vst [vmem:[%s6404_s4 + $0x268] sm:$0xff] %v3836_v8 }
 0x2a1   :  { %v3390_v10 = vpop.f32.mrf.mxu1  ;;  %v3104_v11 = vpop.f32.mrf.mxu0 }
 0x2a2   :  { %v3838_v14 = vadd.f32 %v6061_v2, %v3389_v9 }
 0x2a3   :  { %v3393_v12 = vpop.f32.mrf.mxu1  ;;  %v3106_v13 = vpop.f32.mrf.mxu0 }
 0x2a4   :  { %v3394_v15 = vadd.f32 %v3393_v12, %v3104_v11  ;;  %3966 = vst [vmem:[%s6404_s4 + $0x278] sm:$0xff] %v3838_v14 }
 0x2a5   :  { %v3395_v16 = vpop.f32.mrf.mxu1  ;;  %v3107_v17 = vpop.f32.mrf.mxu0 }
 0x2a6   :  { %v3840_v20 = vadd.f32 %v6061_v2, %v3394_v15 }
 0x2a7   :  { %v3396_v18 = vpop.f32.mrf.mxu1  ;;  %v3109_v19 = vpop.f32.mrf.mxu0 }
 0x2a8   :  { %v3397_v21 = vadd.f32 %v3396_v18, %v3107_v17  ;;  %3968 = vst [vmem:[%s6404_s4 + $0x288] sm:$0xff] %v3840_v20 }
 0x2a9   :  { %v3398_v22 = vpop.f32.mrf.mxu1  ;;  %v3112_v23 = vpop.f32.mrf.mxu0 }
 0x2aa   :  { %v3842_v26 = vadd.f32 %v6061_v2, %v3397_v21 }
 0x2ab   :  { %v3401_v24 = vpop.f32.mrf.mxu1  ;;  %v3114_v25 = vpop.f32.mrf.mxu0 }
 0x2ac   :  { %v3402_v27 = vadd.f32 %v3401_v24, %v3112_v23  ;;  %3970 = vst [vmem:[%s6404_s4 + $0x298] sm:$0xff] %v3842_v26 }
 0x2ad   :  { %v3403_v28 = vpop.f32.mrf.mxu1  ;;  %v3115_v29 = vpop.f32.mrf.mxu0 }
 0x2ae   :  { %v3844_v32 = vadd.f32 %v6061_v2, %v3402_v27 }
 0x2af   :  { %v3404_v30 = vpop.f32.mrf.mxu1  ;;  %v3117_v31 = vpop.f32.mrf.mxu0 }
 0x2b0   :  { %v3405_v33 = vadd.f32 %v3404_v30, %v3115_v29  ;;  %3972 = vst [vmem:[%s6404_s4 + $0x2a8] sm:$0xff] %v3844_v32 }
 0x2b1   :  { %v3406_v34 = vpop.f32.mrf.mxu1  ;;  %v3120_v35 = vpop.f32.mrf.mxu0 }
 0x2b2   :  { %v3846_v39 = vadd.f32 %v6061_v2, %v3405_v33 }
 0x2b3   :  { %v3409_v36 = vpop.f32.mrf.mxu1  ;;  %v3122_v38 = vpop.f32.mrf.mxu0 }
 0x2b4   :  { %v3410_v0 = vadd.f32 %v3409_v36, %v3120_v35  ;;  %3974 = vst [vmem:[%s6404_s4 + $0x2b8] sm:$0xff] %v3846_v39 }
 0x2b5   :  { %v3411_v40 = vpop.f32.mrf.mxu1  ;;  %v3123_v41 = vpop.f32.mrf.mxu0 }
 0x2b6   :  { %v3848_v44 = vadd.f32 %v6061_v2, %v3410_v0 }
 0x2b7   :  { %v3412_v42 = vpop.f32.mrf.mxu1  ;;  %v3125_v43 = vpop.f32.mrf.mxu0 }
 0x2b8   :  { %v3413_v45 = vadd.f32 %v3412_v42, %v3123_v41  ;;  %3976 = vst [vmem:[%s6404_s4 + $0x2c8] sm:$0xff] %v3848_v44 }
 0x2b9   :  { %v3414_v46 = vpop.f32.mrf.mxu1  ;;  %v3128_v48 = vpop.f32.mrf.mxu0 }
 0x2ba   :  { %v3850_v51 = vadd.f32 %v6061_v2, %v3413_v45 }
 0x2bb   :  { %v3417_v49 = vpop.f32.mrf.mxu1  ;;  %v3130_v50 = vpop.f32.mrf.mxu0 }
 0x2bc   :  { %v3418_v52 = vadd.f32 %v3417_v49, %v3128_v48  ;;  %3978 = vst [vmem:[%s6404_s4 + $0x2d8] sm:$0xff] %v3850_v51 }
 0x2bd   :  { %v3419_v53 = vpop.f32.mrf.mxu1  ;;  %v3131_v54 = vpop.f32.mrf.mxu0 }
 0x2be   :  { %v3852_v57 = vadd.f32 %v6061_v2, %v3418_v52 }
 0x2bf   :  { %v3420_v55 = vpop.f32.mrf.mxu1  ;;  %v3133_v56 = vpop.f32.mrf.mxu0 }
 0x2c0   :  { %v3421_v58 = vadd.f32 %v3420_v55, %v3131_v54  ;;  %3980 = vst [vmem:[%s6404_s4 + $0x2e8] sm:$0xff] %v3852_v57 }
 0x2c1   :  { %v3422_v59 = vpop.f32.mrf.mxu1  ;;  %v3136_v60 = vpop.f32.mrf.mxu0 }
 0x2c2   :  { %v3854_v63 = vadd.f32 %v6061_v2, %v3421_v58 }
 0x2c3   :  { %v3425_v61 = vpop.f32.mrf.mxu1  ;;  %v3138_v62 = vpop.f32.mrf.mxu0 }
 0x2c4   :  { %v3426_v1 = vadd.f32 %v3425_v61, %v3136_v60  ;;  %3982 = vst [vmem:[%s6404_s4 + $0x2f8] sm:$0xff] %v3854_v63 }
 0x2c5   :  { %v3427_v37 = vpop.f32.mrf.mxu1  ;;  %v3139_v3 = vpop.f32.mrf.mxu0 }
 0x2c6   :  { %v3856_v47 = vadd.f32 %v6061_v2, %v3426_v1 }
 0x2c7   :  { %v3428_v4 = vpop.f32.mrf.mxu1  ;;  %v3141_v5 = vpop.f32.mrf.mxu0 }
 0x2c8   :  { %v3429_v6 = vadd.f32 %v3428_v4, %v3139_v3  ;;  %3984 = vst [vmem:[%s6404_s4 + $0x308] sm:$0xff] %v3856_v47 }
 0x2c9   :  { %v3430_v7 = vpop.f32.mrf.mxu1  ;;  %v3144_v8 = vpop.f32.mrf.mxu0 }
 0x2ca   :  { %v3858_v11 = vadd.f32 %v6061_v2, %v3429_v6 }
 0x2cb   :  { %v3433_v9 = vpop.f32.mrf.mxu1  ;;  %v3146_v10 = vpop.f32.mrf.mxu0 }
 0x2cc   :  { %v3434_v12 = vadd.f32 %v3433_v9, %v3144_v8  ;;  %3986 = vst [vmem:[%s6404_s4 + $0x318] sm:$0xff] %v3858_v11 }
 0x2cd   :  { %v3435_v13 = vpop.f32.mrf.mxu1  ;;  %v3147_v14 = vpop.f32.mrf.mxu0 }
 0x2ce   :  { %v3860_v17 = vadd.f32 %v6061_v2, %v3434_v12 }
 0x2cf   :  { %v3436_v15 = vpop.f32.mrf.mxu1  ;;  %v3149_v16 = vpop.f32.mrf.mxu0 }
 0x2d0   :  { %v3437_v18 = vadd.f32 %v3436_v15, %v3147_v14  ;;  %3988 = vst [vmem:[%s6404_s4 + $0x328] sm:$0xff] %v3860_v17 }
 0x2d1   :  { %v3438_v19 = vpop.f32.mrf.mxu1  ;;  %v3152_v20 = vpop.f32.mrf.mxu0 }
 0x2d2   :  { %v3862_v23 = vadd.f32 %v6061_v2, %v3437_v18 }
 0x2d3   :  { %v3441_v21 = vpop.f32.mrf.mxu1  ;;  %v3154_v22 = vpop.f32.mrf.mxu0 }
 0x2d4   :  { %v3442_v24 = vadd.f32 %v3441_v21, %v3152_v20  ;;  %3990 = vst [vmem:[%s6404_s4 + $0x338] sm:$0xff] %v3862_v23 }
 0x2d5   :  { %v3443_v25 = vpop.f32.mrf.mxu1  ;;  %v3155_v26 = vpop.f32.mrf.mxu0 }
 0x2d6   :  { %v3864_v29 = vadd.f32 %v6061_v2, %v3442_v24 }
 0x2d7   :  { %v3444_v27 = vpop.f32.mrf.mxu1  ;;  %v3157_v28 = vpop.f32.mrf.mxu0 }
 0x2d8   :  { %v3445_v30 = vadd.f32 %v3444_v27, %v3155_v26  ;;  %3992 = vst [vmem:[%s6404_s4 + $0x348] sm:$0xff] %v3864_v29 }
 0x2d9   :  { %v3446_v31 = vpop.f32.mrf.mxu1  ;;  %v3160_v32 = vpop.f32.mrf.mxu0 }
 0x2da   :  { %v3866_v35 = vadd.f32 %v6061_v2, %v3445_v30 }
 0x2db   :  { %v3449_v33 = vpop.f32.mrf.mxu1  ;;  %v3162_v34 = vpop.f32.mrf.mxu0 }
 0x2dc   :  { %v3450_v36 = vadd.f32 %v3449_v33, %v3160_v32  ;;  %3994 = vst [vmem:[%s6404_s4 + $0x358] sm:$0xff] %v3866_v35 }
 0x2dd   :  { %v3451_v38 = vpop.f32.mrf.mxu1  ;;  %v3163_v39 = vpop.f32.mrf.mxu0 }
 0x2de   :  { %v3868_v41 = vadd.f32 %v6061_v2, %v3450_v36 }
 0x2df   :  { %v3452_v0 = vpop.f32.mrf.mxu1  ;;  %v3165_v40 = vpop.f32.mrf.mxu0 }
 0x2e0   :  { %v3453_v42 = vadd.f32 %v3452_v0, %v3163_v39  ;;  %3996 = vst [vmem:[%s6404_s4 + $0x368] sm:$0xff] %v3868_v41 }
 0x2e1   :  { %v3454_v43 = vpop.f32.mrf.mxu1  ;;  %v3168_v44 = vpop.f32.mrf.mxu0 }
 0x2e2   :  { %v3870_v48 = vadd.f32 %v6061_v2, %v3453_v42 }
 0x2e3   :  { %v3457_v45 = vpop.f32.mrf.mxu1  ;;  %v3170_v46 = vpop.f32.mrf.mxu0 }
 0x2e4   :  { %v3458_v49 = vadd.f32 %v3457_v45, %v3168_v44  ;;  %3998 = vst [vmem:[%s6404_s4 + $0x378] sm:$0xff] %v3870_v48 }
 0x2e5   :  { %v3459_v50 = vpop.f32.mrf.mxu1  ;;  %v3171_v51 = vpop.f32.mrf.mxu0 }
 0x2e6   :  { %v3872_v54 = vadd.f32 %v6061_v2, %v3458_v49 }
 0x2e7   :  { %v3460_v52 = vpop.f32.mrf.mxu1  ;;  %v3173_v53 = vpop.f32.mrf.mxu0 }
 0x2e8   :  { %v3461_v55 = vadd.f32 %v3460_v52, %v3171_v51  ;;  %4000 = vst [vmem:[%s6404_s4 + $0x388] sm:$0xff] %v3872_v54 }
 0x2e9   :  { %v3462_v56 = vpop.f32.mrf.mxu1  ;;  %v3176_v57 = vpop.f32.mrf.mxu0 }
 0x2ea   :  { %v3874_v60 = vadd.f32 %v6061_v2, %v3461_v55 }
 0x2eb   :  { %v3465_v58 = vpop.f32.mrf.mxu1  ;;  %v3178_v59 = vpop.f32.mrf.mxu0 }
 0x2ec   :  { %v3466_v61 = vadd.f32 %v3465_v58, %v3176_v57  ;;  %4002 = vst [vmem:[%s6404_s4 + $0x398] sm:$0xff] %v3874_v60 }
 0x2ed   :  { %v3467_v62 = vpop.f32.mrf.mxu1  ;;  %v3179_v63 = vpop.f32.mrf.mxu0 }
 0x2ee   :  { %v3876_v3 = vadd.f32 %v6061_v2, %v3466_v61 }
 0x2ef   :  { %v3468_v1 = vpop.f32.mrf.mxu1  ;;  %v3181_v37 = vpop.f32.mrf.mxu0 }
 0x2f0   :  { %v3469_v4 = vadd.f32 %v3468_v1, %v3179_v63  ;;  %4004 = vst [vmem:[%s6404_s4 + $0x3a8] sm:$0xff] %v3876_v3 }
 0x2f1   :  { %v3470_v5 = vpop.f32.mrf.mxu1  ;;  %v3184_v47 = vpop.f32.mrf.mxu0 }
 0x2f2   :  { %v3878_v8 = vadd.f32 %v6061_v2, %v3469_v4 }
 0x2f3   :  { %v3473_v6 = vpop.f32.mrf.mxu1  ;;  %v3186_v7 = vpop.f32.mrf.mxu0 }
 0x2f4   :  { %v3474_v9 = vadd.f32 %v3473_v6, %v3184_v47  ;;  %4006 = vst [vmem:[%s6404_s4 + $0x3b8] sm:$0xff] %v3878_v8 }
 0x2f5   :  { %v3475_v10 = vpop.f32.mrf.mxu1  ;;  %v3187_v11 = vpop.f32.mrf.mxu0 }
 0x2f6   :  { %v3880_v14 = vadd.f32 %v6061_v2, %v3474_v9 }
 0x2f7   :  { %v3476_v12 = vpop.f32.mrf.mxu1  ;;  %v3189_v13 = vpop.f32.mrf.mxu0 }
 0x2f8   :  { %v3477_v15 = vadd.f32 %v3476_v12, %v3187_v11  ;;  %4008 = vst [vmem:[%s6404_s4 + $0x3c8] sm:$0xff] %v3880_v14 }
 0x2f9   :  { %v3478_v16 = vpop.f32.mrf.mxu1  ;;  %v3192_v17 = vpop.f32.mrf.mxu0 }
 0x2fa   :  { %v3882_v20 = vadd.f32 %v6061_v2, %v3477_v15 }
 0x2fb   :  { %v3481_v18 = vpop.f32.mrf.mxu1  ;;  %v3194_v19 = vpop.f32.mrf.mxu0 }
 0x2fc   :  { %v3482_v21 = vadd.f32 %v3481_v18, %v3192_v17  ;;  %4010 = vst [vmem:[%s6404_s4 + $0x3d8] sm:$0xff] %v3882_v20 }
 0x2fd   :  { %v3483_v22 = vpop.f32.mrf.mxu1  ;;  %v3195_v23 = vpop.f32.mrf.mxu0 }
 0x2fe   :  { %v3884_v26 = vadd.f32 %v6061_v2, %v3482_v21 }
 0x2ff   :  { %v3484_v24 = vpop.f32.mrf.mxu1  ;;  %v3197_v25 = vpop.f32.mrf.mxu0 }
 0x300   :  { %v3485_v27 = vadd.f32 %v3484_v24, %v3195_v23  ;;  %4012 = vst [vmem:[%s6404_s4 + $0x3e8] sm:$0xff] %v3884_v26 }
 0x301   :  { %v3486_v28 = vpop.f32.mrf.mxu1 }
 0x302   :  { %v3886_v29 = vadd.f32 %v6061_v2, %v3485_v27 }
 0x304   :  { %4014 = vst [vmem:[%s6404_s4 + $0x3f8] sm:$0xff] %v3886_v29 }

</bundles_post_ra>
